<compile_context>
chip_gen: v7x
topology: tpu7x:2x2x1
jax: 0.10.0
libtpu: 0.0.40
codegen_flags: <defaults>
</compile_context>

<pallas_src>
import jax
import jax.numpy as jnp
from jax.experimental import pallas as pl
from jax.experimental.pallas import tpu as pltpu


# ---------------------------------------------------------------------------
# Fused "2x2-tap stride-1 conv + bias + activation" Pallas kernel.
# Encoder convs (space-to-depth'd) and decoder transposed convs (parity-decomposed)
# both lower to this single kernel.
# ---------------------------------------------------------------------------
def _make_tap_conv_kernel(th, ws, k, d, act):
    """th: output rows per grid step; ws: padded row width; act: 'relu'|'sigmoid'|None."""
    m = th * ws  # flattened MXU M dimension for this tile

    def kernel(xm_ref, xh_ref, w_ref, b_ref, o_ref):
        # xm_ref: [TH, Ws, K]  main input rows (rows h*TH .. h*TH+TH-1)
        # xh_ref: [Ws, K]      halo row (row h*TH + TH)
        # w_ref : [4, K, D]    packed tap weights, bf16, VMEM-resident across the grid
        # b_ref : [1, D]       f32 bias
        # o_ref : [TH, Ws, D]  column Ws-1 of each row is junk (ignored by consumers)

        # Flatten (TH, Ws) into one matmul M axis; append the halo row plus one zero row
        # so all four flat-shifted tap views are in range.
        xm = xm_ref[...].reshape(m, k)
        xh = xh_ref[...]
        zrow = jnp.zeros((1, k), dtype=xm.dtype)
        x_full = jnp.concatenate([xm, xh, zrow], axis=0)          # [m + ws + 1, K]

        # Four big tap matmuls with f32 accumulation; flat offsets 0, 1, Ws, Ws+1 pick
        # input pixels (r, c), (r, c+1), (r+1, c), (r+1, c+1).  Offsets that run past a
        # row's end only pollute the junk column c == Ws-1.
        acc = jnp.dot(x_full[0:m], w_ref[0], preferred_element_type=jnp.float32)
        acc = acc + jnp.dot(x_full[1:m + 1], w_ref[1], preferred_element_type=jnp.float32)
        acc = acc + jnp.dot(x_full[ws:m + ws], w_ref[2], preferred_element_type=jnp.float32)
        acc = acc + jnp.dot(x_full[ws + 1:m + ws + 1], w_ref[3],
                            preferred_element_type=jnp.float32)
        acc = acc + b_ref[...].astype(jnp.float32)                # single broadcast add

        if act == "relu":
            acc = jnp.maximum(acc, 0.0)
        elif act == "sigmoid":
            # exp and approx-reciprocal both run on the EUP (frees VALU slots).
            acc = pl.reciprocal(1.0 + jnp.exp(-acc), approx=True)

        o_ref[...] = acc.astype(o_ref.dtype).reshape(th, ws, d)   # one store per tile

    return kernel


def _pick_th(ho, ws, k, d, out_itemsize, max_th, budget_bytes=8 * 1024 * 1024):
    """Largest divisor of `ho` (<= max_th) whose per-step buffers fit the VMEM budget."""
    best = 1
    for th in range(1, min(ho, max_th) + 1):
        if ho % th:
            continue
        m = th * ws
        vmem = 2 * ((m + ws) * k * 2 + m * d * out_itemsize)      # double-buffered blocks
        vmem += 4 * k * d * 2 + 4 * d                             # resident weights + bias
        vmem += (m + ws + 1) * k * 2 + m * d * 4                  # in-kernel copy + f32 acc
        if vmem <= budget_bytes:
            best = th
    return best


def _fused_tap_conv(xs, w_taps, bias, *, act, out_dtype):
    """xs: [N, Hs, Ws, K] bf16 (padded grid); w_taps: [4, K, D] bf16; bias: [D] f32.

    Returns [N, Ho, Ws, D] with Ho = Hs-1 and
      out[n, oh, ow, :] = act(sum_{th,tw in {0,1}} xs[n, oh+th, ow+tw, :] @ w_taps[2*th+tw] + bias)
    for ow < Ws-1; column Ws-1 holds junk and must be ignored by the consumer.
    """
    n, hs, ws, k = xs.shape
    t, k2, d = w_taps.shape
    assert t == 4 and k2 == k
    ho = hs - 1

    out_itemsize = jnp.dtype(out_dtype).itemsize
    # Keep >= 2 row blocks when there is only one image so both v7x cores get work.
    max_th = ho if n > 1 else max(1, ho // 2)
    th = _pick_th(ho, ws, k, d, out_itemsize, max_th)
    grid = (n, ho // th)

    kernel = _make_tap_conv_kernel(th, ws, k, d, act)
    bias2d = bias.reshape(1, d).astype(jnp.float32)

    in_specs = [
        pl.BlockSpec((None, th, ws, k), lambda i, h: (i, h, 0, 0)),           # main rows
        pl.BlockSpec((None, None, ws, k), lambda i, h: (i, (h + 1) * th, 0, 0)),  # halo row
        pl.BlockSpec((4, k, d), lambda i, h: (0, 0, 0)),                      # resident weights
        pl.BlockSpec((1, d), lambda i, h: (0, 0)),                            # bias
    ]
    out_specs = pl.BlockSpec((None, th, ws, d), lambda i, h: (i, h, 0, 0))

    return pl.pallas_call(
        kernel,
        grid=grid,
        in_specs=in_specs,
        out_specs=out_specs,
        out_shape=jax.ShapeDtypeStruct((n, ho, ws, d), out_dtype),
        compiler_params=pltpu.CompilerParams(
            dimension_semantics=("parallel", "parallel"),
            vmem_limit_bytes=32 * 1024 * 1024,
        ),
    )(xs, xs, w_taps, bias2d)


# ---------------------------------------------------------------------------
# Layout glue (one fused XLA pad/transpose per layer boundary; ~1x activation bytes).
# ---------------------------------------------------------------------------
def _s2d_input_nchw(x):
    """[N,C,H,W] -> pad 1 -> space-to-depth -> [N, H//2+1, W//2+1, 4C], channels (dh,dw,c)."""
    n, c, h, w = x.shape
    xp = jnp.pad(x, ((0, 0), (0, 0), (1, 1), (1, 1)))
    hs, ws = h // 2 + 1, w // 2 + 1
    return xp.reshape(n, c, hs, 2, ws, 2).transpose(0, 2, 4, 3, 5, 1).reshape(n, hs, ws, 4 * c)


def _s2d_mid(h_prev):
    """Padded-grid output [N, Ho, Wo+1, C] -> pad 1 + space-to-depth -> [N, Ho//2+1, Wo//2+1, 4C]."""
    n, ho, ws, c = h_prev.shape
    wo = ws - 1
    hp = jnp.pad(h_prev[:, :, :wo, :], ((0, 0), (1, 1), (1, 1), (0, 0)))
    hs2, ws2 = ho // 2 + 1, wo // 2 + 1
    return hp.reshape(n, hs2, 2, ws2, 2, c).transpose(0, 1, 3, 2, 4, 5).reshape(n, hs2, ws2, 4 * c)


def _endpad_mid(h_prev):
    """[N, Ho, Wo+1, C] (junk last col) -> end-pad -> [N, Ho+1, Wo+1, C] (zero last row/col)."""
    n, ho, ws, c = h_prev.shape
    return jnp.pad(h_prev[:, :, :ws - 1, :], ((0, 0), (0, 1), (0, 1), (0, 0)))


def _d2s_endpad(y_prev, c):
    """Parity-packed [N, Ho, Wo+1, 4C] -> depth-to-space + end-pad -> [N, 2Ho+1, 2Wo+1, C]."""
    n, ho, ws, _ = y_prev.shape
    wo = ws - 1
    y = y_prev[:, :, :wo, :].reshape(n, ho, wo, 2, 2, c)
    h3 = y.transpose(0, 1, 3, 2, 4, 5).reshape(n, 2 * ho, 2 * wo, c)
    return jnp.pad(h3, ((0, 0), (0, 1), (0, 1), (0, 0)))


def _d2s_to_nchw(y_prev, c):
    """Parity-packed [N, Ho, Wo+1, 4C] -> [N, C, 2Ho, 2Wo] NCHW."""
    n, ho, ws, _ = y_prev.shape
    wo = ws - 1
    y = y_prev[:, :, :wo, :].reshape(n, ho, wo, 2, 2, c)
    return y.transpose(0, 5, 1, 3, 2, 4).reshape(n, c, 2 * ho, 2 * wo)


# ---------------------------------------------------------------------------
# Weight packing (trace-time, tiny).
# ---------------------------------------------------------------------------
def _pack_encoder_weight(w):
    """PyTorch Conv2d weight [Cout, Cin, 3, 3] -> tap weights [4, 4*Cin, Cout].

    Tap (th, tw) multiplies s2d pixel (oh+th, ow+tw); its channel (dh, dw, ci)
    corresponds to original kernel index (kh, kw) = (2*th+dh, 2*tw+dw) (zero if > 2).
    """
    cout, cin = w.shape[0], w.shape[1]
    wt = jnp.zeros((2, 2, 2, 2, cin, cout), dtype=jnp.float32)  # (th, tw, dh, dw, ci, co)
    for t_h in range(2):
        for d_h in range(2):
            kh = 2 * t_h + d_h
            if kh > 2:
                continue
            for t_w in range(2):
                for d_w in range(2):
                    kw = 2 * t_w + d_w
                    if kw > 2:
                        continue
                    wt = wt.at[t_h, t_w, d_h, d_w].set(w[:, :, kh, kw].T)
    return wt.reshape(4, 4 * cin, cout)


def _pack_decoder_weight(w):
    """PyTorch ConvTranspose2d weight [Cin, Cout, 3, 3] -> tap weights [4, Cin, 4*Cout].

    Output parity dh: even rows (dh=0) use kh=1 from input row i (tap th=0);
    odd rows (dh=1) use kh=2 from row i (th=0) and kh=0 from row i+1 (th=1).
    Same for columns.  Output channels are packed as (dh, dw, co).
    """
    cin, cout = w.shape[0], w.shape[1]
    dk = {(0, 0): 1, (1, 0): 2, (1, 1): 0}  # (parity d, tap t) -> kernel index k
    wt = jnp.zeros((2, 2, cin, 2, 2, cout), dtype=jnp.float32)  # (th, tw, ci, dh, dw, co)
    for (d_h, t_h), kh in dk.items():
        for (d_w, t_w), kw in dk.items():
            wt = wt.at[t_h, t_w, :, d_h, d_w, :].set(w[:, :, kh, kw])
    return wt.reshape(4, cin, 4 * cout)


# ---------------------------------------------------------------------------
# Full forward pass (Pallas path).
# ---------------------------------------------------------------------------
def conv_autoencoder_forward(x, params):
    """x: [N, C, H, W] float32 (NCHW like PyTorch). Returns [N, C, H, W] float32."""
    n, c, h, w = x.shape
    assert h % 4 == 0 and w % 4 == 0, "spatial dims must be multiples of 4 for this autoencoder"

    cdt = jnp.bfloat16  # MXU input dtype; accumulation/epilogue stay f32.

    w_e1 = _pack_encoder_weight(params["enc1_w"]).astype(cdt)
    w_e2 = _pack_encoder_weight(params["enc2_w"]).astype(cdt)
    w_d1 = _pack_decoder_weight(params["dec1_w"]).astype(cdt)
    w_d2 = _pack_decoder_weight(params["dec2_w"]).astype(cdt)
    b_e1 = params["enc1_b"]
    b_e2 = params["enc2_b"]
    b_d1 = jnp.tile(params["dec1_b"], 4)  # replicated over the 4 output parities
    b_d2 = jnp.tile(params["dec2_b"], 4)

    xb = x.astype(cdt)

    # ---- encoder ----
    h1 = _fused_tap_conv(_s2d_input_nchw(xb), w_e1, b_e1, act="relu", out_dtype=cdt)
    h2 = _fused_tap_conv(_s2d_mid(h1), w_e2, b_e2, act="relu", out_dtype=cdt)
    # ---- decoder ----
    h3 = _fused_tap_conv(_endpad_mid(h2), w_d1, b_d1, act="relu", out_dtype=cdt)
    h4 = _fused_tap_conv(_d2s_endpad(h3, 64), w_d2, b_d2, act="sigmoid", out_dtype=jnp.float32)
    return _d2s_to_nchw(h4, c)


# ---------------------------------------------------------------------------
# Pure-JAX reference (f32) matching PyTorch semantics, for the self-check.
# ---------------------------------------------------------------------------
def _conv2d_ref(x, w, b, stride, padding):
    out = jax.lax.conv_general_dilated(
        x, w, window_strides=(stride, stride),
        padding=((padding, padding), (padding, padding)),
        dimension_numbers=("NCHW", "OIHW", "NCHW"))
    return out + b[None, :, None, None]


def _conv_transpose2d_ref(x, w, b, stride, padding, output_padding):
    kh, kw = w.shape[2], w.shape[3]
    w_conv = jnp.flip(w, axis=(2, 3)).transpose(1, 0, 2, 3)  # -> [Cout, Cin, kh, kw]
    pad_h = (kh - 1 - padding, kh - 1 - padding + output_padding)
    pad_w = (kw - 1 - padding, kw - 1 - padding + output_padding)
    out = jax.lax.conv_general_dilated(
        x, w_conv, window_strides=(1, 1),
        padding=(pad_h, pad_w), lhs_dilation=(stride, stride),
        dimension_numbers=("NCHW", "OIHW", "NCHW"))
    return out + b[None, :, None, None]


def reference_forward(x, params):
    h = jax.nn.relu(_conv2d_ref(x, params["enc1_w"], params["enc1_b"], 2, 1))
    h = jax.nn.relu(_conv2d_ref(h, params["enc2_w"], params["enc2_b"], 2, 1))
    h = jax.nn.relu(_conv_transpose2d_ref(h, params["dec1_w"], params["dec1_b"], 2, 1, 1))
    h = jax.nn.sigmoid(_conv_transpose2d_ref(h, params["dec2_w"], params["dec2_b"], 2, 1, 1))
    return h


if __name__ == "__main__":
    key = jax.random.PRNGKey(0)
    n, c, h, w = 2, 4, 16, 16
    ks = jax.random.split(key, 9)
    x = jax.random.uniform(ks[0], (n, c, h, w), jnp.float32)

    def _init(k, shape, fan_in):
        s = (6.0 / fan_in) ** 0.5  # He-uniform-ish, keeps activations O(1)
        return jax.random.uniform(k, shape, jnp.float32, -s, s)

    params = {
        "enc1_w": _init(ks[1], (64, c, 3, 3), c * 9),
        "enc1_b": _init(ks[2], (64,), c * 9),
        "enc2_w": _init(ks[3], (128, 64, 3, 3), 64 * 9),
        "enc2_b": _init(ks[4], (128,), 64 * 9),
        "dec1_w": _init(ks[5], (128, 64, 3, 3), 128 * 9),
        "dec1_b": _init(ks[6], (64,), 128 * 9),
        "dec2_w": _init(ks[7], (64, c, 3, 3), 64 * 9),
        "dec2_b": _init(ks[8], (c,), 64 * 9),
    }

    fwd = jax.jit(conv_autoencoder_forward)
    out = jax.block_until_ready(fwd(x, params))
    assert out.shape == (n, c, h, w), out.shape

    ref = jax.block_until_ready(reference_forward(x, params))
    err = float(jnp.max(jnp.abs(out - ref)))
    assert err < 8e-2, f"Pallas output deviates from reference: max abs err = {err}"

    print("KERNEL_OK")
</pallas_src>

<mosaic_0001>
module attributes {stable_mosaic.version = 11 : i64} {
  func.func @kernel(%arg0: i32, %arg1: i32, %arg2: memref<1x8x9x16xbf16, #tpu.memory_space<vmem>>, %arg3: memref<1x1x9x16xbf16, #tpu.memory_space<vmem>>, %arg4: memref<4x16x64xbf16, #tpu.memory_space<vmem>>, %arg5: memref<1x64xf32, #tpu.memory_space<vmem>>, %arg6: memref<1x8x9x64xbf16, #tpu.memory_space<vmem>>) attributes {dimension_semantics = [#tpu.dimension_semantics<parallel>, #tpu.dimension_semantics<parallel>], iteration_bounds = array<i64: 2, 1>, scalar_prefetch = 0 : i64, scratch_operands = 0 : i64, tpu.core_type = #tpu.core_type<tc>, window_params = [{transform_indices = @transform_0, window_bounds = array<i64: 1, 8, 9, 16>}, {transform_indices = @transform_1, window_bounds = array<i64: 1, 1, 9, 16>}, {pipeline_mode = #tpu.pipeline_mode<synchronous>, transform_indices = @transform_2, window_bounds = array<i64: 4, 16, 64>}, {pipeline_mode = #tpu.pipeline_mode<synchronous>, transform_indices = @transform_3, window_bounds = array<i64: 1, 64>}, {transform_indices = @transform_4, window_bounds = array<i64: 1, 8, 9, 64>}]} {
    %c0 = arith.constant 0 : index
    %c0_0 = arith.constant 0 : index
    %c0_1 = arith.constant 0 : index
    %c0_2 = arith.constant 0 : index
    %0 = vector.load %arg2[%c0, %c0_0, %c0_1, %c0_2] : memref<1x8x9x16xbf16, #tpu.memory_space<vmem>>, vector<1x8x9x16xbf16>
    %1 = vector.shape_cast %0 : vector<1x8x9x16xbf16> to vector<8x9x16xbf16>
    %2 = vector.shape_cast %1 : vector<8x9x16xbf16> to vector<72x16xbf16>
    %c0_3 = arith.constant 0 : index
    %c0_4 = arith.constant 0 : index
    %c0_5 = arith.constant 0 : index
    %c0_6 = arith.constant 0 : index
    %3 = vector.load %arg3[%c0_3, %c0_4, %c0_5, %c0_6] : memref<1x1x9x16xbf16, #tpu.memory_space<vmem>>, vector<1x1x9x16xbf16>
    %4 = vector.shape_cast %3 : vector<1x1x9x16xbf16> to vector<9x16xbf16>
    %cst = arith.constant 0.000000e+00 : bf16
    %5 = vector.broadcast %cst : bf16 to vector<1x16xbf16>
    %6 = tpu.concatenate %2, %4, %5 in 0 : vector<72x16xbf16>, vector<9x16xbf16>, vector<1x16xbf16> -> vector<82x16xbf16>
    %7 = vector.extract_strided_slice %6 {offsets = [0, 0], sizes = [72, 16], strides = [1, 1]} : vector<82x16xbf16> to vector<72x16xbf16>
    %c0_7 = arith.constant 0 : index
    %c0_8 = arith.constant 0 : index
    %c0_9 = arith.constant 0 : index
    %8 = vector.load %arg4[%c0_7, %c0_8, %c0_9] : memref<4x16x64xbf16, #tpu.memory_space<vmem>>, vector<1x16x64xbf16>
    %9 = vector.shape_cast %8 : vector<1x16x64xbf16> to vector<16x64xbf16>
    %cst_10 = arith.constant dense<0.000000e+00> : vector<72x64xf32>
    %10 = tpu.matmul %7, %9, %cst_10 {dimension_numbers = #tpu.dot_dimension_numbers<[1], [0], [0], [1], [0, 0, 1, 1], [], []>} : vector<72x16xbf16>, vector<16x64xbf16>, vector<72x64xf32> -> vector<72x64xf32>
    %11 = vector.extract_strided_slice %6 {offsets = [1, 0], sizes = [72, 16], strides = [1, 1]} : vector<82x16xbf16> to vector<72x16xbf16>
    %c1 = arith.constant 1 : index
    %c0_11 = arith.constant 0 : index
    %c0_12 = arith.constant 0 : index
    %12 = vector.load %arg4[%c1, %c0_11, %c0_12] : memref<4x16x64xbf16, #tpu.memory_space<vmem>>, vector<1x16x64xbf16>
    %13 = vector.shape_cast %12 : vector<1x16x64xbf16> to vector<16x64xbf16>
    %cst_13 = arith.constant dense<0.000000e+00> : vector<72x64xf32>
    %14 = tpu.matmul %11, %13, %cst_13 {dimension_numbers = #tpu.dot_dimension_numbers<[1], [0], [0], [1], [0, 0, 1, 1], [], []>} : vector<72x16xbf16>, vector<16x64xbf16>, vector<72x64xf32> -> vector<72x64xf32>
    %15 = arith.addf %10, %14 : vector<72x64xf32>
    %16 = vector.extract_strided_slice %6 {offsets = [9, 0], sizes = [72, 16], strides = [1, 1]} : vector<82x16xbf16> to vector<72x16xbf16>
    %c2 = arith.constant 2 : index
    %c0_14 = arith.constant 0 : index
    %c0_15 = arith.constant 0 : index
    %17 = vector.load %arg4[%c2, %c0_14, %c0_15] : memref<4x16x64xbf16, #tpu.memory_space<vmem>>, vector<1x16x64xbf16>
    %18 = vector.shape_cast %17 : vector<1x16x64xbf16> to vector<16x64xbf16>
    %cst_16 = arith.constant dense<0.000000e+00> : vector<72x64xf32>
    %19 = tpu.matmul %16, %18, %cst_16 {dimension_numbers = #tpu.dot_dimension_numbers<[1], [0], [0], [1], [0, 0, 1, 1], [], []>} : vector<72x16xbf16>, vector<16x64xbf16>, vector<72x64xf32> -> vector<72x64xf32>
    %20 = arith.addf %15, %19 : vector<72x64xf32>
    %21 = vector.extract_strided_slice %6 {offsets = [10, 0], sizes = [72, 16], strides = [1, 1]} : vector<82x16xbf16> to vector<72x16xbf16>
    %c3 = arith.constant 3 : index
    %c0_17 = arith.constant 0 : index
    %c0_18 = arith.constant 0 : index
    %22 = vector.load %arg4[%c3, %c0_17, %c0_18] : memref<4x16x64xbf16, #tpu.memory_space<vmem>>, vector<1x16x64xbf16>
    %23 = vector.shape_cast %22 : vector<1x16x64xbf16> to vector<16x64xbf16>
    %cst_19 = arith.constant dense<0.000000e+00> : vector<72x64xf32>
    %24 = tpu.matmul %21, %23, %cst_19 {dimension_numbers = #tpu.dot_dimension_numbers<[1], [0], [0], [1], [0, 0, 1, 1], [], []>} : vector<72x16xbf16>, vector<16x64xbf16>, vector<72x64xf32> -> vector<72x64xf32>
    %25 = arith.addf %20, %24 : vector<72x64xf32>
    %c0_20 = arith.constant 0 : index
    %c0_21 = arith.constant 0 : index
    %26 = vector.load %arg5[%c0_20, %c0_21] : memref<1x64xf32, #tpu.memory_space<vmem>>, vector<1x64xf32>
    %27 = vector.broadcast %26 : vector<1x64xf32> to vector<72x64xf32>
    %28 = arith.addf %25, %27 : vector<72x64xf32>
    %cst_22 = arith.constant 0.000000e+00 : f32
    %29 = vector.broadcast %cst_22 : f32 to vector<72x64xf32>
    %30 = arith.maximumf %28, %29 : vector<72x64xf32>
    %31 = arith.truncf %30 : vector<72x64xf32> to vector<72x64xbf16>
    %32 = vector.shape_cast %31 : vector<72x64xbf16> to vector<8x9x64xbf16>
    %c0_23 = arith.constant 0 : index
    %c0_24 = arith.constant 0 : index
    %c0_25 = arith.constant 0 : index
    %c0_26 = arith.constant 0 : index
    %33 = vector.load %arg6[%c0_23, %c0_24, %c0_25, %c0_26] : memref<1x8x9x64xbf16, #tpu.memory_space<vmem>>, vector<1x8x9x64xbf16>
    %34 = vector.shape_cast %33 : vector<1x8x9x64xbf16> to vector<8x9x64xbf16>
    %35 = vector.shape_cast %32 : vector<8x9x64xbf16> to vector<1x8x9x64xbf16>
    tpu.vector_store %arg6[%c0_23, %c0_24, %c0_25, %c0_26], %35 {strides = array<i32>} : memref<1x8x9x64xbf16, #tpu.memory_space<vmem>>, vector<1x8x9x64xbf16>,
    return
  }
  func.func @transform_0(%arg0: i32, %arg1: i32) -> (i32, i32, i32, i32) {
    %c0_i32 = arith.constant 0 : i32
    %c0_i32_0 = arith.constant 0 : i32
    %c0_i32_1 = arith.constant 0 : i32
    return %arg0, %arg1, %c0_i32, %c0_i32_0 : i32, i32, i32, i32
  }
  func.func @transform_1(%arg0: i32, %arg1: i32) -> (i32, i32, i32, i32) {
    %c1_i32 = arith.constant 1 : i32
    %0 = arith.addi %arg1, %c1_i32 : i32
    %c8_i32 = arith.constant 8 : i32
    %1 = arith.muli %0, %c8_i32 : i32
    %c0_i32 = arith.constant 0 : i32
    %c0_i32_0 = arith.constant 0 : i32
    %c0_i32_1 = arith.constant 0 : i32
    return %arg0, %1, %c0_i32, %c0_i32_0 : i32, i32, i32, i32
  }
  func.func @transform_2(%arg0: i32, %arg1: i32) -> (i32, i32, i32) {
    %c0_i32 = arith.constant 0 : i32
    %c0_i32_0 = arith.constant 0 : i32
    %c0_i32_1 = arith.constant 0 : i32
    %c0_i32_2 = arith.constant 0 : i32
    return %c0_i32, %c0_i32_0, %c0_i32_1 : i32, i32, i32
  }
  func.func @transform_3(%arg0: i32, %arg1: i32) -> (i32, i32) {
    %c0_i32 = arith.constant 0 : i32
    %c0_i32_0 = arith.constant 0 : i32
    %c0_i32_1 = arith.constant 0 : i32
    return %c0_i32, %c0_i32_0 : i32, i32
  }
  func.func @transform_4(%arg0: i32, %arg1: i32) -> (i32, i32, i32, i32) {
    %c0_i32 = arith.constant 0 : i32
    %c0_i32_0 = arith.constant 0 : i32
    %c0_i32_1 = arith.constant 0 : i32
    return %arg0, %arg1, %c0_i32, %c0_i32_0 : i32, i32, i32, i32
  }
}

module attributes {stable_mosaic.version = 11 : i64} {
  func.func @kernel(%arg0: i32, %arg1: i32, %arg2: memref<1x4x5x256xbf16, #tpu.memory_space<vmem>>, %arg3: memref<1x1x5x256xbf16, #tpu.memory_space<vmem>>, %arg4: memref<4x256x128xbf16, #tpu.memory_space<vmem>>, %arg5: memref<1x128xf32, #tpu.memory_space<vmem>>, %arg6: memref<1x4x5x128xbf16, #tpu.memory_space<vmem>>) attributes {dimension_semantics = [#tpu.dimension_semantics<parallel>, #tpu.dimension_semantics<parallel>], iteration_bounds = array<i64: 2, 1>, scalar_prefetch = 0 : i64, scratch_operands = 0 : i64, tpu.core_type = #tpu.core_type<tc>, window_params = [{transform_indices = @transform_0, window_bounds = array<i64: 1, 4, 5, 256>}, {transform_indices = @transform_1, window_bounds = array<i64: 1, 1, 5, 256>}, {pipeline_mode = #tpu.pipeline_mode<synchronous>, transform_indices = @transform_2, window_bounds = array<i64: 4, 256, 128>}, {pipeline_mode = #tpu.pipeline_mode<synchronous>, transform_indices = @transform_3, window_bounds = array<i64: 1, 128>}, {transform_indices = @transform_4, window_bounds = array<i64: 1, 4, 5, 128>}]} {
    %c0 = arith.constant 0 : index
    %c0_0 = arith.constant 0 : index
    %c0_1 = arith.constant 0 : index
    %c0_2 = arith.constant 0 : index
    %0 = vector.load %arg2[%c0, %c0_0, %c0_1, %c0_2] : memref<1x4x5x256xbf16, #tpu.memory_space<vmem>>, vector<1x4x5x256xbf16>
    %1 = vector.shape_cast %0 : vector<1x4x5x256xbf16> to vector<4x5x256xbf16>
    %2 = vector.shape_cast %1 : vector<4x5x256xbf16> to vector<20x256xbf16>
    %c0_3 = arith.constant 0 : index
    %c0_4 = arith.constant 0 : index
    %c0_5 = arith.constant 0 : index
    %c0_6 = arith.constant 0 : index
    %3 = vector.load %arg3[%c0_3, %c0_4, %c0_5, %c0_6] : memref<1x1x5x256xbf16, #tpu.memory_space<vmem>>, vector<1x1x5x256xbf16>
    %4 = vector.shape_cast %3 : vector<1x1x5x256xbf16> to vector<5x256xbf16>
    %cst = arith.constant 0.000000e+00 : bf16
    %5 = vector.broadcast %cst : bf16 to vector<1x256xbf16>
    %6 = tpu.concatenate %2, %4, %5 in 0 : vector<20x256xbf16>, vector<5x256xbf16>, vector<1x256xbf16> -> vector<26x256xbf16>
    %7 = vector.extract_strided_slice %6 {offsets = [0, 0], sizes = [20, 256], strides = [1, 1]} : vector<26x256xbf16> to vector<20x256xbf16>
    %c0_7 = arith.constant 0 : index
    %c0_8 = arith.constant 0 : index
    %c0_9 = arith.constant 0 : index
    %8 = vector.load %arg4[%c0_7, %c0_8, %c0_9] : memref<4x256x128xbf16, #tpu.memory_space<vmem>>, vector<1x256x128xbf16>
    %9 = vector.shape_cast %8 : vector<1x256x128xbf16> to vector<256x128xbf16>
    %cst_10 = arith.constant dense<0.000000e+00> : vector<20x128xf32>
    %10 = tpu.matmul %7, %9, %cst_10 {dimension_numbers = #tpu.dot_dimension_numbers<[1], [0], [0], [1], [0, 0, 1, 1], [], []>} : vector<20x256xbf16>, vector<256x128xbf16>, vector<20x128xf32> -> vector<20x128xf32>
    %11 = vector.extract_strided_slice %6 {offsets = [1, 0], sizes = [20, 256], strides = [1, 1]} : vector<26x256xbf16> to vector<20x256xbf16>
    %c1 = arith.constant 1 : index
    %c0_11 = arith.constant 0 : index
    %c0_12 = arith.constant 0 : index
    %12 = vector.load %arg4[%c1, %c0_11, %c0_12] : memref<4x256x128xbf16, #tpu.memory_space<vmem>>, vector<1x256x128xbf16>
    %13 = vector.shape_cast %12 : vector<1x256x128xbf16> to vector<256x128xbf16>
    %cst_13 = arith.constant dense<0.000000e+00> : vector<20x128xf32>
    %14 = tpu.matmul %11, %13, %cst_13 {dimension_numbers = #tpu.dot_dimension_numbers<[1], [0], [0], [1], [0, 0, 1, 1], [], []>} : vector<20x256xbf16>, vector<256x128xbf16>, vector<20x128xf32> -> vector<20x128xf32>
    %15 = arith.addf %10, %14 : vector<20x128xf32>
    %16 = vector.extract_strided_slice %6 {offsets = [5, 0], sizes = [20, 256], strides = [1, 1]} : vector<26x256xbf16> to vector<20x256xbf16>
    %c2 = arith.constant 2 : index
    %c0_14 = arith.constant 0 : index
    %c0_15 = arith.constant 0 : index
    %17 = vector.load %arg4[%c2, %c0_14, %c0_15] : memref<4x256x128xbf16, #tpu.memory_space<vmem>>, vector<1x256x128xbf16>
    %18 = vector.shape_cast %17 : vector<1x256x128xbf16> to vector<256x128xbf16>
    %cst_16 = arith.constant dense<0.000000e+00> : vector<20x128xf32>
    %19 = tpu.matmul %16, %18, %cst_16 {dimension_numbers = #tpu.dot_dimension_numbers<[1], [0], [0], [1], [0, 0, 1, 1], [], []>} : vector<20x256xbf16>, vector<256x128xbf16>, vector<20x128xf32> -> vector<20x128xf32>
    %20 = arith.addf %15, %19 : vector<20x128xf32>
    %21 = vector.extract_strided_slice %6 {offsets = [6, 0], sizes = [20, 256], strides = [1, 1]} : vector<26x256xbf16> to vector<20x256xbf16>
    %c3 = arith.constant 3 : index
    %c0_17 = arith.constant 0 : index
    %c0_18 = arith.constant 0 : index
    %22 = vector.load %arg4[%c3, %c0_17, %c0_18] : memref<4x256x128xbf16, #tpu.memory_space<vmem>>, vector<1x256x128xbf16>
    %23 = vector.shape_cast %22 : vector<1x256x128xbf16> to vector<256x128xbf16>
    %cst_19 = arith.constant dense<0.000000e+00> : vector<20x128xf32>
    %24 = tpu.matmul %21, %23, %cst_19 {dimension_numbers = #tpu.dot_dimension_numbers<[1], [0], [0], [1], [0, 0, 1, 1], [], []>} : vector<20x256xbf16>, vector<256x128xbf16>, vector<20x128xf32> -> vector<20x128xf32>
    %25 = arith.addf %20, %24 : vector<20x128xf32>
    %c0_20 = arith.constant 0 : index
    %c0_21 = arith.constant 0 : index
    %26 = vector.load %arg5[%c0_20, %c0_21] : memref<1x128xf32, #tpu.memory_space<vmem>>, vector<1x128xf32>
    %27 = vector.broadcast %26 : vector<1x128xf32> to vector<20x128xf32>
    %28 = arith.addf %25, %27 : vector<20x128xf32>
    %cst_22 = arith.constant 0.000000e+00 : f32
    %29 = vector.broadcast %cst_22 : f32 to vector<20x128xf32>
    %30 = arith.maximumf %28, %29 : vector<20x128xf32>
    %31 = arith.truncf %30 : vector<20x128xf32> to vector<20x128xbf16>
    %32 = vector.shape_cast %31 : vector<20x128xbf16> to vector<4x5x128xbf16>
    %c0_23 = arith.constant 0 : index
    %c0_24 = arith.constant 0 : index
    %c0_25 = arith.constant 0 : index
    %c0_26 = arith.constant 0 : index
    %33 = vector.load %arg6[%c0_23, %c0_24, %c0_25, %c0_26] : memref<1x4x5x128xbf16, #tpu.memory_space<vmem>>, vector<1x4x5x128xbf16>
    %34 = vector.shape_cast %33 : vector<1x4x5x128xbf16> to vector<4x5x128xbf16>
    %35 = vector.shape_cast %32 : vector<4x5x128xbf16> to vector<1x4x5x128xbf16>
    tpu.vector_store %arg6[%c0_23, %c0_24, %c0_25, %c0_26], %35 {strides = array<i32>} : memref<1x4x5x128xbf16, #tpu.memory_space<vmem>>, vector<1x4x5x128xbf16>,
    return
  }
  func.func @transform_0(%arg0: i32, %arg1: i32) -> (i32, i32, i32, i32) {
    %c0_i32 = arith.constant 0 : i32
    %c0_i32_0 = arith.constant 0 : i32
    %c0_i32_1 = arith.constant 0 : i32
    return %arg0, %arg1, %c0_i32, %c0_i32_0 : i32, i32, i32, i32
  }
  func.func @transform_1(%arg0: i32, %arg1: i32) -> (i32, i32, i32, i32) {
    %c1_i32 = arith.constant 1 : i32
    %0 = arith.addi %arg1, %c1_i32 : i32
    %c4_i32 = arith.constant 4 : i32
    %1 = arith.muli %0, %c4_i32 : i32
    %c0_i32 = arith.constant 0 : i32
    %c0_i32_0 = arith.constant 0 : i32
    %c0_i32_1 = arith.constant 0 : i32
    return %arg0, %1, %c0_i32, %c0_i32_0 : i32, i32, i32, i32
  }
  func.func @transform_2(%arg0: i32, %arg1: i32) -> (i32, i32, i32) {
    %c0_i32 = arith.constant 0 : i32
    %c0_i32_0 = arith.constant 0 : i32
    %c0_i32_1 = arith.constant 0 : i32
    %c0_i32_2 = arith.constant 0 : i32
    return %c0_i32, %c0_i32_0, %c0_i32_1 : i32, i32, i32
  }
  func.func @transform_3(%arg0: i32, %arg1: i32) -> (i32, i32) {
    %c0_i32 = arith.constant 0 : i32
    %c0_i32_0 = arith.constant 0 : i32
    %c0_i32_1 = arith.constant 0 : i32
    return %c0_i32, %c0_i32_0 : i32, i32
  }
  func.func @transform_4(%arg0: i32, %arg1: i32) -> (i32, i32, i32, i32) {
    %c0_i32 = arith.constant 0 : i32
    %c0_i32_0 = arith.constant 0 : i32
    %c0_i32_1 = arith.constant 0 : i32
    return %arg0, %arg1, %c0_i32, %c0_i32_0 : i32, i32, i32, i32
  }
}

module attributes {stable_mosaic.version = 11 : i64} {
  func.func @kernel(%arg0: i32, %arg1: i32, %arg2: memref<1x4x5x128xbf16, #tpu.memory_space<vmem>>, %arg3: memref<1x1x5x128xbf16, #tpu.memory_space<vmem>>, %arg4: memref<4x128x256xbf16, #tpu.memory_space<vmem>>, %arg5: memref<1x256xf32, #tpu.memory_space<vmem>>, %arg6: memref<1x4x5x256xbf16, #tpu.memory_space<vmem>>) attributes {dimension_semantics = [#tpu.dimension_semantics<parallel>, #tpu.dimension_semantics<parallel>], iteration_bounds = array<i64: 2, 1>, scalar_prefetch = 0 : i64, scratch_operands = 0 : i64, tpu.core_type = #tpu.core_type<tc>, window_params = [{transform_indices = @transform_0, window_bounds = array<i64: 1, 4, 5, 128>}, {transform_indices = @transform_1, window_bounds = array<i64: 1, 1, 5, 128>}, {pipeline_mode = #tpu.pipeline_mode<synchronous>, transform_indices = @transform_2, window_bounds = array<i64: 4, 128, 256>}, {pipeline_mode = #tpu.pipeline_mode<synchronous>, transform_indices = @transform_3, window_bounds = array<i64: 1, 256>}, {transform_indices = @transform_4, window_bounds = array<i64: 1, 4, 5, 256>}]} {
    %c0 = arith.constant 0 : index
    %c0_0 = arith.constant 0 : index
    %c0_1 = arith.constant 0 : index
    %c0_2 = arith.constant 0 : index
    %0 = vector.load %arg2[%c0, %c0_0, %c0_1, %c0_2] : memref<1x4x5x128xbf16, #tpu.memory_space<vmem>>, vector<1x4x5x128xbf16>
    %1 = vector.shape_cast %0 : vector<1x4x5x128xbf16> to vector<4x5x128xbf16>
    %2 = vector.shape_cast %1 : vector<4x5x128xbf16> to vector<20x128xbf16>
    %c0_3 = arith.constant 0 : index
    %c0_4 = arith.constant 0 : index
    %c0_5 = arith.constant 0 : index
    %c0_6 = arith.constant 0 : index
    %3 = vector.load %arg3[%c0_3, %c0_4, %c0_5, %c0_6] : memref<1x1x5x128xbf16, #tpu.memory_space<vmem>>, vector<1x1x5x128xbf16>
    %4 = vector.shape_cast %3 : vector<1x1x5x128xbf16> to vector<5x128xbf16>
    %cst = arith.constant 0.000000e+00 : bf16
    %5 = vector.broadcast %cst : bf16 to vector<1x128xbf16>
    %6 = tpu.concatenate %2, %4, %5 in 0 : vector<20x128xbf16>, vector<5x128xbf16>, vector<1x128xbf16> -> vector<26x128xbf16>
    %7 = vector.extract_strided_slice %6 {offsets = [0, 0], sizes = [20, 128], strides = [1, 1]} : vector<26x128xbf16> to vector<20x128xbf16>
    %c0_7 = arith.constant 0 : index
    %c0_8 = arith.constant 0 : index
    %c0_9 = arith.constant 0 : index
    %8 = vector.load %arg4[%c0_7, %c0_8, %c0_9] : memref<4x128x256xbf16, #tpu.memory_space<vmem>>, vector<1x128x256xbf16>
    %9 = vector.shape_cast %8 : vector<1x128x256xbf16> to vector<128x256xbf16>
    %cst_10 = arith.constant dense<0.000000e+00> : vector<20x256xf32>
    %10 = tpu.matmul %7, %9, %cst_10 {dimension_numbers = #tpu.dot_dimension_numbers<[1], [0], [0], [1], [0, 0, 1, 1], [], []>} : vector<20x128xbf16>, vector<128x256xbf16>, vector<20x256xf32> -> vector<20x256xf32>
    %11 = vector.extract_strided_slice %6 {offsets = [1, 0], sizes = [20, 128], strides = [1, 1]} : vector<26x128xbf16> to vector<20x128xbf16>
    %c1 = arith.constant 1 : index
    %c0_11 = arith.constant 0 : index
    %c0_12 = arith.constant 0 : index
    %12 = vector.load %arg4[%c1, %c0_11, %c0_12] : memref<4x128x256xbf16, #tpu.memory_space<vmem>>, vector<1x128x256xbf16>
    %13 = vector.shape_cast %12 : vector<1x128x256xbf16> to vector<128x256xbf16>
    %cst_13 = arith.constant dense<0.000000e+00> : vector<20x256xf32>
    %14 = tpu.matmul %11, %13, %cst_13 {dimension_numbers = #tpu.dot_dimension_numbers<[1], [0], [0], [1], [0, 0, 1, 1], [], []>} : vector<20x128xbf16>, vector<128x256xbf16>, vector<20x256xf32> -> vector<20x256xf32>
    %15 = arith.addf %10, %14 : vector<20x256xf32>
    %16 = vector.extract_strided_slice %6 {offsets = [5, 0], sizes = [20, 128], strides = [1, 1]} : vector<26x128xbf16> to vector<20x128xbf16>
    %c2 = arith.constant 2 : index
    %c0_14 = arith.constant 0 : index
    %c0_15 = arith.constant 0 : index
    %17 = vector.load %arg4[%c2, %c0_14, %c0_15] : memref<4x128x256xbf16, #tpu.memory_space<vmem>>, vector<1x128x256xbf16>
    %18 = vector.shape_cast %17 : vector<1x128x256xbf16> to vector<128x256xbf16>
    %cst_16 = arith.constant dense<0.000000e+00> : vector<20x256xf32>
    %19 = tpu.matmul %16, %18, %cst_16 {dimension_numbers = #tpu.dot_dimension_numbers<[1], [0], [0], [1], [0, 0, 1, 1], [], []>} : vector<20x128xbf16>, vector<128x256xbf16>, vector<20x256xf32> -> vector<20x256xf32>
    %20 = arith.addf %15, %19 : vector<20x256xf32>
    %21 = vector.extract_strided_slice %6 {offsets = [6, 0], sizes = [20, 128], strides = [1, 1]} : vector<26x128xbf16> to vector<20x128xbf16>
    %c3 = arith.constant 3 : index
    %c0_17 = arith.constant 0 : index
    %c0_18 = arith.constant 0 : index
    %22 = vector.load %arg4[%c3, %c0_17, %c0_18] : memref<4x128x256xbf16, #tpu.memory_space<vmem>>, vector<1x128x256xbf16>
    %23 = vector.shape_cast %22 : vector<1x128x256xbf16> to vector<128x256xbf16>
    %cst_19 = arith.constant dense<0.000000e+00> : vector<20x256xf32>
    %24 = tpu.matmul %21, %23, %cst_19 {dimension_numbers = #tpu.dot_dimension_numbers<[1], [0], [0], [1], [0, 0, 1, 1], [], []>} : vector<20x128xbf16>, vector<128x256xbf16>, vector<20x256xf32> -> vector<20x256xf32>
    %25 = arith.addf %20, %24 : vector<20x256xf32>
    %c0_20 = arith.constant 0 : index
    %c0_21 = arith.constant 0 : index
    %26 = vector.load %arg5[%c0_20, %c0_21] : memref<1x256xf32, #tpu.memory_space<vmem>>, vector<1x256xf32>
    %27 = vector.broadcast %26 : vector<1x256xf32> to vector<20x256xf32>
    %28 = arith.addf %25, %27 : vector<20x256xf32>
    %cst_22 = arith.constant 0.000000e+00 : f32
    %29 = vector.broadcast %cst_22 : f32 to vector<20x256xf32>
    %30 = arith.maximumf %28, %29 : vector<20x256xf32>
    %31 = arith.truncf %30 : vector<20x256xf32> to vector<20x256xbf16>
    %32 = vector.shape_cast %31 : vector<20x256xbf16> to vector<4x5x256xbf16>
    %c0_23 = arith.constant 0 : index
    %c0_24 = arith.constant 0 : index
    %c0_25 = arith.constant 0 : index
    %c0_26 = arith.constant 0 : index
    %33 = vector.load %arg6[%c0_23, %c0_24, %c0_25, %c0_26] : memref<1x4x5x256xbf16, #tpu.memory_space<vmem>>, vector<1x4x5x256xbf16>
    %34 = vector.shape_cast %33 : vector<1x4x5x256xbf16> to vector<4x5x256xbf16>
    %35 = vector.shape_cast %32 : vector<4x5x256xbf16> to vector<1x4x5x256xbf16>
    tpu.vector_store %arg6[%c0_23, %c0_24, %c0_25, %c0_26], %35 {strides = array<i32>} : memref<1x4x5x256xbf16, #tpu.memory_space<vmem>>, vector<1x4x5x256xbf16>,
    return
  }
  func.func @transform_0(%arg0: i32, %arg1: i32) -> (i32, i32, i32, i32) {
    %c0_i32 = arith.constant 0 : i32
    %c0_i32_0 = arith.constant 0 : i32
    %c0_i32_1 = arith.constant 0 : i32
    return %arg0, %arg1, %c0_i32, %c0_i32_0 : i32, i32, i32, i32
  }
  func.func @transform_1(%arg0: i32, %arg1: i32) -> (i32, i32, i32, i32) {
    %c1_i32 = arith.constant 1 : i32
    %0 = arith.addi %arg1, %c1_i32 : i32
    %c4_i32 = arith.constant 4 : i32
    %1 = arith.muli %0, %c4_i32 : i32
    %c0_i32 = arith.constant 0 : i32
    %c0_i32_0 = arith.constant 0 : i32
    %c0_i32_1 = arith.constant 0 : i32
    return %arg0, %1, %c0_i32, %c0_i32_0 : i32, i32, i32, i32
  }
  func.func @transform_2(%arg0: i32, %arg1: i32) -> (i32, i32, i32) {
    %c0_i32 = arith.constant 0 : i32
    %c0_i32_0 = arith.constant 0 : i32
    %c0_i32_1 = arith.constant 0 : i32
    %c0_i32_2 = arith.constant 0 : i32
    return %c0_i32, %c0_i32_0, %c0_i32_1 : i32, i32, i32
  }
  func.func @transform_3(%arg0: i32, %arg1: i32) -> (i32, i32) {
    %c0_i32 = arith.constant 0 : i32
    %c0_i32_0 = arith.constant 0 : i32
    %c0_i32_1 = arith.constant 0 : i32
    return %c0_i32, %c0_i32_0 : i32, i32
  }
  func.func @transform_4(%arg0: i32, %arg1: i32) -> (i32, i32, i32, i32) {
    %c0_i32 = arith.constant 0 : i32
    %c0_i32_0 = arith.constant 0 : i32
    %c0_i32_1 = arith.constant 0 : i32
    return %arg0, %arg1, %c0_i32, %c0_i32_0 : i32, i32, i32, i32
  }
}

module attributes {stable_mosaic.version = 11 : i64} {
  func.func @kernel(%arg0: i32, %arg1: i32, %arg2: memref<1x8x9x64xbf16, #tpu.memory_space<vmem>>, %arg3: memref<1x1x9x64xbf16, #tpu.memory_space<vmem>>, %arg4: memref<4x64x16xbf16, #tpu.memory_space<vmem>>, %arg5: memref<1x16xf32, #tpu.memory_space<vmem>>, %arg6: memref<1x8x9x16xf32, #tpu.memory_space<vmem>>) attributes {dimension_semantics = [#tpu.dimension_semantics<parallel>, #tpu.dimension_semantics<parallel>], iteration_bounds = array<i64: 2, 1>, scalar_prefetch = 0 : i64, scratch_operands = 0 : i64, tpu.core_type = #tpu.core_type<tc>, window_params = [{transform_indices = @transform_0, window_bounds = array<i64: 1, 8, 9, 64>}, {transform_indices = @transform_1, window_bounds = array<i64: 1, 1, 9, 64>}, {pipeline_mode = #tpu.pipeline_mode<synchronous>, transform_indices = @transform_2, window_bounds = array<i64: 4, 64, 16>}, {pipeline_mode = #tpu.pipeline_mode<synchronous>, transform_indices = @transform_3, window_bounds = array<i64: 1, 16>}, {transform_indices = @transform_4, window_bounds = array<i64: 1, 8, 9, 16>}]} {
    %c0 = arith.constant 0 : index
    %c0_0 = arith.constant 0 : index
    %c0_1 = arith.constant 0 : index
    %c0_2 = arith.constant 0 : index
    %0 = vector.load %arg2[%c0, %c0_0, %c0_1, %c0_2] : memref<1x8x9x64xbf16, #tpu.memory_space<vmem>>, vector<1x8x9x64xbf16>
    %1 = vector.shape_cast %0 : vector<1x8x9x64xbf16> to vector<8x9x64xbf16>
    %2 = vector.shape_cast %1 : vector<8x9x64xbf16> to vector<72x64xbf16>
    %c0_3 = arith.constant 0 : index
    %c0_4 = arith.constant 0 : index
    %c0_5 = arith.constant 0 : index
    %c0_6 = arith.constant 0 : index
    %3 = vector.load %arg3[%c0_3, %c0_4, %c0_5, %c0_6] : memref<1x1x9x64xbf16, #tpu.memory_space<vmem>>, vector<1x1x9x64xbf16>
    %4 = vector.shape_cast %3 : vector<1x1x9x64xbf16> to vector<9x64xbf16>
    %cst = arith.constant 0.000000e+00 : bf16
    %5 = vector.broadcast %cst : bf16 to vector<1x64xbf16>
    %6 = tpu.concatenate %2, %4, %5 in 0 : vector<72x64xbf16>, vector<9x64xbf16>, vector<1x64xbf16> -> vector<82x64xbf16>
    %7 = vector.extract_strided_slice %6 {offsets = [0, 0], sizes = [72, 64], strides = [1, 1]} : vector<82x64xbf16> to vector<72x64xbf16>
    %c0_7 = arith.constant 0 : index
    %c0_8 = arith.constant 0 : index
    %c0_9 = arith.constant 0 : index
    %8 = vector.load %arg4[%c0_7, %c0_8, %c0_9] : memref<4x64x16xbf16, #tpu.memory_space<vmem>>, vector<1x64x16xbf16>
    %9 = vector.shape_cast %8 : vector<1x64x16xbf16> to vector<64x16xbf16>
    %cst_10 = arith.constant dense<0.000000e+00> : vector<72x16xf32>
    %10 = tpu.matmul %7, %9, %cst_10 {dimension_numbers = #tpu.dot_dimension_numbers<[1], [0], [0], [1], [0, 0, 1, 1], [], []>} : vector<72x64xbf16>, vector<64x16xbf16>, vector<72x16xf32> -> vector<72x16xf32>
    %11 = vector.extract_strided_slice %6 {offsets = [1, 0], sizes = [72, 64], strides = [1, 1]} : vector<82x64xbf16> to vector<72x64xbf16>
    %c1 = arith.constant 1 : index
    %c0_11 = arith.constant 0 : index
    %c0_12 = arith.constant 0 : index
    %12 = vector.load %arg4[%c1, %c0_11, %c0_12] : memref<4x64x16xbf16, #tpu.memory_space<vmem>>, vector<1x64x16xbf16>
    %13 = vector.shape_cast %12 : vector<1x64x16xbf16> to vector<64x16xbf16>
    %cst_13 = arith.constant dense<0.000000e+00> : vector<72x16xf32>
    %14 = tpu.matmul %11, %13, %cst_13 {dimension_numbers = #tpu.dot_dimension_numbers<[1], [0], [0], [1], [0, 0, 1, 1], [], []>} : vector<72x64xbf16>, vector<64x16xbf16>, vector<72x16xf32> -> vector<72x16xf32>
    %15 = arith.addf %10, %14 : vector<72x16xf32>
    %16 = vector.extract_strided_slice %6 {offsets = [9, 0], sizes = [72, 64], strides = [1, 1]} : vector<82x64xbf16> to vector<72x64xbf16>
    %c2 = arith.constant 2 : index
    %c0_14 = arith.constant 0 : index
    %c0_15 = arith.constant 0 : index
    %17 = vector.load %arg4[%c2, %c0_14, %c0_15] : memref<4x64x16xbf16, #tpu.memory_space<vmem>>, vector<1x64x16xbf16>
    %18 = vector.shape_cast %17 : vector<1x64x16xbf16> to vector<64x16xbf16>
    %cst_16 = arith.constant dense<0.000000e+00> : vector<72x16xf32>
    %19 = tpu.matmul %16, %18, %cst_16 {dimension_numbers = #tpu.dot_dimension_numbers<[1], [0], [0], [1], [0, 0, 1, 1], [], []>} : vector<72x64xbf16>, vector<64x16xbf16>, vector<72x16xf32> -> vector<72x16xf32>
    %20 = arith.addf %15, %19 : vector<72x16xf32>
    %21 = vector.extract_strided_slice %6 {offsets = [10, 0], sizes = [72, 64], strides = [1, 1]} : vector<82x64xbf16> to vector<72x64xbf16>
    %c3 = arith.constant 3 : index
    %c0_17 = arith.constant 0 : index
    %c0_18 = arith.constant 0 : index
    %22 = vector.load %arg4[%c3, %c0_17, %c0_18] : memref<4x64x16xbf16, #tpu.memory_space<vmem>>, vector<1x64x16xbf16>
    %23 = vector.shape_cast %22 : vector<1x64x16xbf16> to vector<64x16xbf16>
    %cst_19 = arith.constant dense<0.000000e+00> : vector<72x16xf32>
    %24 = tpu.matmul %21, %23, %cst_19 {dimension_numbers = #tpu.dot_dimension_numbers<[1], [0], [0], [1], [0, 0, 1, 1], [], []>} : vector<72x64xbf16>, vector<64x16xbf16>, vector<72x16xf32> -> vector<72x16xf32>
    %25 = arith.addf %20, %24 : vector<72x16xf32>
    %c0_20 = arith.constant 0 : index
    %c0_21 = arith.constant 0 : index
    %26 = vector.load %arg5[%c0_20, %c0_21] : memref<1x16xf32, #tpu.memory_space<vmem>>, vector<1x16xf32>
    %27 = vector.broadcast %26 : vector<1x16xf32> to vector<72x16xf32>
    %28 = arith.addf %25, %27 : vector<72x16xf32>
    %cst_22 = arith.constant 0.000000e+00 : f32
    %29 = vector.broadcast %cst_22 : f32 to vector<72x16xf32>
    %30 = arith.subf %29, %28 : vector<72x16xf32>
    %31 = math.exp %30 : vector<72x16xf32>
    %cst_23 = arith.constant 1.000000e+00 : f32
    %32 = vector.broadcast %cst_23 : f32 to vector<72x16xf32>
    %33 = arith.addf %32, %31 : vector<72x16xf32>
    %34 = tpu.reciprocal %33 {approx = true} : vector<72x16xf32> -> vector<72x16xf32>
    %35 = vector.shape_cast %34 : vector<72x16xf32> to vector<8x9x16xf32>
    %c0_24 = arith.constant 0 : index
    %c0_25 = arith.constant 0 : index
    %c0_26 = arith.constant 0 : index
    %c0_27 = arith.constant 0 : index
    %36 = vector.load %arg6[%c0_24, %c0_25, %c0_26, %c0_27] : memref<1x8x9x16xf32, #tpu.memory_space<vmem>>, vector<1x8x9x16xf32>
    %37 = vector.shape_cast %36 : vector<1x8x9x16xf32> to vector<8x9x16xf32>
    %38 = vector.shape_cast %35 : vector<8x9x16xf32> to vector<1x8x9x16xf32>
    tpu.vector_store %arg6[%c0_24, %c0_25, %c0_26, %c0_27], %38 {strides = array<i32>} : memref<1x8x9x16xf32, #tpu.memory_space<vmem>>, vector<1x8x9x16xf32>,
    return
  }
  func.func @transform_0(%arg0: i32, %arg1: i32) -> (i32, i32, i32, i32) {
    %c0_i32 = arith.constant 0 : i32
    %c0_i32_0 = arith.constant 0 : i32
    %c0_i32_1 = arith.constant 0 : i32
    return %arg0, %arg1, %c0_i32, %c0_i32_0 : i32, i32, i32, i32
  }
  func.func @transform_1(%arg0: i32, %arg1: i32) -> (i32, i32, i32, i32) {
    %c1_i32 = arith.constant 1 : i32
    %0 = arith.addi %arg1, %c1_i32 : i32
    %c8_i32 = arith.constant 8 : i32
    %1 = arith.muli %0, %c8_i32 : i32
    %c0_i32 = arith.constant 0 : i32
    %c0_i32_0 = arith.constant 0 : i32
    %c0_i32_1 = arith.constant 0 : i32
    return %arg0, %1, %c0_i32, %c0_i32_0 : i32, i32, i32, i32
  }
  func.func @transform_2(%arg0: i32, %arg1: i32) -> (i32, i32, i32) {
    %c0_i32 = arith.constant 0 : i32
    %c0_i32_0 = arith.constant 0 : i32
    %c0_i32_1 = arith.constant 0 : i32
    %c0_i32_2 = arith.constant 0 : i32
    return %c0_i32, %c0_i32_0, %c0_i32_1 : i32, i32, i32
  }
  func.func @transform_3(%arg0: i32, %arg1: i32) -> (i32, i32) {
    %c0_i32 = arith.constant 0 : i32
    %c0_i32_0 = arith.constant 0 : i32
    %c0_i32_1 = arith.constant 0 : i32
    return %c0_i32, %c0_i32_0 : i32, i32
  }
  func.func @transform_4(%arg0: i32, %arg1: i32) -> (i32, i32, i32, i32) {
    %c0_i32 = arith.constant 0 : i32
    %c0_i32_0 = arith.constant 0 : i32
    %c0_i32_1 = arith.constant 0 : i32
    return %arg0, %arg1, %c0_i32, %c0_i32_0 : i32, i32, i32, i32
  }
}

</mosaic_0001>

<bundles_post_ra>
// kernel: tile.13
= control target key start
LH: loop header
LB: loop body
LE: loop exit
PB: predicated region body
PF: predicated region fallthrough
CT: control target
= control target key end

     0   :  { %s22_s0 = inlined_call_operand.vmem [shape: f32[64], index: 0, kind: input, shape index: {}]   ;;  %s23_s1 = inlined_call_operand.vmem [shape: f32[4,64], index: 1, kind: output, shape index: {}]  }
   0x1   :  { %v4_v0 = vld [vmem:[%s22_s0] ss:$0 sm:$0xff] }
   0x2   :  { %5 = vst [vmem:[%s23_s1] sm:$0xf] %v4_v0 }

// kernel: tile.18
= control target key start
LH: loop header
LB: loop body
LE: loop exit
PB: predicated region body
PF: predicated region fallthrough
CT: control target
= control target key end

     0   :  { %s6_s8 = smov 3  ;;  %vm8_vm0 = vcmask 523264   ;;  %s30_s9 = smov 64   ;;  %vm15_vm1 = vcmask 1048064   ;;  %s50_s0 = inlined_call_operand.vmem [shape: f32[4,64], index: 0, kind: input, shape index: {}]   ;;  %s51_s1 = inlined_call_operand.vmem [shape: f32[1,256], index: 1, kind: output, shape index: {}]  }
   0x1   :  { %v4_v0 = vld [vmem:[%s50_s0] sm:$0xf]  ;;  %s11_s0 = smov 3 }
   0x2   :  { %5 = vst [vmem:[#allocation1] sm:$0xf] %v4_v0 }
   0x9   :  { %v12_v1 = vld [vmem:[#allocation1 + $0x1] ss:$2 sm:%s11_s0]   ;;  %v7_v2 = vld [vmem:[#allocation1] ss:$2 sm:%s6_s8]  }
   0xa   :  { %13 = vrot.lane.b32.xlu0 %v12_v1, %s30_s9  ;;  %9 = vst.msk [vmem:[#allocation0] ss:$8 sm:$0x3] %vm8_vm0, %v7_v2  }
  0x7c   :  { %v14_v3 = vpop.permute.xlu0 %13  }
  0x7d   :  { %16 = vst.msk [vmem:[#allocation0] ss:$8 sm:$0x3] %vm15_vm1, %v14_v3  }
  0x84   :  { %v20_v4 = vld [vmem:[#allocation0] sm:$0x1]  ;;  %v24_v5 = vld [vmem:[#allocation0 + $0x8] sm:$0x1] }
  0x85   :  { %22 = vst [vmem:[%s51_s1] sm:$0x1] %v20_v4  ;;  %28 = vst [vmem:[%s51_s1 + $0x1] sm:$0x1] %v24_v5 }

// kernel: conv_autoencoder_forward.4
= control target key start
LH: loop header
LB: loop body
LE: loop exit
PB: predicated region body
PF: predicated region fallthrough
CT: control target
= control target key end

     0   :  { %s2618_s15 = smov 0   ;;  %s2620_s16 = smov 0   ;;  %s3047_s0 = inlined_call_operand.vmem [shape: bf16[2,9,9,16], index: 0, kind: input, shape index: {}, may-alias: {0,1}]   ;;  %s3048_s1 = inlined_call_operand.vmem [shape: bf16[2,9,9,16], index: 1, kind: input, shape index: {}, may-alias: {0,1}]   ;;  %s3049_s2 = inlined_call_operand.vmem [shape: bf16[4,16,64], index: 2, kind: input, shape index: {}]   ;;  %s3050_s3 = inlined_call_operand.vmem [shape: f32[1,64], index: 3, kind: input, shape index: {}]   ;;  %s3051_s4 = inlined_call_operand.vmem [shape: bf16[2,8,9,64], index: 4, kind: output, shape index: {}]  }
   0x1   :  { %s2622_s17 = smov 0  }
   0x2 LB: > { %s26_s18 = sadd.s32 1, %s2583_s16  ;;  %p2315_p0 = scmp.ge.s32.totalorder %s2587_s17, 1  ;;  %s2587_s17 = sphi %s2622_s17, %s14_s17   ;;  %s2583_s16 = sphi %s2620_s16, %s3055_s16   ;;  %s2579_s15 = sphi %s2618_s15, %s3054_s15  }
   0x3   : > { %p28_p1 = scmp.ge.s32.totalorder %s26_s18, 2  ;;  %p218_p2 = scmp.lt.s32.totalorder %s2587_s17, 3 }
   0x5   : > { %s3057_s18 = smov (%p28_p1, %s26_s18), 0  ;;  %p219_p3 = pnand %p2315_p0, %p218_p2 }
   0x6   : > { %v2559_v0 = vld [vmem:[%s3049_s2 + $0x8] sm:$0xff] (!%p219_p3)   ;;  %v359_v1 = vlaneseq (!%p219_p3)  ;;  %v2589_v2 = vmov (!%p219_p3), 0.0   ;;  %v2560_v3 = vld [vmem:[%s3049_s2] sm:$0xff] (!%p219_p3)   ;;  %vm2590_vm0 = vmmov (!%p219_p3), 0   ;;  %p276_p4 = scmp.lt.s32.totalorder (!%p219_p3), %s2579_s15, 1  ;;  %vm1047_vm1 = vcmask (!%p219_p3), 130048  }
   0x7   : > { %222 = sbr.rel (%p219_p3) target bundleno = 376 (0x178), region = 36  ;;  %2440 = vmatprep.subr.bf16.mxu0 (!%p219_p3), %v2589_v2  ;;  %2462 = vmatprep.subr.bf16.mxu1 (!%p219_p3), %v2589_v2  ;;  %v2591_v4 = vmov (!%p219_p3), 1966171168   ;;  %vm1002_vm2 = vsmask.f32 (!%p219_p3), 7424  ;;  %vm989_vm3 = vcmask (!%p219_p3), 1043456  }
   0x8   : > { %2441 = vmatpush3.bf16.msra.mxu0 (!%p219_p3), %v2559_v0  ;;  %2464 = vmatprep.mubr.msk.bf16.mxu1 (!%p219_p3), %vm2590_vm0, %v2589_v2  ;;  %v357_v5 = vunpack.c.l.s4 (!%p219_p3), %v2591_v4  ;;  %v2650_v6 = vshrl.u32 (!%p219_p3), %v359_v1, 7  ;;  %vm1358_vm4 = vcmask (!%p219_p3), 1042432   ;;  %vm1226_vm5 = vsmask.f32 (!%p219_p3), 3328 }
   0x9   : > { %2463 = vmatpush3.bf16.msra.mxu1 (!%p219_p3), %v2560_v3  ;;  %2442 = vmatprep.mubr.msk.bf16.mxu0 (!%p219_p3), %vm2590_vm0, %v2589_v2  ;;  %vm993_vm6 = vcmask (!%p219_p3), 1040384   ;;  %vm994_vm7 = vsmask.f32 (!%p219_p3), 256  ;;  %vm2161_vm9 = vcmask (!%p219_p3), 516096   ;;  %vm2159_vm10 = vcmask (!%p219_p3), 519168  }
   0xa   : > { %2484 = vmatprep.subr.bf16.mxu0 (!%p219_p3), %v2589_v2  ;;  %2506 = vmatprep.subr.bf16.mxu1 (!%p219_p3), %v2589_v2  ;;  %v358_v7 = vunpack.c.0.s8 (!%p219_p3), %v357_v5  ;;  %vm995_vm8 = vmand (!%p219_p3), %vm993_vm6, %vm994_vm7 }
   0xb   : > { %vm2912_vm11 = vmand (!%p219_p3), %vm2161_vm9, %vm994_vm7 }
   0xc   : > { %v2661_v8 = vsub.s32 (!%p219_p3), %v358_v7, %v2650_v6 }
   0xe   : > { %s3059_s15 = smov (!%p276_p4, %s2579_s15), 1 }
   0xf   : > { %s2528_s23 = smul.u32 72, %s3059_s15  ;;  %s2415_s11 = sshll.u32 %s3059_s15, 6 }
  0x10   : > { %s2904_s14 = scalar_lea.vmem %s3051_s4, %s2415_s11 }
  0x11   : > { %s2658_s26 = scalar_lea.vmem %s3047_s0, %s2528_s23  ;;  %s2414_s27 = sadd.s32 64, %s2528_s23 }
  0x12   : > { %v2320_v9 = vld.sshfl [vmem:[%s2658_s26] sm:$0x33 pattern:$0x75316420]  ;;  %s2667_s30 = scalar_lea.vmem %s3048_s1, %s2414_s27 }
  0x13   : > { %v2321_v10 = vld.sshfl [vmem:[%s2658_s26 + $0x4] sm:$0x1 pattern:$0x75316420]  ;;  %v355_v11 = vcombine.high %v2320_v9, %v2320_v9  ;;  %v362_v13 = vrot.slane %v2320_v9, %v2661_v8 }
  0x14   : > { %v2322_v12 = vld.sshfl [vmem:[%s2658_s26 + $0x8] sm:$0x33 pattern:$0x75316420]  ;;  %v385_v14 = vrot.slane %v2321_v10, %v2661_v8 }
  0x15   : > { %v2323_v15 = vld.sshfl [vmem:[%s2658_s26 + $0xc] sm:$0x1 pattern:$0x75316420]  ;;  %v369_v16 = vrot.slane %v355_v11, %v2661_v8  ;;  %v393_v17 = vcombine.high %v2322_v12, %v2322_v12  ;;  %v400_v18 = vrot.slane %v2322_v12, %v2661_v8 }
  0x16   : > { %v2324_v19 = vld.sshfl [vmem:[%s2658_s26 + $0x10] sm:$0x33 pattern:$0x75316420]  ;;  %v423_v20 = vrot.slane %v2323_v15, %v2661_v8 }
  0x17   : > { %v407_v21 = vrot.slane %v393_v17, %v2661_v8  ;;  %v408_v22 = vcombine.high %v400_v18, %v400_v18  ;;  %v431_v23 = vcombine.high %v2324_v19, %v2324_v19  ;;  %v438_v24 = vrot.slane %v2324_v19, %v2661_v8  ;;  %v2325_v29 = vld.sshfl [vmem:[%s2658_s26 + $0x14] sm:$0x1 pattern:$0x75316420] }
  0x18   : > { %v662_v25 = vunpack.i.h.s16 %v400_v18  ;;  %v2336_v26 = vpack.i.b16 %v400_v18, %v385_v14  ;;  %v762_v27 = vcombine.low %v362_v13, %v369_v16  ;;  %v2356_v28 = vcombine.high %v362_v13, %v369_v16  ;;  %v2326_v33 = vld.sshfl [vmem:[%s2658_s26 + $0x18] sm:$0x33 pattern:$0x75316420] }
  0x19   : > { %v409_v30 = vcombine.high %v407_v21, %v407_v21  ;;  %v664_v31 = vunpack.i.h.s16 %v407_v21  ;;  %v666_v32 = vunpack.i.h.s16 %v408_v22  ;;  %v445_v34 = vrot.slane %v431_v23, %v2661_v8  ;;  %v2327_v43 = vld.sshfl [vmem:[%s2658_s26 + $0x1c] sm:$0x1 pattern:$0x75316420] }
  0x1a   : > { %v2337_v35 = vpack.i.b16 %v407_v21, %v662_v25  ;;  %v772_v36 = vrot.slane %v762_v27, %v2661_v8  ;;  %v779_v37 = vrot.slane %v2356_v28, %v2661_v8  ;;  %v446_v38 = vcombine.high %v438_v24, %v438_v24  ;;  %v2328_v55 = vld.sshfl [vmem:[%s2658_s26 + $0x20] sm:$0x33 pattern:$0x75316420] }
  0x1b   : > { %v668_v39 = vunpack.i.h.s16 %v409_v30  ;;  %v2338_v40 = vpack.i.b16 %v408_v22, %v664_v31  ;;  %v2339_v41 = vpack.i.b16 %v409_v30, %v666_v32  ;;  %v447_v42 = vcombine.high %v445_v34, %v445_v34  ;;  %v2329_v61 = vld.sshfl [vmem:[%s2658_s26 + $0x24] sm:$0x1 pattern:$0x75316420] }
  0x1c   : > { %v764_v44 = vcombine.low %v2336_v26, %v2337_v35  ;;  %v794_v45 = vcombine.low %v772_v36, %v779_v37  ;;  %v461_v46 = vrot.slane %v2325_v29, %v2661_v8  ;;  %v469_v47 = vcombine.high %v2326_v33, %v2326_v33  ;;  %v2330_v1 = vld.sshfl [vmem:[%s2658_s26 + $0x28] sm:$0x33 pattern:$0x75316420] }
  0x1d   : > { %v2340_v48 = vpack.i.b16 %v423_v20, %v668_v39  ;;  %v765_v49 = vcombine.low %v2338_v40, %v2339_v41  ;;  %v476_v50 = vrot.slane %v2326_v33, %v2661_v8  ;;  %v812_v51 = vcombine.low %v445_v34, %v446_v38  ;;  %v2562_v20 = vld [vmem:[%s3049_s2 + $0x18] sm:$0xff]   ;;  %v2331_v38 = vld.sshfl [vmem:[%s2658_s26 + $0x2c] sm:$0x1 pattern:$0x75316420] }
  0x1e   : > { %v786_v52 = vrot.slane %v764_v44, %v2661_v8  ;;  %v802_v53 = vrot.slane %v794_v45, %v2661_v8  ;;  %v483_v54 = vrot.slane %v469_v47, %v2661_v8  ;;  %v499_v56 = vrot.slane %v2327_v43, %v2661_v8  ;;  %v2332_v41 = vld.sshfl [vmem:[%s2658_s26 + $0x30] sm:$0x33 pattern:$0x75316420] }
  0x1f   : > { %v793_v57 = vrot.slane %v765_v49, %v2661_v8  ;;  %v811_v58 = vcombine.low %v2340_v48, %v438_v24  ;;  %v484_v59 = vcombine.high %v476_v50, %v476_v50  ;;  %v680_v60 = vunpack.i.h.s16 %v476_v50  ;;  %v2334_v48 = vld.sshfl [vmem:[%s2658_s26 + $0x38] sm:$0x33 pattern:$0x75316420] }
  0x20   : > { %v682_v62 = vunpack.i.h.s16 %v483_v54  ;;  %v2341_v63 = vpack.i.b16 %v476_v50, %v461_v46  ;;  %v828_v0 = vrot.slane %v812_v51, %v2661_v8  ;;  %v485_v3 = vcombine.high %v483_v54, %v483_v54  ;;  %v2333_v46 = vld.sshfl [vmem:[%s2658_s26 + $0x34] sm:$0x1 pattern:$0x75316420] }
  0x21   : > { %v795_v4 = vcombine.low %v786_v52, %v793_v57  ;;  %v2342_v5 = vpack.i.b16 %v483_v54, %v680_v60  ;;  %v821_v7 = vrot.slane %v811_v58, %v2661_v8  ;;  %v507_v9 = vcombine.high %v2328_v55, %v2328_v55 }
  0x22   : > { %v2343_v10 = vpack.i.b16 %v484_v59, %v682_v62  ;;  %v813_v11 = vcombine.low %v447_v42, %v2341_v63  ;;  %v514_v12 = vrot.slane %v2328_v55, %v2661_v8  ;;  %v537_v13 = vrot.slane %v2329_v61, %v2661_v8 }
  0x23   : > { %v809_v14 = vrot.slane %v795_v4, %v2661_v8  ;;  %v843_v15 = vcombine.low %v821_v7, %v828_v0  ;;  %v521_v16 = vrot.slane %v507_v9, %v2661_v8  ;;  %v545_v17 = vcombine.high %v2330_v1, %v2330_v1  ;;  %v2561_v7 = vld [vmem:[%s3049_s2 + $0x10] sm:$0xff]  }
  0x24   : > { %v814_v18 = vcombine.low %v2342_v5, %v2343_v10  ;;  %v835_v19 = vrot.slane %v813_v11, %v2661_v8  ;;  %v552_v21 = vrot.slane %v2330_v1, %v2661_v8  ;;  %v684_v22 = vunpack.i.h.s16 %v484_v59 }
  0x25   : > { %v2707_v23 = vcombine.low %v802_v53, %v809_v14  ;;  %v559_v24 = vrot.slane %v545_v17, %v2661_v8  ;;  %v686_v25 = vunpack.i.h.s16 %v485_v3  ;;  %v851_v30 = vrot.slane %v843_v15, %v2661_v8 }
  0x26   : > { %v842_v26 = vrot.slane %v814_v18, %v2661_v8  ;;  %v698_v27 = vunpack.i.h.s16 %v552_v21  ;;  %v2344_v28 = vpack.i.b16 %v485_v3, %v684_v22  ;;  %v2346_v29 = vpack.i.b16 %v552_v21, %v537_v13 }
  0x27   : > { %2465 = vmatmul.mubr.msk.bf16.vlgmr.msra.gmra.mrb[0].mxu1 %vm1047_vm1, %v2707_v23  ;;  %v1006_v31 = vshll.u32 %v2707_v23, 16  ;;  %v2345_v32 = vpack.i.b16 %v499_v56, %v686_v25  ;;  %v861_v33 = vcombine.low %v514_v12, %v521_v16  ;;  %v1004_v35 = vshrl.u32 %v2707_v23, 16 }
  0x28   : > { %v844_v34 = vcombine.low %v835_v19, %v842_v26  ;;  %2507 = vmatpush3.bf16.msra.mxu1 %v2562_v20  ;;  %2468 = vmatprep.mubr.msk.bf16.mxu1 %vm2590_vm0, %v2589_v2  ;;  %v2347_v36 = vpack.i.b16 %v559_v24, %v698_v27  ;;  %v2357_v37 = vcombine.high %v514_v12, %v521_v16  ;;  %v700_v51 = vunpack.i.h.s16 %v559_v24 }
  0x29   : > { %v1008_v39 = vrot.slane %v1006_v31, 1  ;;  %v860_v40 = vcombine.low %v2344_v28, %v2345_v32  ;;  %v877_v44 = vrot.slane %v861_v33, %v2661_v8  ;;  %v560_v49 = vcombine.high %v552_v21, %v552_v21  ;;  %v2335_v21 = vld.sshfl [vmem:[%s2658_s26 + $0x3c] sm:$0x1 pattern:$0x75316420] }
  0x2a   : > { %v858_v42 = vrot.slane %v844_v34, %v2661_v8  ;;  %v863_v43 = vcombine.low %v2346_v29, %v2347_v36  ;;  %v884_v45 = vrot.slane %v2357_v37, %v2661_v8  ;;  %v561_v50 = vcombine.high %v559_v24, %v559_v24 }
  0x2b   : > { %v870_v47 = vrot.slane %v860_v40, %v2661_v8  ;;  %v1009_v53 = vor.u32 %v1008_v39, %v1004_v35  ;;  %v583_v55 = vcombine.high %v2332_v41, %v2332_v41  ;;  %v575_v57 = vrot.slane %v2331_v38, %v2661_v8 }
  0x2c   : > { %v2728_v52 = vcombine.low %v851_v30, %v858_v42  ;;  %v891_v54 = vrot.slane %v863_v43, %v2661_v8  ;;  %v590_v58 = vrot.slane %v2332_v41, %v2661_v8  ;;  %v613_v59 = vrot.slane %v2333_v46, %v2661_v8 }
  0x2d   : > { %v892_v56 = vcombine.low %v870_v47, %v877_v44  ;;  %v597_v62 = vrot.slane %v583_v55, %v2661_v8  ;;  %v628_v63 = vrot.slane %v2334_v48, %v2661_v8  ;;  %v702_v3 = vunpack.i.h.s16 %v560_v49 }
  0x2e   : > { %v1011_v60 = vshll.u32 %v2728_v52, 16  ;;  %v893_v61 = vcombine.low %v884_v45, %v891_v54  ;;  %v598_v1 = vcombine.high %v590_v58, %v590_v58  ;;  %v704_v4 = vunpack.i.h.s16 %v561_v50 }
  0x2f   : > { %2469 = vmatmul.mubr.msk.bf16.gmra.mrb[4].mxu1 %vm1047_vm1, %v2728_v52  ;;  %v900_v0 = vrot.slane %v892_v56, %v2661_v8  ;;  %v1015_v10 = vshrl.u32 %v2728_v52, 16  ;;  %v599_v11 = vcombine.high %v597_v62, %v597_v62  ;;  %v2348_v12 = vpack.i.b16 %v560_v49, %v700_v51 }
  0x30   : > { %v1013_v5 = vrot.slane %v1011_v60, 1  ;;  %v907_v9 = vrot.slane %v893_v61, %v2661_v8  ;;  %2472 = vmatprep.mubr.msk.bf16.mxu1 %vm2590_vm0, %v2589_v2  ;;  %v2349_v13 = vpack.i.b16 %v561_v50, %v702_v3  ;;  %v2350_v14 = vpack.i.b16 %v575_v57, %v704_v4 }
  0x31   : > { %v2351_v17 = vpack.i.b16 %v628_v63, %v613_v59  ;;  %v911_v20 = vcombine.low %v597_v62, %v598_v1  ;;  %v621_v22 = vcombine.high %v2334_v48, %v2334_v48  ;;  %v636_v27 = vcombine.high %v628_v63, %v628_v63 }
  0x32   : > { %v1014_v15 = vsel %vm1002_vm2, %v1009_v53, %v1013_v5  ;;  %v2752_v16 = vcombine.low %v900_v0, %v907_v9  ;;  %v909_v18 = vcombine.low %v2348_v12, %v2349_v13  ;;  %v910_v19 = vcombine.low %v2350_v14, %v590_v58 }
  0x33   : > { %2443 = vmatmul.mubr.msk.bf16.vlgmr.msra.gmra.mrb[0].mxu0 %vm1047_vm1, %v1014_v15  ;;  %v1017_v24 = vor.u32 %v1015_v10, %v1013_v5  ;;  %v912_v26 = vcombine.low %v599_v11, %v2351_v17  ;;  %v933_v30 = vrot.slane %v911_v20, %v2661_v8  ;;  %v635_v32 = vrot.slane %v621_v22, %v2661_v8 }
  0x34   : > { %2485 = vmatpush3.bf16.msra.mxu0 %v2561_v7  ;;  %2446 = vmatprep.mubr.msk.bf16.mxu0 %vm2590_vm0, %v2589_v2  ;;  %v1019_v25 = vshll.u32 %v2752_v16, 16  ;;  %v919_v28 = vrot.slane %v909_v18, %v2661_v8  ;;  %v926_v29 = vrot.slane %v910_v19, %v2661_v8  ;;  %v651_v36 = vrot.slane %v2335_v21, %v2661_v8 }
  0x35   : > { %v940_v34 = vrot.slane %v912_v26, %v2661_v8  ;;  %v716_v37 = vunpack.i.h.s16 %v628_v63  ;;  %v637_v39 = vcombine.high %v635_v32, %v635_v32  ;;  %v718_v40 = vunpack.i.h.s16 %v635_v32  ;;  %v2563_v63 = vld [vmem:[%s2667_s30] ss:$0 sps:$4 sm:$0xff]  }
  0x36   : > { %v1021_v33 = vrot.slane %v1019_v25, 1  ;;  %v941_v38 = vcombine.low %v919_v28, %v926_v29  ;;  %v720_v41 = vunpack.i.h.s16 %v636_v27  ;;  %v1023_v50 = vshrl.u32 %v2752_v16, 16 }
  0x37   : > { %2473 = vmatmul.mubr.msk.bf16.gmra.mrb[8].mxu1 %vm1047_vm1, %v2752_v16  ;;  %v942_v43 = vcombine.low %v933_v30, %v940_v34  ;;  %v2352_v44 = vpack.i.b16 %v635_v32, %v716_v37  ;;  %v722_v46 = vunpack.i.h.s16 %v637_v39  ;;  %v2353_v47 = vpack.i.b16 %v636_v27, %v718_v40  ;;  %v2564_v30 = vld [vmem:[%s2667_s30 + $0x4] ss:$0 sps:$4 sm:$0x11]  }
  0x38   : > { %v1022_v42 = vsel %vm1002_vm2, %v1017_v24, %v1021_v33  ;;  %2476 = vmatprep.mubr.msk.bf16.mxu1 %vm2590_vm0, %v2589_v2  ;;  %v949_v45 = vrot.slane %v941_v38, %v2661_v8  ;;  %v2354_v48 = vpack.i.b16 %v637_v39, %v720_v41  ;;  %v1025_v57 = vor.u32 %v1023_v50, %v1021_v33 }
  0x39   : > { %v956_v49 = vrot.slane %v942_v43, %v2661_v8  ;;  %v2355_v51 = vpack.i.b16 %v651_v36, %v722_v46  ;;  %v958_v53 = vcombine.low %v2352_v44, %v2353_v47  ;;  %v1359_v11 = vrot.slane %v2707_v23, 5 }
  0x3a   : > { %v1360_v12 = vrot.slane %v2728_v52, 5  ;;  %v1227_v17 = vrot.slane %v1004_v35, 4  ;;  %v1228_v19 = vrot.slane %v1006_v31, 5  ;;  %v1231_v20 = vrot.slane %v1011_v60, 5 }
  0x3b   : > { %2447 = vmatmul.mubr.msk.bf16.gmra.mrb[4].mxu0 %vm1047_vm1, %v1022_v42  ;;  %v2780_v54 = vcombine.low %v949_v45, %v956_v49  ;;  %v959_v55 = vcombine.low %v2354_v48, %v2355_v51  ;;  %v966_v56 = vrot.slane %v958_v53, %v2661_v8  ;;  %v1230_v21 = vrot.slane %v1015_v10, 4 }
  0x3c   : > { %2450 = vmatprep.mubr.msk.bf16.mxu0 %vm2590_vm0, %v2589_v2  ;;  %v1361_v15 = vsel %vm1358_vm4, %v1359_v11, %v1360_v12  ;;  %v1362_v22 = vrot.slane %v2752_v16, 5  ;;  %v1229_v35 = vor.u32 %v1228_v19, %v1227_v17  ;;  %v1234_v52 = vrot.slane %v1023_v50, 4 }
  0x3d   : > { %v1027_v58 = vshll.u32 %v2780_v54, 16  ;;  %v973_v59 = vrot.slane %v959_v55, %v2661_v8  ;;  %v1031_v1 = vshrl.u32 %v2780_v54, 16  ;;  %v1232_v24 = vor.u32 %v1231_v20, %v1230_v21 }
  0x3e   : > { %v1363_v23 = vsel %vm1358_vm4, %v1360_v12, %v1362_v22  ;;  %v1235_v60 = vrot.slane %v1019_v25, 5  ;;  %v1364_v10 = vrot.slane %v2780_v54, 5  ;;  %v996_v34 = vsel %vm995_vm8, %v2564_v30, 0 }
  0x3f   : > { %2477 = vmatmul.mubr.msk.bf16.gmra.mrb[12].mxu1 %vm1047_vm1, %v2780_v54  ;;  %v1029_v61 = vrot.slane %v1027_v58, 1  ;;  %v974_v62 = vcombine.low %v966_v56, %v973_v59  ;;  %v1233_v31 = vsel %vm1226_vm5, %v1229_v35, %v1232_v24  ;;  %v1238_v25 = vrot.slane %v1031_v1, 4 }
  0x40   : > { %2480 = vmatprep.mubr.msk.bf16.mxu1 %vm2590_vm0, %v2589_v2  ;;  %v1236_v26 = vor.u32 %v1235_v60, %v1234_v52  ;;  %v1365_v27 = vsel %vm1358_vm4, %v1362_v22, %v1364_v10  ;;  %v1239_v28 = vrot.slane %v1027_v58, 5  ;;  %v1368_v39 = vrot.slane %v996_v34, 5 }
  0x41   : > { %v1030_v0 = vsel %vm1002_vm2, %v1025_v57, %v1029_v61  ;;  %v981_v3 = vrot.slane %v974_v62, %v2661_v8  ;;  %v1033_v5 = vor.u32 %v1031_v1, %v1029_v61  ;;  %v1247_v43 = vshll.u32 %v996_v34, 16 }
  0x42   : > { %v1237_v16 = vsel %vm1226_vm5, %v1232_v24, %v1236_v26  ;;  %v1240_v32 = vor.u32 %v1239_v28, %v1238_v25 }
  0x43   : > { %2451 = vmatmul.mubr.msk.bf16.gmra.mrb[8].mxu0 %vm1047_vm1, %v1030_v0  ;;  %v2796_v4 = vsel %vm989_vm3, %v981_v3, %v2563_v63  ;;  %v1249_v44 = vrot.slane %v1247_v43, 5 }
  0x44   : > { %2454 = vmatprep.mubr.msk.bf16.mxu0 %vm2590_vm0, %v2589_v2  ;;  %v1034_v7 = vshll.u32 %v2796_v4, 16  ;;  %v1038_v14 = vshrl.u32 %v2796_v4, 16  ;;  %v1366_v29 = vrot.slane %v2796_v4, 5  ;;  %v1241_v36 = vsel %vm1226_vm5, %v1236_v26, %v1240_v32 }
  0x46   : > { %v1036_v9 = vrot.slane %v1034_v7, 1  ;;  %v1367_v33 = vsel %vm1358_vm4, %v1364_v10, %v1366_v29  ;;  %v1242_v37 = vrot.slane %v1038_v14, 4  ;;  %v1243_v38 = vrot.slane %v1034_v7, 5 }
  0x47   : > { %2481 = vmatmul.mubr.msk.bf16.gmra.mrb[16].mxu1 %vm1047_vm1, %v2796_v4  ;;  %v1369_v41 = vsel %vm1358_vm4, %v1366_v29, %v1368_v39 }
  0x48   : > { %2508 = vmatprep.mubr.msk.bf16.mxu1 %vm2590_vm0, %v2589_v2  ;;  %v1037_v13 = vsel %vm1002_vm2, %v1033_v5, %v1036_v9  ;;  %v1040_v18 = vor.u32 %v1038_v14, %v1036_v9  ;;  %v1244_v40 = vor.u32 %v1243_v38, %v1242_v37 }
  0x4a   : > { %v1245_v42 = vsel %vm1226_vm5, %v1240_v32, %v1244_v40  ;;  %v1250_v45 = vsel %vm1226_vm5, %v1244_v40, %v1249_v44  ;;  %v2877_v44 = vld [vmem:[%s3050_s3] ss:$0 sm:$0xff] }
  0x4b   : > { %2455 = vmatmul.mubr.msk.bf16.gmra.mrb[12].mxu0 %vm1047_vm1, %v1037_v13 }
  0x4c   : > { %2458 = vmatprep.mubr.msk.bf16.mxu0 %vm2590_vm0, %v2589_v2 }
  0x4f   : > { %2509 = vmatmul.mubr.msk.bf16.vlgmr.msra.gmra.mrb[20].mxu1 %vm1047_vm1, %v1361_v15 }
  0x50   : > { %2512 = vmatprep.mubr.msk.bf16.mxu1 %vm2590_vm0, %v2589_v2 }
  0x53   : > { %2459 = vmatmul.mubr.msk.bf16.gmra.mrb[16].mxu0 %vm1047_vm1, %v1040_v18 }
  0x54   : > { %2486 = vmatprep.mubr.msk.bf16.mxu0 %vm2590_vm0, %v2589_v2 }
  0x57   : > { %2513 = vmatmul.mubr.msk.bf16.gmra.mrb[24].mxu1 %vm1047_vm1, %v1363_v23 }
  0x58   : > { %2516 = vmatprep.mubr.msk.bf16.mxu1 %vm2590_vm0, %v2589_v2 }
  0x5b   : > { %2487 = vmatmul.mubr.msk.bf16.vlgmr.msra.gmra.mrb[20].mxu0 %vm1047_vm1, %v1233_v31 }
  0x5c   : > { %2490 = vmatprep.mubr.msk.bf16.mxu0 %vm2590_vm0, %v2589_v2 }
  0x5f   : > { %2517 = vmatmul.mubr.msk.bf16.gmra.mrb[28].mxu1 %vm1047_vm1, %v1365_v27 }
  0x60   : > { %2520 = vmatprep.mubr.msk.bf16.mxu1 %vm2590_vm0, %v2589_v2 }
  0x63   : > { %2491 = vmatmul.mubr.msk.bf16.gmra.mrb[24].mxu0 %vm1047_vm1, %v1237_v16 }
  0x64   : > { %2494 = vmatprep.mubr.msk.bf16.mxu0 %vm2590_vm0, %v2589_v2 }
  0x67   : > { %2521 = vmatmul.mubr.msk.bf16.gmra.mrb[32].mxu1 %vm1047_vm1, %v1367_v33 }
  0x68   : > { %2524 = vmatprep.mubr.msk.bf16.mxu1 %vm2590_vm0, %v2589_v2 }
  0x6b   : > { %2495 = vmatmul.mubr.msk.bf16.gmra.mrb[28].mxu0 %vm1047_vm1, %v1241_v36 }
  0x6c   : > { %2498 = vmatprep.mubr.msk.bf16.mxu0 %vm2590_vm0, %v2589_v2 }
  0x6f   : > { %2525 = vmatmul.mubr.msk.bf16.gmra.mrb[36].mxu1 %vm1047_vm1, %v1369_v41 }
  0x73   : > { %2499 = vmatmul.mubr.msk.bf16.gmra.mrb[32].mxu0 %vm1047_vm1, %v1245_v42 }
  0x74   : > { %2502 = vmatprep.mubr.msk.bf16.mxu0 %vm2590_vm0, %v2589_v2 }
  0x7b   : > { %2503 = vmatmul.mubr.msk.bf16.gmra.mrb[36].mxu0 %vm1047_vm1, %v1250_v45 }
  0xfa   : > { %v1185_v46 = vpop.f32.mrb[0].mxu1 }
  0xfb   : > { %v2466_v47 = vpop.f32.mrb[1].mxu1 }
  0xfc   : > { %v1188_v48 = vpop.f32.mrb[2].mxu1 }
  0xfd   : > { %v2467_v49 = vpop.f32.mrb[3].mxu1 }
 0x102   : > { %v1193_v50 = vpop.f32.mrb[4].mxu1 }
 0x103   : > { %v2470_v51 = vpop.f32.mrb[5].mxu1 }
 0x104   : > { %v1196_v53 = vpop.f32.mrb[6].mxu1 }
 0x105   : > { %v2471_v54 = vpop.f32.mrb[7].mxu1 }
 0x106   : > { %v1097_v55 = vpop.f32.mrb[0].mxu0 }
 0x107   : > { %v1186_v56 = vadd.f32 %v1185_v46, %v1097_v55  ;;  %v2444_v57 = vpop.f32.mrb[1].mxu0 }
 0x108   : > { %v1100_v58 = vpop.f32.mrb[2].mxu0  ;;  %v2592_v57 = vmov 1935823168  }
 0x109   : > { %v1189_v59 = vadd.f32 %v1188_v48, %v1100_v58  ;;  %v2445_v61 = vpop.f32.mrb[3].mxu0  ;;  %v1842_v58 = vunpack.c.l.s4 %v2592_v57 }
 0x10a   : > { %v1201_v2 = vpop.f32.mrb[8].mxu1 }
 0x10b   : > { %v2474_v62 = vpop.f32.mrb[9].mxu1 }
 0x10c   : > { %v1204_v63 = vpop.f32.mrb[10].mxu1 }
 0x10d   : > { %v2475_v0 = vpop.f32.mrb[11].mxu1 }
 0x10e   : > { %v1105_v1 = vpop.f32.mrb[4].mxu0 }
 0x10f   : > { %v1194_v3 = vadd.f32 %v1193_v50, %v1105_v1  ;;  %v2448_v4 = vpop.f32.mrb[5].mxu0 }
 0x110   : > { %v1108_v5 = vpop.f32.mrb[6].mxu0 }
 0x111   : > { %v1197_v7 = vadd.f32 %v1196_v53, %v1108_v5  ;;  %v2449_v9 = vpop.f32.mrb[7].mxu0 }
 0x112   : > { %v1209_v11 = vpop.f32.mrb[12].mxu1 }
 0x113   : > { %v2478_v12 = vpop.f32.mrb[13].mxu1 }
 0x114   : > { %v1212_v13 = vpop.f32.mrb[14].mxu1  ;;  %v1843_v12 = vunpack.c.0.s8 %v1842_v58 }
 0x115   : > { %v2479_v14 = vpop.f32.mrb[15].mxu1 }
 0x116   : > { %v1113_v15 = vpop.f32.mrb[8].mxu0 }
 0x117   : > { %v2864_v17 = vadd.f32 %v1201_v2, %v1113_v15  ;;  %v2452_v18 = vpop.f32.mrb[9].mxu0 }
 0x118   : > { %v1116_v19 = vpop.f32.mrb[10].mxu0 }
 0x119   : > { %v2866_v20 = vadd.f32 %v1204_v63, %v1116_v19  ;;  %v2453_v21 = vpop.f32.mrb[11].mxu0 }
 0x11a   : > { %v1217_v22 = vpop.f32.mrb[16].mxu1 }
 0x11b   : > { %v2482_v35 = vpop.f32.mrb[17].mxu1 }
 0x11c   : > { %v1220_v24 = vpop.f32.mrb[18].mxu1 }
 0x11d   : > { %v2483_v23 = vpop.f32.mrb[19].mxu1 }
 0x11e   : > { %v1121_v31 = vpop.f32.mrb[12].mxu0 }
 0x11f   : > { %v2868_v52 = vadd.f32 %v1209_v11, %v1121_v31  ;;  %v2456_v60 = vpop.f32.mrb[13].mxu0  ;;  %v2896_v31 = vsub.s32 %v1843_v12, %v2650_v6 }
 0x120   : > { %v1124_v10 = vpop.f32.mrb[14].mxu0 }
 0x121   : > { %v2870_v26 = vadd.f32 %v1212_v13, %v1124_v10  ;;  %v2457_v27 = vpop.f32.mrb[15].mxu0 }
 0x122   : > { %v1425_v16 = vpop.f32.mrb[20].mxu1 }
 0x123   : > { %v2510_v25 = vpop.f32.mrb[21].mxu1 }
 0x124   : > { %v1428_v28 = vpop.f32.mrb[22].mxu1 }
 0x125   : > { %v2511_v29 = vpop.f32.mrb[23].mxu1 }
 0x126   : > { %v1129_v30 = vpop.f32.mrb[16].mxu0 }
 0x127   : > { %v2872_v32 = vadd.f32 %v1217_v22, %v1129_v30  ;;  %v2460_v33 = vpop.f32.mrb[17].mxu0 }
 0x128   : > { %v1132_v34 = vpop.f32.mrb[18].mxu0 }
 0x129   : > { %v2461_v36 = vpop.f32.mrb[19].mxu0 }
 0x12a   : > { %v1433_v37 = vpop.f32.mrb[24].mxu1 }
 0x12b   : > { %v2514_v38 = vpop.f32.mrb[25].mxu1 }
 0x12c   : > { %v1436_v39 = vpop.f32.mrb[26].mxu1 }
 0x12d   : > { %v2515_v40 = vpop.f32.mrb[27].mxu1 }
 0x12e   : > { %v1306_v41 = vpop.f32.mrb[20].mxu0 }
 0x12f   : > { %v1344_v42 = vadd.f32 %v1306_v41, %v1186_v56  ;;  %v2488_v43 = vpop.f32.mrb[21].mxu0 }
 0x130   : > { %v1309_v45 = vpop.f32.mrb[22].mxu0 }
 0x131   : > { %v1463_v46 = vadd.f32 %v1425_v16, %v1344_v42  ;;  %v1345_v47 = vadd.f32 %v1309_v45, %v1189_v59  ;;  %v2489_v48 = vpop.f32.mrb[23].mxu0 }
 0x132   : > { %v2879_v49 = vpop.f32.mrb[28].mxu1 }
 0x133   : > { %v1479_v50 = vadd.f32 %v2877_v44, %v1463_v46  ;;  %v1464_v51 = vadd.f32 %v1428_v28, %v1345_v47  ;;  %v2518_v53 = vpop.f32.mrb[29].mxu1 }
 0x134   : > { %v2882_v54 = vpop.f32.mrb[30].mxu1  ;;  %v2163_v53 = vld [vmem:[%s2904_s14 + $0x4] sm:$0x1] }
 0x135   : > { %v1480_v55 = vadd.f32 %v2877_v44, %v1464_v51  ;;  %v2519_v56 = vpop.f32.mrb[31].mxu1  ;;  %v1488_v2 = vmax.f32 %v1479_v50, 0.0 }
 0x136   : > { %v1314_v61 = vpop.f32.mrb[24].mxu0 }
 0x137   : > { %v1489_v62 = vmax.f32 %v1480_v55, 0.0  ;;  %v1346_v63 = vadd.f32 %v1314_v61, %v1194_v3  ;;  %v2492_v59 = vpop.f32.mrb[25].mxu0 }
 0x138   : > { %v1317_v0 = vpop.f32.mrb[26].mxu0 }
 0x139   : > { %v1497_v1 = vpack.c.bf16 %v1489_v62, %v1488_v2  ;;  %v2391_v4 = vpack.c.bf16 %v1489_v62, %v1489_v62  ;;  %v1465_v5 = vadd.f32 %v1433_v37, %v1346_v63  ;;  %v1347_v9 = vadd.f32 %v1317_v0, %v1197_v7  ;;  %v2493_v11 = vpop.f32.mrb[27].mxu0 }
 0x13a   : > { %v2885_v13 = vpop.f32.mrb[32].mxu1 }
 0x13b   : > { %v1514_v14 = vrot.slane %v1497_v1, %v2661_v8  ;;  %v1521_v15 = vrot.slane %v2391_v4, %v2661_v8  ;;  %v1481_v18 = vadd.f32 %v2877_v44, %v1465_v5  ;;  %v1466_v19 = vadd.f32 %v1436_v39, %v1347_v9  ;;  %v2522_v21 = vpop.f32.mrb[33].mxu1 }
 0x13c   : > { %v2890_v3 = vpop.f32.mrb[34].mxu1 }
 0x13d   : > { %v1522_v22 = vcombine.high %v1514_v14, %v1514_v14  ;;  %v1523_v35 = vcombine.high %v1521_v15, %v1521_v15  ;;  %v1530_v24 = vrot.slane %v1514_v14, %v2661_v8  ;;  %v1537_v7 = vrot.slane %v1521_v15, %v2661_v8  ;;  %v2523_v23 = vpop.f32.mrb[35].mxu1 }
 0x13e   : > { %v1490_v60 = vmax.f32 %v1481_v18, 0.0  ;;  %v1482_v10 = vadd.f32 %v2877_v44, %v1466_v19  ;;  %v1322_v27 = vpop.f32.mrb[28].mxu0 }
 0x13f   : > { %v1544_v16 = vrot.slane %v1522_v22, %v2661_v8  ;;  %v1551_v25 = vrot.slane %v1523_v35, %v2661_v8  ;;  %v1552_v28 = vcombine.high %v1530_v24, %v1530_v24  ;;  %v1553_v29 = vcombine.high %v1537_v7, %v1537_v7  ;;  %v2496_v30 = vpop.f32.mrb[29].mxu0 }
 0x140   : > { %v1735_v33 = vunpack.i.l.s16 %v1537_v7  ;;  %v1736_v34 = vunpack.i.h.s16 %v1537_v7  ;;  %v1491_v6 = vmax.f32 %v1482_v10, 0.0  ;;  %v1348_v36 = vadd.f32 %v1322_v27, %v2864_v17  ;;  %v1325_v37 = vpop.f32.mrb[30].mxu0  ;;  %v2167_v30 = vld [vmem:[%s2904_s14 + $0xc] sm:$0x1] }
 0x141   : > { %v1554_v38 = vcombine.high %v1544_v16, %v1544_v16  ;;  %v1555_v39 = vcombine.high %v1551_v25, %v1551_v25  ;;  %v1738_v40 = vunpack.i.h.s16 %v1551_v25  ;;  %v1740_v41 = vunpack.i.h.s16 %v1553_v29  ;;  %v2497_v42 = vpop.f32.mrb[31].mxu0 }
 0x142   : > { %v1839_v43 = vcombine.low %v1530_v24, %v1552_v28  ;;  %v1869_v45 = vrot.slane %v1735_v33, %v2896_v31  ;;  %v1498_v46 = vpack.c.bf16 %v1491_v6, %v1490_v60  ;;  %v2908_v47 = vpop.f32.mrb[36].mxu1  ;;  %v2395_v17 = vpack.i.b16 %v1551_v25, %v1736_v34 }
 0x143   : > { %v2397_v50 = vpack.i.b16 %v1555_v39, %v1740_v41  ;;  %v1840_v51 = vcombine.low %v1544_v16, %v1554_v38  ;;  %v2392_v55 = vpack.c.bf16 %v1491_v6, %v1491_v6  ;;  %v2526_v56 = vpop.f32.mrb[37].mxu1  ;;  %v2396_v57 = vpack.i.b16 %v1553_v29, %v1738_v40 }
 0x144   : > { %v1847_v58 = vrot.slane %v1839_v43, %v2896_v31  ;;  %v1876_v61 = vrot.slane %v1869_v45, %v2896_v31  ;;  %v1563_v2 = vrot.slane %v1498_v46, %v2661_v8  ;;  %v1460_v62 = vpop.f32.mrb[38].mxu1  ;;  %v1742_v0 = vunpack.i.h.s16 %v1555_v39  ;;  %v2171_v43 = vld [vmem:[%s2904_s14 + $0x14] sm:$0x1] }
 0x145   : > { %v1854_v63 = vrot.slane %v1840_v51, %v2896_v31  ;;  %v1570_v59 = vrot.slane %v2392_v55, %v2661_v8  ;;  %v1467_v1 = vadd.f32 %v2879_v49, %v1348_v36  ;;  %v2527_v4 = vpop.f32.mrb[39].mxu1  ;;  %v1349_v12 = vadd.f32 %v1325_v37, %v2866_v20 }
 0x146   : > { %v2164_v5 = vsel %vm2912_vm11, %v1876_v61, %v2163_v53  ;;  %v1571_v9 = vcombine.high %v1563_v2, %v1563_v2  ;;  %v1579_v11 = vrot.slane %v1563_v2, %v2661_v8  ;;  %v1330_v14 = vpop.f32.mrb[32].mxu0  ;;  %v1877_v18 = vcombine.low %v2395_v17, %v2397_v50 }
 0x147   : > { %v1855_v15 = vcombine.low %v1847_v58, %v1854_v63  ;;  %2165 = vst [vmem:[%s2904_s14 + $0x4] sm:$0x1] %v2164_v5  ;;  %v1572_v19 = vcombine.high %v1570_v59, %v1570_v59  ;;  %v1586_v21 = vrot.slane %v1570_v59, %v2661_v8  ;;  %v2500_v22 = vpop.f32.mrb[33].mxu0  ;;  %v1483_v39 = vadd.f32 %v2877_v44, %v1467_v1 }
 0x148   : > { %v1593_v49 = vrot.slane %v1571_v9, %v2661_v8  ;;  %v1601_v35 = vcombine.high %v1579_v11, %v1579_v11  ;;  %v1744_v24 = vunpack.i.h.s16 %v1579_v11  ;;  %v2398_v7 = vpack.i.b16 %v1579_v11, %v1742_v0  ;;  %v1333_v23 = vpop.f32.mrb[34].mxu0 }
 0x149   : > { %v1862_v60 = vrot.slane %v1855_v15, %v2896_v31  ;;  %v1600_v20 = vrot.slane %v1572_v19, %v2661_v8  ;;  %v2501_v10 = vpop.f32.mrb[35].mxu0  ;;  %v1885_v33 = vrot.slane %v1877_v18, %v2896_v31  ;;  %v1468_v45 = vadd.f32 %v2882_v54, %v1349_v12 }
 0x14a   : > { %v1603_v27 = vcombine.high %v1593_v49, %v1593_v49  ;;  %v1878_v16 = vcombine.low %v2396_v57, %v2398_v7  ;;  %v1907_v25 = vrot.slane %v1744_v24, %v2896_v31  ;;  %v1916_v28 = vcombine.low %v1601_v35, %v1586_v21 }
 0x14b   : > { %2160 = vst.msk [vmem:[%s2904_s14] sm:$0xf] %vm2159_vm10, %v1862_v60  ;;  %v1753_v29 = vunpack.i.l.s16 %v1600_v20  ;;  %v1602_v17 = vcombine.high %v1586_v21, %v1586_v21  ;;  %v1350_v51 = vadd.f32 %v1330_v14, %v2868_v52  ;;  %v1351_v53 = vadd.f32 %v1333_v23, %v2870_v26 }
 0x14c   : > { %v1892_v34 = vrot.slane %v1878_v16, %v2896_v31  ;;  %v1914_v6 = vrot.slane %v1907_v25, %v2896_v31  ;;  %v1915_v36 = vcombine.low %v1593_v49, %v1603_v27  ;;  %v1930_v37 = vrot.slane %v1916_v28, %v2896_v31 }
 0x14d   : > { %v1945_v38 = vrot.slane %v1753_v29, %v2896_v31  ;;  %v1484_v58 = vadd.f32 %v2877_v44, %v1468_v45  ;;  %v1604_v2 = vcombine.high %v1600_v20, %v1600_v20  ;;  %v1469_v63 = vadd.f32 %v2885_v13, %v1350_v51 }
 0x14e   : > { %v1893_v40 = vcombine.low %v1885_v33, %v1892_v34  ;;  %v1923_v41 = vrot.slane %v1915_v36, %v2896_v31  ;;  %v2168_v42 = vsel %vm2912_vm11, %v1914_v6, %v2167_v30  ;;  %v1338_v46 = vpop.f32.mrb[36].mxu0  ;;  %v1470_v52 = vadd.f32 %v2890_v3, %v1351_v53 }
 0x14f   : > { %v1952_v50 = vrot.slane %v1945_v38, %v2896_v31  ;;  %2169 = vst [vmem:[%s2904_s14 + $0xc] sm:$0x1] %v2168_v42  ;;  %v2504_v55 = vpop.f32.mrb[37].mxu0  ;;  %v1352_v61 = vadd.f32 %v1338_v46, %v2872_v32  ;;  %v1492_v0 = vmax.f32 %v1483_v39, 0.0  ;;  %v1493_v1 = vmax.f32 %v1484_v58, 0.0 }
 0x150   : > { %v1900_v56 = vrot.slane %v1893_v40, %v2896_v31  ;;  %v1931_v57 = vcombine.low %v1923_v41, %v1930_v37  ;;  %v1341_v54 = vpop.f32.mrb[38].mxu0  ;;  %v1754_v4 = vunpack.i.h.s16 %v1600_v20  ;;  %v1756_v5 = vunpack.i.h.s16 %v1602_v17  ;;  %v2179_v58 = vld [vmem:[%s2904_s14 + $0x24] sm:$0x1] }
 0x151   : > { %v2172_v62 = vsel %vm2912_vm11, %v1952_v50, %v2171_v43  ;;  %v2505_v59 = vpop.f32.mrb[39].mxu0  ;;  %v1471_v32 = vadd.f32 %v2908_v47, %v1352_v61  ;;  %v1485_v9 = vadd.f32 %v2877_v44, %v1469_v63  ;;  %v1486_v11 = vadd.f32 %v2877_v44, %v1470_v52 }
 0x152   : > { %v1938_v26 = vrot.slane %v1931_v57, %v2896_v31  ;;  %2166 = vst.msk [vmem:[%s2904_s14 + $0x8] sm:$0xf] %vm2159_vm10, %v1900_v56  ;;  %2173 = vst [vmem:[%s2904_s14 + $0x14] sm:$0x1] %v2172_v62  ;;  %v1499_v13 = vpack.c.bf16 %v1493_v1, %v1492_v0  ;;  %v2393_v3 = vpack.c.bf16 %v1493_v1, %v1493_v1  ;;  %v1758_v20 = vunpack.i.h.s16 %v1604_v2  ;;  %v2175_v57 = vld [vmem:[%s2904_s14 + $0x1c] sm:$0x1] }
 0x153   : > { %v1487_v12 = vadd.f32 %v2877_v44, %v1471_v32  ;;  %v1494_v14 = vmax.f32 %v1485_v9, 0.0  ;;  %v1495_v15 = vmax.f32 %v1486_v11, 0.0  ;;  %v2399_v47 = vpack.i.b16 %v1602_v17, %v1754_v4 }
 0x154   : > { %2170 = vst.msk [vmem:[%s2904_s14 + $0x10] sm:$0xf] %vm2159_vm10, %v1938_v26  ;;  %v1612_v18 = vrot.slane %v1499_v13, %v2661_v8  ;;  %v1619_v19 = vrot.slane %v2393_v3, %v2661_v8  ;;  %v2400_v22 = vpack.i.b16 %v1604_v2, %v1756_v5 }
 0x155   : > { %v1496_v21 = vmax.f32 %v1487_v12, 0.0  ;;  %v1500_v49 = vpack.c.bf16 %v1495_v15, %v1494_v14  ;;  %v2394_v35 = vpack.c.bf16 %v1495_v15, %v1495_v15 }
 0x156   : > { %v1620_v24 = vcombine.high %v1612_v18, %v1612_v18  ;;  %v1621_v7 = vcombine.high %v1619_v19, %v1619_v19  ;;  %v1628_v23 = vrot.slane %v1612_v18, %v2661_v8  ;;  %v1635_v60 = vrot.slane %v1619_v19, %v2661_v8 }
 0x157   : > { %v1661_v44 = vrot.slane %v1500_v49, %v2661_v8  ;;  %v1668_v10 = vrot.slane %v2394_v35, %v2661_v8  ;;  %v1501_v27 = vpack.c.bf16 %v1496_v21, %v1496_v21 }
 0x158   : > { %v1642_v16 = vrot.slane %v1620_v24, %v2661_v8  ;;  %v1649_v25 = vrot.slane %v1621_v7, %v2661_v8  ;;  %v1650_v28 = vcombine.high %v1628_v23, %v1628_v23  ;;  %v1651_v29 = vcombine.high %v1635_v60, %v1635_v60 }
 0x159   : > { %v1760_v30 = vunpack.i.h.s16 %v1628_v23  ;;  %v2401_v33 = vpack.i.b16 %v1628_v23, %v1758_v20  ;;  %v1669_v34 = vcombine.high %v1661_v44, %v1661_v44  ;;  %v1670_v6 = vcombine.high %v1668_v10, %v1668_v10 }
 0x15a   : > { %v1652_v36 = vcombine.high %v1642_v16, %v1642_v16  ;;  %v1653_v37 = vcombine.high %v1649_v25, %v1649_v25  ;;  %v1762_v38 = vunpack.i.h.s16 %v1642_v16  ;;  %v1771_v39 = vunpack.i.l.s16 %v1651_v29 }
 0x15b   : > { %v1772_v40 = vunpack.i.h.s16 %v1651_v29  ;;  %v2402_v41 = vpack.i.b16 %v1642_v16, %v1760_v30  ;;  %v1953_v42 = vcombine.low %v2399_v47, %v2401_v33  ;;  %v1991_v43 = vcombine.low %v1650_v28, %v1635_v60  ;;  %v2183_v60 = vld [vmem:[%s2904_s14 + $0x2c] sm:$0x1]  ;;  %v2187_v29 = vld [vmem:[%s2904_s14 + $0x34] sm:$0x1] }
 0x15c   : > { %v1774_v45 = vunpack.i.h.s16 %v1653_v37  ;;  %v1983_v46 = vrot.slane %v1762_v38, %v2896_v31  ;;  %v1992_v17 = vcombine.low %v1652_v36, %v1649_v25  ;;  %v2021_v50 = vrot.slane %v1771_v39, %v2896_v31 }
 0x15d   : > { %v2403_v51 = vpack.i.b16 %v1653_v37, %v1772_v40  ;;  %v1954_v53 = vcombine.low %v2400_v22, %v2402_v41  ;;  %v1961_v55 = vrot.slane %v1953_v42, %v2896_v31  ;;  %v1999_v56 = vrot.slane %v1991_v43, %v2896_v31 }
 0x15e   : > { %v1990_v61 = vrot.slane %v1983_v46, %v2896_v31  ;;  %v2006_v54 = vrot.slane %v1992_v17, %v2896_v31  ;;  %v2028_v2 = vrot.slane %v2021_v50, %v2896_v31  ;;  %v1677_v62 = vrot.slane %v1661_v44, %v2661_v8 }
 0x15f   : > { %v1968_v63 = vrot.slane %v1954_v53, %v2896_v31  ;;  %v1684_v52 = vrot.slane %v1668_v10, %v2661_v8  ;;  %v1691_v59 = vrot.slane %v1669_v34, %v2661_v8  ;;  %v1698_v26 = vrot.slane %v1670_v6, %v2661_v8 }
 0x160   : > { %v2007_v0 = vcombine.low %v1999_v56, %v2006_v54  ;;  %v2176_v1 = vsel %vm2912_vm11, %v1990_v61, %v2175_v57  ;;  %v2180_v32 = vsel %vm2912_vm11, %v2028_v2, %v2179_v58  ;;  %v1699_v4 = vcombine.high %v1677_v62, %v1677_v62  ;;  %v2191_v54 = vld [vmem:[%s2904_s14 + $0x3c] sm:$0x1] }
 0x161   : > { %v1969_v5 = vcombine.low %v1961_v55, %v1968_v63  ;;  %2177 = vst [vmem:[%s2904_s14 + $0x1c] sm:$0x1] %v2176_v1  ;;  %2181 = vst [vmem:[%s2904_s14 + $0x24] sm:$0x1] %v2180_v32  ;;  %v1700_v9 = vcombine.high %v1684_v52, %v1684_v52  ;;  %v1701_v11 = vcombine.high %v1691_v59, %v1691_v59  ;;  %v1776_v12 = vunpack.i.h.s16 %v1677_v62 }
 0x162   : > { %v1702_v13 = vcombine.high %v1698_v26, %v1698_v26  ;;  %v2014_v3 = vrot.slane %v2007_v0, %v2896_v31  ;;  %v1778_v14 = vunpack.i.h.s16 %v1691_v59  ;;  %v1780_v15 = vunpack.i.h.s16 %v1699_v4 }
 0x163   : > { %v1976_v18 = vrot.slane %v1969_v5, %v2896_v31  ;;  %v2404_v21 = vpack.i.b16 %v1677_v62, %v1774_v45  ;;  %v2067_v47 = vcombine.low %v1701_v11, %v1698_v26  ;;  %v2405_v22 = vpack.i.b16 %v1691_v59, %v1776_v12 }
 0x164   : > { %v1789_v19 = vunpack.i.l.s16 %v1702_v13  ;;  %2178 = vst.msk [vmem:[%s2904_s14 + $0x20] sm:$0xf] %vm2159_vm10, %v2014_v3  ;;  %v2406_v49 = vpack.i.b16 %v1699_v4, %v1778_v14  ;;  %v2059_v35 = vrot.slane %v1780_v15, %v2896_v31  ;;  %v2068_v24 = vcombine.low %v1684_v52, %v1700_v9 }
 0x165   : > { %2174 = vst.msk [vmem:[%s2904_s14 + $0x18] sm:$0xf] %vm2159_vm10, %v1976_v18  ;;  %v2075_v7 = vrot.slane %v2067_v47, %v2896_v31  ;;  %v1709_v20 = vrot.slane %v1501_v27, %v2661_v8  ;;  %v1790_v44 = vunpack.i.h.s16 %v1702_v13  ;;  %v2029_v10 = vcombine.low %v2403_v51, %v2405_v22 }
 0x166   : > { %v2097_v23 = vrot.slane %v1789_v19, %v2896_v31  ;;  %v2030_v16 = vcombine.low %v2404_v21, %v2406_v49  ;;  %v2066_v25 = vrot.slane %v2059_v35, %v2896_v31  ;;  %v2082_v28 = vrot.slane %v2068_v24, %v2896_v31 }
 0x167   : > { %v1710_v33 = vcombine.high %v1709_v20, %v1709_v20  ;;  %v1717_v34 = vrot.slane %v1709_v20, %v2661_v8  ;;  %v2037_v6 = vrot.slane %v2029_v10, %v2896_v31 }
 0x168   : > { %v2104_v30 = vrot.slane %v2097_v23, %v2896_v31  ;;  %v2044_v36 = vrot.slane %v2030_v16, %v2896_v31  ;;  %v2083_v27 = vcombine.low %v2075_v7, %v2082_v28  ;;  %v2184_v37 = vsel %vm2912_vm11, %v2066_v25, %v2183_v60 }
 0x169   : > { %2185 = vst [vmem:[%s2904_s14 + $0x2c] sm:$0x1] %v2184_v37  ;;  %v1724_v39 = vrot.slane %v1710_v33, %v2661_v8  ;;  %v1725_v40 = vcombine.high %v1717_v34, %v1717_v34  ;;  %v1792_v41 = vunpack.i.h.s16 %v1717_v34  ;;  %v2407_v45 = vpack.i.b16 %v1717_v34, %v1790_v44 }
 0x16a   : > { %v2188_v38 = vsel %vm2912_vm11, %v2104_v30, %v2187_v29  ;;  %v2045_v42 = vcombine.low %v2037_v6, %v2044_v36  ;;  %v2090_v43 = vrot.slane %v2083_v27, %v2896_v31 }
 0x16b   : > { %2189 = vst [vmem:[%s2904_s14 + $0x34] sm:$0x1] %v2188_v38  ;;  %v1726_v46 = vcombine.high %v1724_v39, %v1724_v39  ;;  %v1794_v17 = vunpack.i.h.s16 %v1724_v39  ;;  %v1796_v50 = vunpack.i.h.s16 %v1725_v40  ;;  %v2408_v8 = vpack.i.b16 %v1724_v39, %v1792_v41 }
 0x16c   : > { %v2052_v51 = vrot.slane %v2045_v42, %v2896_v31  ;;  %2186 = vst.msk [vmem:[%s2904_s14 + $0x30] sm:$0xf] %vm2159_vm10, %v2090_v43 }
 0x16d   : > { %v1798_v53 = vunpack.i.h.s16 %v1726_v46  ;;  %v2409_v55 = vpack.i.b16 %v1725_v40, %v1794_v17  ;;  %v2410_v56 = vpack.i.b16 %v1726_v46, %v1796_v50 }
 0x16e   : > { %2182 = vst.msk [vmem:[%s2904_s14 + $0x28] sm:$0xf] %vm2159_vm10, %v2052_v51 }
 0x16f   : > { %v2105_v57 = vcombine.low %v2407_v45, %v2409_v55  ;;  %v2106_v58 = vcombine.low %v2408_v8, %v2410_v56  ;;  %v2135_v61 = vrot.slane %v1798_v53, %v2896_v31 }
 0x171   : > { %v2113_v2 = vrot.slane %v2105_v57, %v2896_v31  ;;  %v2120_v62 = vrot.slane %v2106_v58, %v2896_v31  ;;  %v2142_v63 = vrot.slane %v2135_v61, %v2896_v31 }
 0x173   : > { %v2121_v52 = vcombine.low %v2113_v2, %v2120_v62  ;;  %v2192_v59 = vsel %vm2912_vm11, %v2142_v63, %v2191_v54 }
 0x174   : > { %2193 = vst [vmem:[%s2904_s14 + $0x3c] sm:$0x1] %v2192_v59 }
 0x175   : > { %v2128_v26 = vrot.slane %v2121_v52, %v2896_v31 }
 0x177   : > { %2190 = vst.msk [vmem:[%s2904_s14 + $0x38] sm:$0xf] %vm2159_vm10, %v2128_v26 }
 0x178 PF: > { %s14_s17 = sadd.s32 1, %s2587_s17   ;;  %s3054_s15 = smov %s2583_s16 }
 0x179   : > { %p11_p5 = scmp.ge.s32.totalorder %s14_s17, 4   ;;  %s3055_s16 = smov %s3057_s18 }
 0x17b   :  { %13 = sbr.rel (!%p11_p5) target bundleno = 2 (0x2), region = 72 }

// kernel: conv_autoencoder_forward.5
= control target key start
LH: loop header
LB: loop body
LE: loop exit
PB: predicated region body
PF: predicated region fallthrough
CT: control target
= control target key end

     0   :  { %s2128_s15 = smov 0   ;;  %s2130_s16 = smov 0   ;;  %s2460_s0 = inlined_call_operand.vmem [shape: bf16[2,5,5,256], index: 0, kind: input, shape index: {}, may-alias: {0,1}]   ;;  %s2461_s1 = inlined_call_operand.vmem [shape: bf16[2,5,5,256], index: 1, kind: input, shape index: {}, may-alias: {0,1}]   ;;  %s2462_s2 = inlined_call_operand.vmem [shape: bf16[4,256,128], index: 2, kind: input, shape index: {}]   ;;  %s2463_s3 = inlined_call_operand.vmem [shape: f32[1,128], index: 3, kind: input, shape index: {}]   ;;  %s2464_s4 = inlined_call_operand.vmem [shape: bf16[2,4,5,128], index: 4, kind: output, shape index: {}]  }
   0x1   :  { %s2132_s17 = smov 0  }
   0x2 LB: > { %s26_s18 = sadd.s32 1, %s2095_s16  ;;  %p1682_p0 = scmp.ge.s32.totalorder %s2099_s17, 1  ;;  %s2099_s17 = sphi %s2132_s17, %s14_s17   ;;  %s2095_s16 = sphi %s2130_s16, %s2468_s16   ;;  %s2091_s15 = sphi %s2128_s15, %s2467_s15  }
   0x3   : > { %p28_p1 = scmp.ge.s32.totalorder %s26_s18, 2  ;;  %p218_p2 = scmp.lt.s32.totalorder %s2099_s17, 3 }
   0x5   : > { %s2470_s18 = smov (%p28_p1, %s26_s18), 0  ;;  %p219_p3 = pnand %p1682_p0, %p218_p2 }
   0x6   : > { %v2011_v0 = vld [vmem:[%s2462_s2 + $0xc0] sm:$0xff] (!%p219_p3)   ;;  %p275_p4 = scmp.lt.s32.totalorder (!%p219_p3), %s2091_s15, 1  ;;  %v2015_v4 = vld [vmem:[%s2462_s2 + $0xc8] sm:$0xff] (!%p219_p3)   ;;  %v2019_v8 = vld [vmem:[%s2462_s2 + $0xd0] sm:$0xff] (!%p219_p3)   ;;  %v333_v30 = vlaneseq (!%p219_p3)  ;;  %v2101_v35 = vmov (!%p219_p3), 1966171168  }
   0x7   : > { %222 = sbr.rel (%p219_p3) target bundleno = 332 (0x14c), region = 36  ;;  %v2012_v1 = vld [vmem:[%s2462_s2 + $0x40] sm:$0xff] (!%p219_p3)   ;;  %1870 = vmatprep.subr.bf16.mxu0 (!%p219_p3), %v2011_v0  ;;  %v2016_v5 = vld [vmem:[%s2462_s2 + $0x48] sm:$0xff] (!%p219_p3)   ;;  %v2020_v9 = vld [vmem:[%s2462_s2 + $0x50] sm:$0xff] (!%p219_p3)   ;;  %v331_v36 = vunpack.c.l.s4 (!%p219_p3), %v2101_v35  ;;  %vm552_vm0 = vcmask (!%p219_p3), 1044480   ;;  %vm543_vm2 = vcmask (!%p219_p3), 1041408  }
   0x8   : > { %v2013_v2 = vld [vmem:[%s2462_s2 + $0x80] sm:$0xff] (!%p219_p3)   ;;  %1898 = vmatprep.subr.bf16.mxu1 (!%p219_p3), %v2012_v1  ;;  %v2017_v6 = vld [vmem:[%s2462_s2 + $0x88] sm:$0xff] (!%p219_p3)   ;;  %v2021_v10 = vld [vmem:[%s2462_s2 + $0x90] sm:$0xff] (!%p219_p3)   ;;  %v2248_v37 = vshrl.u32 (!%p219_p3), %v333_v30, 7  ;;  %vm553_vm1 = vsmask.f32 (!%p219_p3), 4352 }
   0x9   : > { %v2014_v3 = vld [vmem:[%s2462_s2] sm:$0xff] (!%p219_p3)   ;;  %1871 = vmatpush3.bf16.msra.mxu0 (!%p219_p3), %v2013_v2  ;;  %v2018_v7 = vld [vmem:[%s2462_s2 + $0x8] sm:$0xff] (!%p219_p3)   ;;  %v2022_v11 = vld [vmem:[%s2462_s2 + $0x10] sm:$0xff] (!%p219_p3)   ;;  %v332_v41 = vunpack.c.0.s8 (!%p219_p3), %v331_v36  ;;  %vm622_vm4 = vsmask.f32 (!%p219_p3), 7424  ;;  %vm1552_vm6 = vcmask (!%p219_p3), 1042432  }
   0xa   : > { %1899 = vmatpush3.bf16.msra.mxu1 (!%p219_p3), %v2014_v3  ;;  %1872 = vmatprep.subr.bf16.mxu0 (!%p219_p3), %v2015_v4  ;;  %v2023_v12 = vld [vmem:[%s2462_s2 + $0xd8] sm:$0xff] (!%p219_p3)   ;;  %v2027_v16 = vld [vmem:[%s2462_s2 + $0xe0] sm:$0xff] (!%p219_p3)   ;;  %v2031_v20 = vld [vmem:[%s2462_s2 + $0xe8] sm:$0xff] (!%p219_p3)   ;;  %vm978_vm5 = vsmask.f32 (!%p219_p3), 5376 }
   0xb   : > { %1900 = vmatprep.subr.bf16.mxu1 (!%p219_p3), %v2016_v5  ;;  %v2024_v13 = vld [vmem:[%s2462_s2 + $0x58] sm:$0xff] (!%p219_p3)   ;;  %v2028_v17 = vld [vmem:[%s2462_s2 + $0x60] sm:$0xff] (!%p219_p3)   ;;  %v2032_v21 = vld [vmem:[%s2462_s2 + $0x68] sm:$0xff] (!%p219_p3)   ;;  %v2251_v45 = vsub.s32 (!%p219_p3), %v332_v41, %v2248_v37  ;;  %vm1553_vm7 = vsmask.f32 (!%p219_p3), 2304 }
   0xc   : > { %v2025_v14 = vld [vmem:[%s2462_s2 + $0x98] sm:$0xff] (!%p219_p3)   ;;  %v2029_v18 = vld [vmem:[%s2462_s2 + $0xa0] sm:$0xff] (!%p219_p3)   ;;  %v2033_v22 = vld [vmem:[%s2462_s2 + $0xa8] sm:$0xff] (!%p219_p3)  }
   0xd   : > { %1873 = vmatpush3.bf16.msra.mxu0 (!%p219_p3), %v2017_v6  ;;  %v2026_v15 = vld [vmem:[%s2462_s2 + $0x18] sm:$0xff] (!%p219_p3)   ;;  %v2030_v19 = vld [vmem:[%s2462_s2 + $0x20] sm:$0xff] (!%p219_p3)   ;;  %v2034_v23 = vld [vmem:[%s2462_s2 + $0x28] sm:$0xff] (!%p219_p3)  }
   0xe   : > { %s2472_s15 = smov (!%p275_p4, %s2091_s15), 1  ;;  %1901 = vmatpush3.bf16.msra.mxu1 %v2018_v7  ;;  %1874 = vmatprep.subr.bf16.mxu0 %v2019_v8  ;;  %v2035_v24 = vld [vmem:[%s2462_s2 + $0xf0] sm:$0xff]   ;;  %v2039_v28 = vld [vmem:[%s2462_s2 + $0xf8] sm:$0xff]   ;;  %v2045_v46 = vld [vmem:[%s2462_s2 + $0x140] sm:$0xff]  }
   0xf   : > { %1902 = vmatprep.subr.bf16.mxu1 %v2020_v9  ;;  %v2036_v25 = vld [vmem:[%s2462_s2 + $0x70] sm:$0xff]   ;;  %s1982_s29 = smul.u32 40, %s2472_s15  ;;  %v2040_v29 = vld [vmem:[%s2462_s2 + $0x78] sm:$0xff]   ;;  %v2046_v47 = vld [vmem:[%s2462_s2 + $0x1c0] sm:$0xff]   ;;  %s1869_s25 = sshll.u32 %s2472_s15, 4 }
  0x10   : > { %v2037_v26 = vld [vmem:[%s2462_s2 + $0xb0] sm:$0xff]   ;;  %v2041_v31 = vld [vmem:[%s2462_s2 + $0xb8] sm:$0xff]   ;;  %vm554_vm3 = vmand %vm552_vm0, %vm553_vm1  ;;  %s2426_s28 = scalar_lea.vmem %s2464_s4, %s1869_s25 }
  0x11   : > { %1875 = vmatpush3.bf16.msra.mxu0 %v2021_v10  ;;  %v2038_v27 = vld [vmem:[%s2462_s2 + $0x30] sm:$0xff]   ;;  %s283_s14 = scalar_lea.vmem %s2460_s0, %s1982_s29  ;;  %v2042_v32 = vld [vmem:[%s2462_s2 + $0x38] sm:$0xff]   ;;  %s1868_s21 = sadd.s32 32, %s1982_s29  ;;  %vm2431_vm8 = vmand %vm1552_vm6, %vm1553_vm7 }
  0x12   : > { %1903 = vmatpush3.bf16.msra.mxu1 %v2022_v11  ;;  %1876 = vmatprep.subr.bf16.mxu0 %v2023_v12  ;;  %v1687_v33 = vld.sshfl [vmem:[%s283_s14] sm:$0x5f pattern:$0x75316420]  ;;  %s300_s26 = scalar_lea.vmem %s2461_s1, %s1868_s21 }
  0x13   : > { %1904 = vmatprep.subr.bf16.mxu1 %v2024_v13  ;;  %v1688_v34 = vld.sshfl [vmem:[%s283_s14 + $0x8] sm:$0x5f pattern:$0x75316420]  ;;  %v329_v40 = vcombine.high %v1687_v33, %v1687_v33  ;;  %v336_v48 = vrot.slane %v1687_v33, %v2251_v45  ;;  %v434_v60 = vld [vmem:[%s300_s26] sm:$0x77] }
  0x14   : > { %v1689_v38 = vld.sshfl [vmem:[%s283_s14 + $0x10] sm:$0x5f pattern:$0x75316420]  ;;  %v352_v42 = vcombine.high %v1688_v34, %v1688_v34  ;;  %v359_v50 = vrot.slane %v1688_v34, %v2251_v45  ;;  %v1697_v8 = vcombine.low %v434_v60, %v434_v60  ;;  %v1698_v12 = vcombine.high %v434_v60, %v434_v60  ;;  %v2048_v34 = vld [vmem:[%s2462_s2 + $0x180] sm:$0xff]  }
  0x15   : > { %1877 = vmatpush3.bf16.msra.mxu0 %v2025_v14  ;;  %v1690_v39 = vld.sshfl [vmem:[%s283_s14 + $0x18] sm:$0x5f pattern:$0x75316420]  ;;  %v375_v43 = vcombine.high %v1689_v38, %v1689_v38  ;;  %v343_v49 = vrot.slane %v329_v40, %v2251_v45  ;;  %v382_v52 = vrot.slane %v1689_v38, %v2251_v45  ;;  %v344_v56 = vcombine.high %v336_v48, %v336_v48 }
  0x16   : > { %1905 = vmatpush3.bf16.msra.mxu1 %v2026_v15  ;;  %1878 = vmatprep.subr.bf16.mxu0 %v2027_v16  ;;  %v398_v44 = vcombine.high %v1690_v39, %v1690_v39  ;;  %v366_v51 = vrot.slane %v352_v42, %v2251_v45  ;;  %v405_v54 = vrot.slane %v1690_v39, %v2251_v45  ;;  %v420_v58 = vunpack.i.h.s16 %v359_v50  ;;  %v2050_v39 = vld [vmem:[%s2462_s2 + $0x1c8] sm:$0xff]  }
  0x17   : > { %1906 = vmatprep.subr.bf16.mxu1 %v2028_v17  ;;  %v389_v53 = vrot.slane %v375_v43, %v2251_v45  ;;  %v367_v57 = vcombine.high %v359_v50, %v359_v50  ;;  %v390_v61 = vcombine.high %v382_v52, %v382_v52  ;;  %v1691_v1 = vpack.i.b16 %v359_v50, %v344_v56 }
  0x18   : > { %v412_v55 = vrot.slane %v398_v44, %v2251_v45  ;;  %v422_v59 = vunpack.i.h.s16 %v366_v51  ;;  %v413_v62 = vcombine.high %v405_v54, %v405_v54  ;;  %v430_v63 = vunpack.i.h.s16 %v405_v54 }
  0x19   : > { %1879 = vmatpush3.bf16.msra.mxu0 %v2029_v18  ;;  %v1692_v2 = vpack.i.b16 %v366_v51, %v420_v58  ;;  %v445_v4 = vcombine.low %v336_v48, %v343_v49  ;;  %v1694_v5 = vpack.i.b16 %v405_v54, %v390_v61  ;;  %v2052_v51 = vld [vmem:[%s2462_s2 + $0x188] sm:$0xff]  }
  0x1a   : > { %1907 = vmatpush3.bf16.msra.mxu1 %v2030_v19  ;;  %1880 = vmatprep.subr.bf16.mxu0 %v2031_v20  ;;  %v432_v0 = vunpack.i.h.s16 %v412_v55  ;;  %v1693_v3 = vpack.i.b16 %v367_v57, %v422_v59  ;;  %v1695_v6 = vpack.i.b16 %v412_v55, %v430_v63  ;;  %v541_v19 = vrot.slane %v1697_v8, 6  ;;  %v2047_v55 = vld [vmem:[%s2462_s2 + $0x100] sm:$0xff]   ;;  %v2049_v57 = vld [vmem:[%s2462_s2 + $0x148] sm:$0xff]   ;;  %v2056_v59 = vld [vmem:[%s2462_s2 + $0x190] sm:$0xff]  }
  0x1b   : > { %1908 = vmatprep.subr.bf16.mxu1 %v2032_v21  ;;  %v446_v9 = vcombine.low %v1691_v1, %v1692_v2  ;;  %v455_v11 = vrot.slane %v445_v4, %v2251_v45  ;;  %v448_v13 = vcombine.low %v389_v53, %v1694_v5  ;;  %v542_v21 = vrot.slane %v1698_v12, 6  ;;  %v2051_v1 = vld [vmem:[%s2462_s2 + $0x108] sm:$0xff]   ;;  %v2060_v8 = vld [vmem:[%s2462_s2 + $0x198] sm:$0xff]  }
  0x1c   : > { %v1696_v7 = vpack.i.b16 %v413_v62, %v432_v0  ;;  %v447_v10 = vcombine.low %v1693_v3, %v382_v52  ;;  %v2054_v52 = vld [vmem:[%s2462_s2 + $0x1d0] sm:$0xff]   ;;  %v2058_v62 = vld [vmem:[%s2462_s2 + $0x1d8] sm:$0xff]  }
  0x1d   : > { %1881 = vmatpush3.bf16.msra.mxu0 %v2033_v22  ;;  %v462_v15 = vrot.slane %v446_v9, %v2251_v45  ;;  %v476_v17 = vrot.slane %v448_v13, %v2251_v45 }
  0x1e   : > { %1909 = vmatpush3.bf16.msra.mxu1 %v2034_v23  ;;  %1882 = vmatprep.subr.bf16.mxu0 %v2035_v24  ;;  %v511_v14 = vcombine.low %v1695_v6, %v1696_v7  ;;  %v469_v16 = vrot.slane %v447_v10, %v2251_v45  ;;  %v2053_v6 = vld [vmem:[%s2462_s2 + $0x150] sm:$0xff]   ;;  %v2062_v10 = vld [vmem:[%s2462_s2 + $0x1e0] sm:$0xff]  }
  0x1f   : > { %1910 = vmatprep.subr.bf16.mxu1 %v2036_v25  ;;  %v478_v20 = vcombine.high %v455_v11, %v462_v15  ;;  %v477_v22 = vcombine.low %v455_v11, %v462_v15  ;;  %v2055_v15 = vld [vmem:[%s2462_s2 + $0x110] sm:$0xff]  }
  0x20   : > { %v518_v18 = vrot.slane %v511_v14, %v2251_v45  ;;  %v480_v23 = vcombine.high %v469_v16, %v476_v17  ;;  %v479_v25 = vcombine.low %v469_v16, %v476_v17  ;;  %v2057_v16 = vld [vmem:[%s2462_s2 + $0x158] sm:$0xff]   ;;  %v2064_v17 = vld [vmem:[%s2462_s2 + $0x1a0] sm:$0xff]  }
  0x21   : > { %1883 = vmatpush3.bf16.msra.mxu0 %v2037_v26 }
  0x22   : > { %1911 = vmatpush3.bf16.msra.mxu1 %v2038_v27  ;;  %1884 = vmatprep.subr.bf16.mxu0 %v2039_v28  ;;  %v519_v24 = vcombine.high %v518_v18, %v518_v18  ;;  %v526_v26 = vrot.slane %v518_v18, %v2251_v45  ;;  %v494_v27 = vrot.slane %v478_v20, %v2251_v45  ;;  %v2066_v18 = vld [vmem:[%s2462_s2 + $0x1e8] sm:$0xff]   ;;  %v2059_v20 = vld [vmem:[%s2462_s2 + $0x118] sm:$0xff]  }
  0x23   : > { %1912 = vmatprep.subr.bf16.mxu1 %v2040_v29  ;;  %v487_v28 = vrot.slane %v477_v22, %v2251_v45  ;;  %v508_v29 = vrot.slane %v480_v23, %v2251_v45  ;;  %v2068_v22 = vld [vmem:[%s2462_s2 + $0x1a8] sm:$0xff]   ;;  %v2070_v23 = vld [vmem:[%s2462_s2 + $0x1f0] sm:$0xff]  }
  0x24   : > { %v533_v30 = vrot.slane %v519_v24, %v2251_v45  ;;  %v2063_v24 = vld [vmem:[%s2462_s2 + $0x120] sm:$0xff]  }
  0x25   : > { %1885 = vmatpush3.bf16.msra.mxu0 %v2041_v31  ;;  %v501_v31 = vrot.slane %v479_v25, %v2251_v45  ;;  %v510_v35 = vcombine.low %v494_v27, %v508_v29  ;;  %v2065_v25 = vld [vmem:[%s2462_s2 + $0x168] sm:$0xff]   ;;  %v2074_v27 = vld [vmem:[%s2462_s2 + $0x1f8] sm:$0xff]   ;;  %v2069_v29 = vld [vmem:[%s2462_s2 + $0x170] sm:$0xff]  }
  0x26   : > { %1913 = vmatpush3.bf16.msra.mxu1 %v2042_v32  ;;  %1926 = vmatprep.subr.bf16.mxu0 %v2045_v46  ;;  %v546_v32 = vsel %vm543_vm2, %v526_v26, %v541_v19  ;;  %v550_v36 = vsel %vm543_vm2, %v533_v30, %v542_v21  ;;  %v2061_v21 = vld [vmem:[%s2462_s2 + $0x160] sm:$0xff]   ;;  %v2072_v26 = vld [vmem:[%s2462_s2 + $0x1b0] sm:$0xff]   ;;  %v2076_v30 = vld [vmem:[%s2462_s2 + $0x1b8] sm:$0xff]  }
  0x27   : > { %1954 = vmatprep.subr.bf16.mxu1 %v2046_v47  ;;  %v2283_v33 = vsel %vm554_vm3, %v546_v32, 0  ;;  %v2289_v38 = vcombine.low %v487_v28, %v501_v31  ;;  %v2294_v40 = vsel %vm554_vm3, %v550_v36, 0  ;;  %v636_v42 = vshrl.u32 %v510_v35, 16  ;;  %929 = vmatprep.mubr.bf16.mxu1 %v510_v35  ;;  %v2067_v28 = vld [vmem:[%s2462_s2 + $0x128] sm:$0xff]  }
  0x28   : > { %v631_v41 = vshll.u32 %v2283_v33, 16  ;;  %v638_v43 = vshll.u32 %v510_v35, 16  ;;  %v643_v44 = vshll.u32 %v2294_v40, 16  ;;  %v650_v48 = vshrl.u32 %v2294_v40, 16 }
  0x29   : > { %v624_v46 = vshrl.u32 %v2289_v38, 16  ;;  %v626_v47 = vshll.u32 %v2289_v38, 16  ;;  %930 = vmatmul.mubr.bf16.vlgmr.msra.gmra.mrb[0].mxu1 %v2289_v38  ;;  %v986_v2 = vrot.slane %v636_v42, 2  ;;  %v647_v4 = vshrl.u32 %v2283_v33, 16 }
  0x2a   : > { %v640_v49 = vrot.slane %v638_v43, 1  ;;  %v645_v50 = vrot.slane %v643_v44, 1  ;;  %1955 = vmatpush3.bf16.msra.mxu1 %v2048_v34  ;;  %937 = vmatprep.mubr.bf16.mxu1 %v2294_v40  ;;  %v633_v54 = vrot.slane %v631_v41, 1  ;;  %v989_v63 = vrot.slane %v650_v48, 2 }
  0x2b   : > { %v628_v53 = vrot.slane %v626_v47, 1  ;;  %1956 = vmatprep.subr.bf16.mxu1 %v2050_v39  ;;  %v987_v3 = vrot.slane %v638_v43, 3  ;;  %v990_v5 = vrot.slane %v643_v44, 3  ;;  %v1182_v7 = vrot.slane %v510_v35, 3  ;;  %v2071_v39 = vld [vmem:[%s2462_s2 + $0x130] sm:$0xff]  }
  0x2c   : > { %v641_v56 = vor.u32 %v640_v49, %v636_v42  ;;  %v652_v60 = vor.u32 %v650_v48, %v645_v50  ;;  %v1183_v9 = vrot.slane %v2294_v40, 3  ;;  %v649_v13 = vor.u32 %v647_v4, %v633_v54  ;;  %v2073_v42 = vld [vmem:[%s2462_s2 + $0x178] sm:$0xff]  }
  0x2d   : > { %v629_v58 = vor.u32 %v628_v53, %v624_v46  ;;  %v988_v11 = vor.u32 %v987_v3, %v986_v2  ;;  %v991_v12 = vor.u32 %v990_v5, %v989_v63  ;;  %v1179_v31 = vrot.slane %v2289_v38, 3 }
  0x2e   : > { %v646_v61 = vsel %vm622_vm4, %v641_v56, %v645_v50  ;;  %1957 = vmatpush3.bf16.msra.mxu1 %v2052_v51  ;;  %v1184_v14 = vsel %vm552_vm0, %v1182_v7, %v1183_v9  ;;  %v1180_v32 = vrot.slane %v2283_v33, 3  ;;  %v979_v34 = vrot.slane %v624_v46, 2 }
  0x2f   : > { %785 = vmatprep.mubr.bf16.mxu0 %v646_v61  ;;  %v634_v0 = vsel %vm622_vm4, %v629_v58, %v633_v54  ;;  %1958 = vmatprep.subr.bf16.mxu1 %v2054_v52  ;;  %v992_v19 = vsel %vm978_vm5, %v988_v11, %v991_v12  ;;  %v983_v35 = vrot.slane %v631_v41, 3  ;;  %v982_v36 = vrot.slane %v647_v4, 2 }
  0x30   : > { %786 = vmatmul.mubr.bf16.vlgmr.msra.gmra.mrb[0].mxu0 %v634_v0  ;;  %v980_v40 = vrot.slane %v626_v47, 3  ;;  %v1181_v43 = vsel %vm552_vm0, %v1179_v31, %v1180_v32 }
  0x31   : > { %1927 = vmatpush3.bf16.msra.mxu0 %v2047_v55  ;;  %793 = vmatprep.mubr.bf16.mxu0 %v652_v60  ;;  %v984_v44 = vor.u32 %v983_v35, %v982_v36 }
  0x32   : > { %1928 = vmatprep.subr.bf16.mxu0 %v2049_v57  ;;  %1959 = vmatpush3.bf16.msra.mxu1 %v2056_v59  ;;  %v981_v41 = vor.u32 %v980_v40, %v979_v34 }
  0x33   : > { %1960 = vmatprep.subr.bf16.mxu1 %v2058_v62  ;;  %938 = vmatmul.mubr.bf16.gmra.mrb[4].mxu1 %v2283_v33  ;;  %v2075_v33 = vld [vmem:[%s2462_s2 + $0x138] sm:$0xff]  }
  0x34   : > { %1317 = vmatprep.mubr.bf16.mxu1 %v1184_v14  ;;  %v985_v38 = vsel %vm978_vm5, %v981_v41, %v984_v44 }
  0x35   : > { %1929 = vmatpush3.bf16.msra.mxu0 %v2051_v1 }
  0x36   : > { %1930 = vmatprep.subr.bf16.mxu0 %v2053_v6  ;;  %1961 = vmatpush3.bf16.msra.mxu1 %v2060_v8 }
  0x37   : > { %1962 = vmatprep.subr.bf16.mxu1 %v2062_v10 }
  0x38   : > { %794 = vmatmul.mubr.bf16.gmra.mrb[4].mxu0 %v649_v13 }
  0x39   : > { %1931 = vmatpush3.bf16.msra.mxu0 %v2055_v15  ;;  %1125 = vmatprep.mubr.bf16.mxu0 %v992_v19 }
  0x3a   : > { %1932 = vmatprep.subr.bf16.mxu0 %v2057_v16  ;;  %1963 = vmatpush3.bf16.msra.mxu1 %v2064_v17 }
  0x3b   : > { %1964 = vmatprep.subr.bf16.mxu1 %v2066_v18 }
  0x3d   : > { %1933 = vmatpush3.bf16.msra.mxu0 %v2059_v20 }
  0x3e   : > { %1934 = vmatprep.subr.bf16.mxu0 %v2061_v21  ;;  %1965 = vmatpush3.bf16.msra.mxu1 %v2068_v22 }
  0x3f   : > { %1966 = vmatprep.subr.bf16.mxu1 %v2070_v23 }
  0x41   : > { %1935 = vmatpush3.bf16.msra.mxu0 %v2063_v24 }
  0x42   : > { %1936 = vmatprep.subr.bf16.mxu0 %v2065_v25  ;;  %1967 = vmatpush3.bf16.msra.mxu1 %v2072_v26  ;;  %v1859_v25 = vld [vmem:[%s2463_s3] ss:$0 sm:$0xff] }
  0x43   : > { %1968 = vmatprep.subr.bf16.mxu1 %v2074_v27 }
  0x45   : > { %1937 = vmatpush3.bf16.msra.mxu0 %v2067_v28 }
  0x46   : > { %1938 = vmatprep.subr.bf16.mxu0 %v2069_v29  ;;  %1969 = vmatpush3.bf16.msra.mxu1 %v2076_v30 }
  0x49   : > { %1939 = vmatpush3.bf16.msra.mxu0 %v2071_v39  ;;  %1318 = vmatmul.mubr.bf16.vlgmr.msra.gmra.mrb[8].mxu1 %v1181_v43  ;;  %v2102_v43 = vmov 1935823168  }
  0x4a   : > { %1940 = vmatprep.subr.bf16.mxu0 %v2073_v42  ;;  %1325 = vmatprep.mubr.bf16.mxu1 %v1183_v9 }
  0x4d   : > { %1941 = vmatpush3.bf16.msra.mxu0 %v2075_v33 }
  0x50   : > { %1126 = vmatmul.mubr.bf16.vlgmr.msra.gmra.mrb[8].mxu0 %v985_v38 }
  0x51   : > { %1133 = vmatprep.mubr.bf16.mxu0 %v991_v12  ;;  %1326 = vmatmul.mubr.bf16.gmra.mrb[12].mxu1 %v1180_v32 }
  0x58   : > { %1134 = vmatmul.mubr.bf16.gmra.mrb[12].mxu0 %v984_v44  ;;  %v1458_v44 = vunpack.c.l.s4 %v2102_v43  ;;  %v1564_v43 = vld [vmem:[%s2426_s28 + $0xc] sm:$0x7] }
  0xfc   : > { %v1914_v46 = vpop.f32.mrb[0].mxu1 }
  0xfd   : > { %v1915_v47 = vpop.f32.mrb[1].mxu1 }
  0xfe   : > { %v1916_v48 = vadd.f32 %v1915_v47, %v1914_v46  ;;  %v1917_v49 = vpop.f32.mrb[2].mxu1 }
  0xff   : > { %v1918_v50 = vpop.f32.mrb[3].mxu1 }
 0x100   : > { %v1919_v51 = vadd.f32 %v1918_v50, %v1917_v49  ;;  %v1459_v49 = vunpack.c.0.s8 %v1458_v44 }
 0x103   : > { %v1886_v52 = vpop.f32.mrb[0].mxu0 }
 0x104   : > { %v1887_v53 = vpop.f32.mrb[1].mxu0 }
 0x105   : > { %v1888_v54 = vadd.f32 %v1887_v53, %v1886_v52  ;;  %v1889_v55 = vpop.f32.mrb[2].mxu0 }
 0x106   : > { %v1890_v56 = vpop.f32.mrb[3].mxu0  ;;  %v1920_v57 = vpop.f32.mrb[4].mxu1 }
 0x107   : > { %v932_v58 = vadd.f32 %v1916_v48, %v1888_v54  ;;  %v1891_v59 = vadd.f32 %v1890_v56, %v1889_v55  ;;  %v1921_v60 = vpop.f32.mrb[5].mxu1 }
 0x108   : > { %v1922_v61 = vadd.f32 %v1921_v60, %v1920_v57  ;;  %v1923_v62 = vpop.f32.mrb[6].mxu1 }
 0x109   : > { %v935_v63 = vadd.f32 %v1919_v51, %v1891_v59  ;;  %v1924_v0 = vpop.f32.mrb[7].mxu1 }
 0x10b   : > { %v1892_v1 = vpop.f32.mrb[4].mxu0 }
 0x10c   : > { %v1893_v2 = vpop.f32.mrb[5].mxu0 }
 0x10d   : > { %v1894_v3 = vadd.f32 %v1893_v2, %v1892_v1  ;;  %v1895_v4 = vpop.f32.mrb[6].mxu0 }
 0x10e   : > { %v1896_v5 = vpop.f32.mrb[7].mxu0 }
 0x10f   : > { %v940_v6 = vadd.f32 %v1922_v61, %v1894_v3 }
 0x11c   : > { %v1970_v7 = vpop.f32.mrb[8].mxu1 }
 0x11d   : > { %v1971_v8 = vpop.f32.mrb[9].mxu1 }
 0x11e   : > { %v1972_v9 = vadd.f32 %v1971_v8, %v1970_v7  ;;  %v1973_v10 = vpop.f32.mrb[10].mxu1 }
 0x11f   : > { %v1974_v11 = vpop.f32.mrb[11].mxu1 }
 0x120   : > { %v1975_v12 = vadd.f32 %v1974_v11, %v1973_v10 }
 0x123   : > { %v1942_v13 = vpop.f32.mrb[8].mxu0 }
 0x124   : > { %v1943_v14 = vpop.f32.mrb[9].mxu0  ;;  %v1976_v15 = vpop.f32.mrb[12].mxu1 }
 0x125   : > { %v1944_v16 = vadd.f32 %v1943_v14, %v1942_v13  ;;  %v1945_v17 = vpop.f32.mrb[10].mxu0  ;;  %v1977_v18 = vpop.f32.mrb[13].mxu1 }
 0x126   : > { %v1946_v19 = vpop.f32.mrb[11].mxu0  ;;  %v1978_v20 = vadd.f32 %v1977_v18, %v1976_v15  ;;  %v1979_v21 = vpop.f32.mrb[14].mxu1 }
 0x127   : > { %v1141_v22 = vadd.f32 %v1944_v16, %v932_v58  ;;  %v1947_v23 = vadd.f32 %v1946_v19, %v1945_v17  ;;  %v1980_v24 = vpop.f32.mrb[15].mxu1  ;;  %v1462_v58 = vsub.s32 %v1459_v49, %v2248_v37 }
 0x129   : > { %v1333_v26 = vadd.f32 %v1972_v9, %v1141_v22  ;;  %v1142_v27 = vadd.f32 %v1947_v23, %v935_v63  ;;  %v1555_v23 = vld [vmem:[%s2426_s28] sm:$0x7] }
 0x12b   : > { %v1343_v28 = vadd.f32 %v1859_v25, %v1333_v26  ;;  %v1334_v29 = vadd.f32 %v1975_v12, %v1142_v27  ;;  %v1948_v30 = vpop.f32.mrb[12].mxu0 }
 0x12c   : > { %v1949_v31 = vpop.f32.mrb[13].mxu0 }
 0x12d   : > { %v1344_v32 = vadd.f32 %v1859_v25, %v1334_v29  ;;  %v1950_v34 = vadd.f32 %v1949_v31, %v1948_v30  ;;  %v1951_v35 = vpop.f32.mrb[14].mxu0  ;;  %v1346_v39 = vmax.f32 %v1343_v28, 0.0  ;;  %v1558_v28 = vld [vmem:[%s2426_s28 + $0x4] sm:$0x7]  ;;  %v1561_v29 = vld [vmem:[%s2426_s28 + $0x8] sm:$0x7] }
 0x12e   : > { %v1952_v36 = vpop.f32.mrb[15].mxu0 }
 0x12f   : > { %v1347_v40 = vmax.f32 %v1344_v32, 0.0  ;;  %v1143_v42 = vadd.f32 %v1950_v34, %v940_v6 }
 0x131   : > { %v1349_v33 = vpack.c.bf16 %v1347_v40, %v1346_v39  ;;  %v1860_v41 = vpack.c.bf16 %v1347_v40, %v1347_v40  ;;  %v1335_v38 = vadd.f32 %v1978_v20, %v1143_v42 }
 0x133   : > { %v1360_v46 = vrot.slane %v1349_v33, %v2251_v45  ;;  %v1367_v47 = vrot.slane %v1860_v41, %v2251_v45  ;;  %v1345_v48 = vadd.f32 %v1859_v25, %v1335_v38 }
 0x135   : > { %v1368_v50 = vcombine.high %v1360_v46, %v1360_v46  ;;  %v1369_v51 = vcombine.high %v1367_v47, %v1367_v47  ;;  %v1376_v52 = vrot.slane %v1360_v46, %v2251_v45  ;;  %v1383_v53 = vrot.slane %v1367_v47, %v2251_v45 }
 0x136   : > { %v1348_v54 = vmax.f32 %v1345_v48, 0.0 }
 0x137   : > { %v1390_v55 = vrot.slane %v1368_v50, %v2251_v45  ;;  %v1397_v56 = vrot.slane %v1369_v51, %v2251_v45  ;;  %v1398_v57 = vcombine.high %v1376_v52, %v1376_v52  ;;  %v1399_v0 = vcombine.high %v1383_v53, %v1383_v53 }
 0x138   : > { %v1350_v59 = vpack.c.bf16 %v1348_v54, %v1348_v54  ;;  %v1433_v1 = vunpack.i.h.s16 %v1383_v53 }
 0x139   : > { %v1400_v60 = vcombine.high %v1390_v55, %v1390_v55  ;;  %v1401_v61 = vcombine.high %v1397_v56, %v1397_v56  ;;  %v1428_v62 = vunpack.i.l.s16 %v1398_v57  ;;  %v1429_v63 = vunpack.i.h.s16 %v1398_v57 }
 0x13a   : > { %v1408_v2 = vrot.slane %v1350_v59, %v2251_v45  ;;  %v1470_v7 = vrot.slane %v1390_v55, %v1462_v58  ;;  %v1516_v14 = vrot.slane %v1399_v0, %v1462_v58 }
 0x13b   : > { %v1431_v3 = vunpack.i.h.s16 %v1400_v60  ;;  %v1438_v4 = vunpack.i.l.s16 %v1401_v61  ;;  %v1861_v5 = vpack.i.b16 %v1400_v60, %v1429_v63  ;;  %v1456_v6 = vcombine.low %v1376_v52, %v1428_v62 }
 0x13c   : > { %v1409_v8 = vcombine.high %v1408_v2, %v1408_v2  ;;  %v1416_v37 = vrot.slane %v1408_v2, %v2251_v45  ;;  %v1439_v9 = vunpack.i.h.s16 %v1401_v61 }
 0x13d   : > { %v1862_v10 = vpack.i.b16 %v1383_v53, %v1431_v3  ;;  %v1463_v11 = vrot.slane %v1456_v6, %v1462_v58  ;;  %v1479_v12 = vcombine.low %v1861_v5, %v1433_v1  ;;  %v1502_v13 = vcombine.low %v1397_v56, %v1438_v4 }
 0x13e   : > { %v1423_v15 = vrot.slane %v1409_v8, %v2251_v45  ;;  %v1441_v16 = vunpack.i.h.s16 %v1416_v37  ;;  %v1863_v17 = vpack.i.b16 %v1416_v37, %v1439_v9 }
 0x13f   : > { %v1471_v18 = vcombine.low %v1463_v11, %v1470_v7  ;;  %v1486_v19 = vrot.slane %v1479_v12, %v1462_v58  ;;  %v1493_v20 = vrot.slane %v1862_v10, %v1462_v58  ;;  %v1509_v21 = vrot.slane %v1502_v13, %v1462_v58 }
 0x140   : > { %v1443_v24 = vunpack.i.h.s16 %v1423_v15  ;;  %v1864_v25 = vpack.i.b16 %v1423_v15, %v1441_v16 }
 0x141   : > { %v1478_v26 = vrot.slane %v1471_v18, %v1462_v58  ;;  %v1494_v45 = vcombine.low %v1486_v19, %v1493_v20  ;;  %v1517_v27 = vcombine.low %v1509_v21, %v1516_v14 }
 0x142   : > { %v1525_v30 = vcombine.low %v1863_v17, %v1443_v24  ;;  %v1539_v36 = vrot.slane %v1864_v25, %v1462_v58 }
 0x143   : > { %v1501_v31 = vrot.slane %v1494_v45, %v1462_v58  ;;  %v1524_v32 = vrot.slane %v1517_v27, %v1462_v58  ;;  %v1556_v34 = vsel %vm2431_vm8, %v1478_v26, %v1555_v23 }
 0x144   : > { %1557 = vst [vmem:[%s2426_s28] sm:$0x7] %v1556_v34  ;;  %v1532_v35 = vrot.slane %v1525_v30, %v1462_v58 }
 0x145   : > { %v1559_v39 = vsel %vm2431_vm8, %v1501_v31, %v1558_v28  ;;  %v1562_v40 = vsel %vm2431_vm8, %v1524_v32, %v1561_v29 }
 0x146   : > { %1560 = vst [vmem:[%s2426_s28 + $0x4] sm:$0x7] %v1559_v39  ;;  %1563 = vst [vmem:[%s2426_s28 + $0x8] sm:$0x7] %v1562_v40  ;;  %v1540_v42 = vcombine.low %v1532_v35, %v1539_v36 }
 0x148   : > { %v1547_v44 = vrot.slane %v1540_v42, %v1462_v58 }
 0x14a   : > { %v1565_v33 = vsel %vm2431_vm8, %v1547_v44, %v1564_v43 }
 0x14b   : > { %1566 = vst [vmem:[%s2426_s28 + $0xc] sm:$0x7] %v1565_v33 }
 0x14c PF: > { %s14_s17 = sadd.s32 1, %s2099_s17   ;;  %s2467_s15 = smov %s2095_s16 }
 0x14d   : > { %p11_p5 = scmp.ge.s32.totalorder %s14_s17, 4   ;;  %s2468_s16 = smov %s2470_s18 }
 0x14f   :  { %13 = sbr.rel (!%p11_p5) target bundleno = 2 (0x2), region = 72 }

// kernel: tile.17
= control target key start
LH: loop header
LB: loop body
LE: loop exit
PB: predicated region body
PF: predicated region fallthrough
CT: control target
= control target key end

     0   :  { %s22_s0 = inlined_call_operand.vmem [shape: f32[4], index: 0, kind: input, shape index: {}]   ;;  %s23_s1 = inlined_call_operand.vmem [shape: f32[4,4], index: 1, kind: output, shape index: {}]  }
   0x1   :  { %v4_v0 = vld [vmem:[%s22_s0] ss:$0 sm:$0xff] }
   0x2   :  { %5 = vst [vmem:[%s23_s1] sm:$0xf] %v4_v0 }

// kernel: tile.19
= control target key start
LH: loop header
LB: loop body
LE: loop exit
PB: predicated region body
PF: predicated region fallthrough
CT: control target
= control target key end

     0   :  { %vm7_vm0 = vcmask 31744   ;;  %s37_s8 = smov 4   ;;  %s38_s9 = smov 8   ;;  %vm13_vm1 = vcmask 130144   ;;  %vm19_vm2 = vcmask 97344   ;;  %vm25_vm3 = vcmask 64544   ;;  %s55_s0 = inlined_call_operand.vmem [shape: f32[4,4], index: 0, kind: input, shape index: {}]   ;;  %s56_s1 = inlined_call_operand.vmem [shape: f32[1,16], index: 1, kind: output, shape index: {}]  }
   0x1   :  { %v4_v0 = vld [vmem:[%s55_s0] sm:$0xf]  ;;  %s36_s0 = smov 12  }
   0x2   :  { %5 = vst [vmem:[#allocation1] sm:$0xf] %v4_v0 }
   0x9   :  { %v10_v1 = vld [vmem:[#allocation1 + $0x3] sm:$0x1]   ;;  %v22_v2 = vld [vmem:[#allocation1 + $0x1] sm:$0x1]   ;;  %v6_v3 = vld [vmem:[#allocation1] sm:$0x1]  }
   0xa   :  { %11 = vrot.lane.b32.xlu0 %v10_v1, %s36_s0  ;;  %23 = vrot.lane.b32.xlu1 %v22_v2, %s37_s8  ;;  %v16_v4 = vld [vmem:[#allocation1 + $0x2] sm:$0x1]   ;;  %8 = vst.msk [vmem:[#allocation0] sm:$0x1] %vm7_vm0, %v6_v3  }
   0xe   :  { %17 = vrot.lane.b32.xlu0 %v16_v4, %s38_s9 }
  0x7c   :  { %v12_v5 = vpop.permute.xlu0 %11   ;;  %v24_v6 = vpop.permute.xlu1 %23  }
  0x7d   :  { %14 = vst.msk [vmem:[#allocation0] sm:$0x1] %vm13_vm1, %v12_v5  }
  0x80   :  { %v18_v7 = vpop.permute.xlu0 %17  }
  0x81   :  { %20 = vst.msk [vmem:[#allocation0] sm:$0x1] %vm19_vm2, %v18_v7  }
  0x82   :  { %26 = vst.msk [vmem:[#allocation0] sm:$0x1] %vm25_vm3, %v24_v6  }
  0x89   :  { %v30_v8 = vld [vmem:[#allocation0] sm:$0x1] }
  0x8a   :  { %32 = vst [vmem:[%s56_s1] sm:$0x1] %v30_v8 }

// kernel: conv_autoencoder_forward.6
= control target key start
LH: loop header
LB: loop body
LE: loop exit
PB: predicated region body
PF: predicated region fallthrough
CT: control target
= control target key end

     0   :  { %s1849_s15 = smov 0   ;;  %s1851_s16 = smov 0   ;;  %s2186_s0 = inlined_call_operand.vmem [shape: bf16[2,5,5,128], index: 0, kind: input, shape index: {}, may-alias: {0,1}]   ;;  %s2187_s1 = inlined_call_operand.vmem [shape: bf16[2,5,5,128], index: 1, kind: input, shape index: {}, may-alias: {0,1}]   ;;  %s2188_s2 = inlined_call_operand.vmem [shape: bf16[4,128,256], index: 2, kind: input, shape index: {}]   ;;  %s2189_s3 = inlined_call_operand.vmem [shape: f32[1,256], index: 3, kind: input, shape index: {}]   ;;  %s2190_s4 = inlined_call_operand.vmem [shape: bf16[2,4,5,256], index: 4, kind: output, shape index: {}]  }
   0x1   :  { %s1853_s17 = smov 0  }
   0x2 LB: > { %s26_s18 = sadd.s32 1, %s1815_s16  ;;  %p1518_p0 = scmp.ge.s32.totalorder %s1819_s17, 1  ;;  %s1819_s17 = sphi %s1853_s17, %s14_s17   ;;  %s1815_s16 = sphi %s1851_s16, %s2194_s16   ;;  %s1811_s15 = sphi %s1849_s15, %s2193_s15  }
   0x3   : > { %p28_p1 = scmp.ge.s32.totalorder %s26_s18, 2  ;;  %p214_p2 = scmp.lt.s32.totalorder %s1819_s17, 3 }
   0x5   : > { %s2196_s18 = smov (%p28_p1, %s26_s18), 0  ;;  %p215_p3 = pnand %p1518_p0, %p214_p2 }
   0x6   : > { %v1700_v0 = vld [vmem:[%s2188_s2 + $0x84] ss:$8 sps:$4 sm:$0xff] (!%p215_p3)   ;;  %p268_p4 = scmp.lt.s32.totalorder (!%p215_p3), %s1811_s15, 1  ;;  %v1821_v2 = vmov (!%p215_p3), 0   ;;  %v1704_v3 = vld [vmem:[%s2188_s2 + $0x80] ss:$8 sps:$4 sm:$0xff] (!%p215_p3)   ;;  %v324_v21 = vlaneseq (!%p215_p3) }
   0x7   : > { %218 = sbr.rel (%p215_p3) target bundleno = 328 (0x148), region = 36  ;;  %v1702_v1 = vld [vmem:[%s2188_s2 + $0x104] ss:$8 sps:$4 sm:$0xff] (!%p215_p3)   ;;  %677 = vmatprep.mubr.bf16.mxu1 (!%p215_p3), %v1821_v2  ;;  %966 = vmatprep.mubr.bf16.mxu0 (!%p215_p3), %v1821_v2  ;;  %v1705_v4 = vld [vmem:[%s2188_s2 + $0x100] ss:$8 sps:$4 sm:$0xff] (!%p215_p3)   ;;  %vm510_vm0 = vcmask (!%p215_p3), 1044480  }
   0x8   : > { %645 = vmatprep.subr.bf16.mxu1 (!%p215_p3), %v1700_v0  ;;  %934 = vmatprep.subr.bf16.mxu0 (!%p215_p3), %v1702_v1  ;;  %v1706_v5 = vld [vmem:[%s2188_s2 + $0x94] ss:$8 sps:$4 sm:$0xff] (!%p215_p3)   ;;  %v1710_v7 = vld [vmem:[%s2188_s2 + $0x90] ss:$8 sps:$4 sm:$0xff] (!%p215_p3)   ;;  %v1712_v9 = vld [vmem:[%s2188_s2 + $0xa4] ss:$8 sps:$4 sm:$0xff] (!%p215_p3)  }
   0x9   : > { %646 = vmatpush1.bf16.msra.mxu1 (!%p215_p3), %v1704_v3  ;;  %935 = vmatpush1.bf16.msra.mxu0 (!%p215_p3), %v1705_v4  ;;  %v1708_v6 = vld [vmem:[%s2188_s2 + $0x114] ss:$8 sps:$4 sm:$0xff] (!%p215_p3)   ;;  %v1711_v8 = vld [vmem:[%s2188_s2 + $0x110] ss:$8 sps:$4 sm:$0xff] (!%p215_p3)   ;;  %v1714_v10 = vld [vmem:[%s2188_s2 + $0x124] ss:$8 sps:$4 sm:$0xff] (!%p215_p3)  }
   0xa   : > { %647 = vmatprep.subr.bf16.mxu1 (!%p215_p3), %v1706_v5  ;;  %936 = vmatprep.subr.bf16.mxu0 (!%p215_p3), %v1708_v6  ;;  %v1716_v11 = vld [vmem:[%s2188_s2 + $0xa0] ss:$8 sps:$4 sm:$0xff] (!%p215_p3)   ;;  %v1718_v13 = vld [vmem:[%s2188_s2 + $0xb4] ss:$8 sps:$4 sm:$0xff] (!%p215_p3)   ;;  %v1722_v15 = vld [vmem:[%s2188_s2 + $0xb0] ss:$8 sps:$4 sm:$0xff] (!%p215_p3)  }
   0xb   : > { %v1717_v12 = vld [vmem:[%s2188_s2 + $0x120] ss:$8 sps:$4 sm:$0xff] (!%p215_p3)   ;;  %v1720_v14 = vld [vmem:[%s2188_s2 + $0x134] ss:$8 sps:$4 sm:$0xff] (!%p215_p3)   ;;  %v1723_v16 = vld [vmem:[%s2188_s2 + $0x130] ss:$8 sps:$4 sm:$0xff] (!%p215_p3)  }
   0xc   : > { %v1724_v17 = vld [vmem:[%s2188_s2 + $0xc4] ss:$8 sps:$4 sm:$0xff] (!%p215_p3)   ;;  %v1822_v19 = vmov (!%p215_p3), 1966171168   ;;  %v1728_v22 = vld [vmem:[%s2188_s2 + $0xc0] ss:$8 sps:$4 sm:$0xff] (!%p215_p3)  }
   0xd   : > { %648 = vmatpush1.bf16.msra.mxu1 (!%p215_p3), %v1710_v7  ;;  %937 = vmatpush1.bf16.msra.mxu0 (!%p215_p3), %v1711_v8  ;;  %v1726_v18 = vld [vmem:[%s2188_s2 + $0x144] ss:$8 sps:$4 sm:$0xff] (!%p215_p3)   ;;  %v322_v20 = vunpack.c.l.s4 (!%p215_p3), %v1822_v19  ;;  %v1729_v23 = vld [vmem:[%s2188_s2 + $0x140] ss:$8 sps:$4 sm:$0xff] (!%p215_p3)   ;;  %v1730_v24 = vld [vmem:[%s2188_s2 + $0xd4] ss:$8 sps:$4 sm:$0xff] (!%p215_p3)  }
   0xe   : > { %s2198_s15 = smov (!%p268_p4, %s1811_s15), 1  ;;  %649 = vmatprep.subr.bf16.mxu1 %v1712_v9  ;;  %938 = vmatprep.subr.bf16.mxu0 %v1714_v10  ;;  %v1732_v25 = vld [vmem:[%s2188_s2 + $0x154] ss:$8 sps:$4 sm:$0xff]   ;;  %v1937_v27 = vshrl.u32 %v324_v21, 7  ;;  %v1734_v28 = vld [vmem:[%s2188_s2 + $0xd0] ss:$8 sps:$4 sm:$0xff]  }
   0xf   : > { %v323_v26 = vunpack.c.0.s8 %v322_v20  ;;  %s1670_s19 = smul.u32 20, %s2198_s15  ;;  %v1735_v29 = vld [vmem:[%s2188_s2 + $0x150] ss:$8 sps:$4 sm:$0xff]   ;;  %v1736_v30 = vld [vmem:[%s2188_s2 + $0xe4] ss:$8 sps:$4 sm:$0xff]   ;;  %vm505_vm2 = vcmask 1041408  }
  0x10   : > { %v1738_v31 = vld [vmem:[%s2188_s2 + $0x164] ss:$8 sps:$4 sm:$0xff]   ;;  %v1740_v33 = vld [vmem:[%s2188_s2 + $0xe0] ss:$8 sps:$4 sm:$0xff]   ;;  %v1742_v35 = vld [vmem:[%s2188_s2 + $0xf4] ss:$8 sps:$4 sm:$0xff]  }
  0x11   : > { %650 = vmatpush1.bf16.msra.mxu1 %v1716_v11  ;;  %939 = vmatpush1.bf16.msra.mxu0 %v1717_v12  ;;  %s1949_s26 = sadd.s32 16, %s1670_s19  ;;  %v1955_v32 = vsub.s32 %v323_v26, %v1937_v27  ;;  %v1741_v34 = vld [vmem:[%s2188_s2 + $0x160] ss:$8 sps:$4 sm:$0xff]   ;;  %s275_s9 = scalar_lea.vmem %s2186_s0, %s1670_s19  ;;  %v1744_v36 = vld [vmem:[%s2188_s2 + $0x174] ss:$8 sps:$4 sm:$0xff]   ;;  %vm1384_vm6 = vcmask 1042432  }
  0x12   : > { %651 = vmatprep.subr.bf16.mxu1 %v1718_v13  ;;  %940 = vmatprep.subr.bf16.mxu0 %v1720_v14  ;;  %s290_s21 = scalar_lea.vmem %s2187_s1, %s1949_s26  ;;  %v1523_v37 = vld.sshfl [vmem:[%s275_s9] sm:$0x13 pattern:$0x75316420]  ;;  %v1746_v44 = vld [vmem:[%s2188_s2 + $0xf0] ss:$8 sps:$4 sm:$0xff]  }
  0x13   : > { %v1524_v38 = vld.sshfl [vmem:[%s275_s9 + $0x4] sm:$0x13 pattern:$0x75316420]  ;;  %v320_v39 = vcombine.high %v1523_v37, %v1523_v37  ;;  %v327_v40 = vrot.slane %v1523_v37, %v1955_v32  ;;  %v1747_v50 = vld [vmem:[%s2188_s2 + $0x170] ss:$8 sps:$4 sm:$0xff]  }
  0x14   : > { %v1525_v41 = vld.sshfl [vmem:[%s275_s9 + $0x8] sm:$0x13 pattern:$0x75316420]  ;;  %v343_v42 = vcombine.high %v1524_v38, %v1524_v38  ;;  %v350_v43 = vrot.slane %v1524_v38, %v1955_v32  ;;  %v1750_v55 = vld [vmem:[%s2188_s2 + $0x4] ss:$8 sps:$4 sm:$0xff]  }
  0x15   : > { %652 = vmatpush1.bf16.msra.mxu1 %v1722_v15  ;;  %941 = vmatpush1.bf16.msra.mxu0 %v1723_v16  ;;  %v1526_v45 = vld.sshfl [vmem:[%s275_s9 + $0xc] sm:$0x13 pattern:$0x75316420]  ;;  %v334_v46 = vrot.slane %v320_v39, %v1955_v32  ;;  %v335_v47 = vcombine.high %v327_v40, %v327_v40  ;;  %v366_v48 = vcombine.high %v1525_v41, %v1525_v41  ;;  %vm511_vm1 = vsmask.f32 4352 }
  0x16   : > { %653 = vmatprep.subr.bf16.mxu1 %v1724_v17  ;;  %942 = vmatprep.subr.bf16.mxu0 %v1726_v18  ;;  %v373_v49 = vrot.slane %v1525_v41, %v1955_v32  ;;  %v357_v51 = vrot.slane %v343_v42, %v1955_v32  ;;  %v358_v52 = vcombine.high %v350_v43, %v350_v43  ;;  %v411_v54 = vunpack.i.h.s16 %v350_v43  ;;  %v1753_v56 = vld [vmem:[%s2188_s2 + $0x184] ss:$8 sps:$4 sm:$0xff]   ;;  %v1754_v14 = vld [vmem:[%s290_s21] ss:$0 sps:$4 sm:$0x77]   ;;  %vm512_vm3 = vmand %vm510_vm0, %vm511_vm1  ;;  %s1657_s28 = sshll.u32 %s2198_s15, 5 }
  0x17   : > { %v389_v53 = vcombine.high %v1526_v45, %v1526_v45  ;;  %v380_v57 = vrot.slane %v366_v48, %v1955_v32  ;;  %v396_v59 = vrot.slane %v1526_v45, %v1955_v32  ;;  %v1527_v62 = vpack.i.b16 %v350_v43, %v335_v47  ;;  %v1751_v43 = vld [vmem:[%s2188_s2 + $0x180] ss:$8 sps:$4 sm:$0xff]   ;;  %v1757_v45 = vld [vmem:[%s2188_s2 + $0x14] ss:$8 sps:$4 sm:$0xff]   ;;  %s2140_s5 = scalar_lea.vmem %s2190_s4, %s1657_s28 }
  0x18   : > { %v381_v58 = vcombine.high %v373_v49, %v373_v49  ;;  %v413_v61 = vunpack.i.h.s16 %v357_v51  ;;  %v1528_v63 = vpack.i.b16 %v357_v51, %v411_v54  ;;  %v436_v4 = vcombine.low %v327_v40, %v334_v46  ;;  %v1748_v40 = vld [vmem:[%s2188_s2] ss:$8 sps:$4 sm:$0xff]   ;;  %v1760_v47 = vld [vmem:[%s2188_s2 + $0x194] ss:$8 sps:$4 sm:$0xff]   ;;  %v1763_v51 = vld [vmem:[%s2188_s2 + $0x24] ss:$8 sps:$4 sm:$0xff]  }
  0x19   : > { %654 = vmatpush1.bf16.msra.mxu1 %v1728_v22  ;;  %943 = vmatpush1.bf16.msra.mxu0 %v1729_v23  ;;  %v403_v60 = vrot.slane %v389_v53, %v1955_v32  ;;  %v404_v0 = vcombine.high %v396_v59, %v396_v59  ;;  %v421_v1 = vunpack.i.h.s16 %v396_v59  ;;  %v504_v22 = vrot.slane %v1754_v14, 6  ;;  %v1761_v54 = vld [vmem:[%s2188_s2 + $0x20] ss:$8 sps:$4 sm:$0xff]  }
  0x1a   : > { %655 = vmatprep.subr.bf16.mxu1 %v1730_v24  ;;  %944 = vmatprep.subr.bf16.mxu0 %v1732_v25  ;;  %v1530_v3 = vpack.i.b16 %v396_v59, %v381_v58  ;;  %v1529_v6 = vpack.i.b16 %v358_v52, %v413_v61  ;;  %v437_v7 = vcombine.low %v1527_v62, %v1528_v63  ;;  %vm547_vm4 = vsmask.f32 7424  ;;  %v1766_v52 = vld [vmem:[%s2188_s2 + $0x1a4] ss:$8 sps:$4 sm:$0xff]   ;;  %v1767_v58 = vld [vmem:[%s2188_s2 + $0x30] ss:$8 sps:$4 sm:$0xff]  }
  0x1b   : > { %v423_v5 = vunpack.i.h.s16 %v403_v60  ;;  %v1531_v8 = vpack.i.b16 %v403_v60, %v421_v1  ;;  %v446_v10 = vrot.slane %v436_v4, %v1955_v32  ;;  %vm844_vm5 = vsmask.f32 5376  ;;  %v1770_v59 = vld [vmem:[%s2188_s2 + $0x1b0] ss:$8 sps:$4 sm:$0xff]   ;;  %v1775_v60 = vld [vmem:[%s2188_s2 + $0x44] ss:$8 sps:$4 sm:$0xff]  }
  0x1c   : > { %v439_v9 = vcombine.low %v380_v57, %v1530_v3  ;;  %v438_v12 = vcombine.low %v1529_v6, %v373_v49  ;;  %v453_v13 = vrot.slane %v437_v7, %v1955_v32  ;;  %v1755_v49 = vld [vmem:[%s2188_s2 + $0x10] ss:$8 sps:$4 sm:$0xff]   ;;  %v1772_v57 = vld [vmem:[%s2188_s2 + $0x1b4] ss:$8 sps:$4 sm:$0xff]   ;;  %v1778_v61 = vld [vmem:[%s2188_s2 + $0x1c4] ss:$8 sps:$4 sm:$0xff]  }
  0x1d   : > { %656 = vmatpush1.bf16.msra.mxu1 %v1734_v28  ;;  %945 = vmatpush1.bf16.msra.mxu0 %v1735_v29  ;;  %v1532_v11 = vpack.i.b16 %v404_v0, %v423_v5  ;;  %v1773_v62 = vld [vmem:[%s2188_s2 + $0x40] ss:$8 sps:$4 sm:$0xff]   ;;  %v1781_v0 = vld [vmem:[%s2188_s2 + $0x54] ss:$8 sps:$4 sm:$0xff]   ;;  %v1779_v3 = vld [vmem:[%s2188_s2 + $0x50] ss:$8 sps:$4 sm:$0xff]  }
  0x1e   : > { %657 = vmatprep.subr.bf16.mxu1 %v1736_v30  ;;  %946 = vmatprep.subr.bf16.mxu0 %v1738_v31  ;;  %v467_v15 = vrot.slane %v439_v9, %v1955_v32  ;;  %v460_v16 = vrot.slane %v438_v12, %v1955_v32  ;;  %v468_v17 = vcombine.low %v446_v10, %v453_v13  ;;  %v1776_v63 = vld [vmem:[%s2188_s2 + $0x1c0] ss:$8 sps:$4 sm:$0xff]   ;;  %v1784_v1 = vld [vmem:[%s2188_s2 + $0x1d4] ss:$8 sps:$4 sm:$0xff]   ;;  %v1782_v4 = vld [vmem:[%s2188_s2 + $0x1d0] ss:$8 sps:$4 sm:$0xff]  }
  0x1f   : > { %v485_v18 = vcombine.low %v1531_v8, %v1532_v11  ;;  %v1787_v5 = vld [vmem:[%s2188_s2 + $0x64] ss:$8 sps:$4 sm:$0xff]   ;;  %v1785_v7 = vld [vmem:[%s2188_s2 + $0x60] ss:$8 sps:$4 sm:$0xff]   ;;  %v1793_v9 = vld [vmem:[%s2188_s2 + $0x74] ss:$8 sps:$4 sm:$0xff]  }
  0x20   : > { %v469_v19 = vcombine.low %v460_v16, %v467_v15  ;;  %v476_v20 = vrot.slane %v468_v17, %v1955_v32  ;;  %v1790_v6 = vld [vmem:[%s2188_s2 + $0x1e4] ss:$8 sps:$4 sm:$0xff]   ;;  %v1788_v8 = vld [vmem:[%s2188_s2 + $0x1e0] ss:$8 sps:$4 sm:$0xff]   ;;  %v1796_v10 = vld [vmem:[%s2188_s2 + $0x1f4] ss:$8 sps:$4 sm:$0xff]  }
  0x21   : > { %658 = vmatpush1.bf16.msra.mxu1 %v1740_v33  ;;  %947 = vmatpush1.bf16.msra.mxu0 %v1741_v34  ;;  %v492_v21 = vrot.slane %v485_v18, %v1955_v32  ;;  %v1791_v11 = vld [vmem:[%s2188_s2 + $0x70] ss:$8 sps:$4 sm:$0xff]   ;;  %vm1385_vm7 = vsmask.f32 2304  ;;  %vm1387_vm8 = vcmask 1046532  }
  0x22   : > { %659 = vmatprep.subr.bf16.mxu1 %v1742_v35  ;;  %948 = vmatprep.subr.bf16.mxu0 %v1744_v36  ;;  %v483_v23 = vrot.slane %v469_v19, %v1955_v32  ;;  %v1794_v12 = vld [vmem:[%s2188_s2 + $0x1f0] ss:$8 sps:$4 sm:$0xff]   ;;  %vm1388_vm9 = vsmask.f32 6400  ;;  %vm1386_vm10 = vmand %vm1384_vm6, %vm1385_vm7 }
  0x23   : > { %v499_v24 = vrot.slane %v492_v21, %v1955_v32  ;;  %vm1389_vm11 = vmand %vm1387_vm8, %vm1388_vm9 }
  0x24   : > { %v2010_v25 = vcombine.low %v476_v20, %v483_v23  ;;  %vm2147_vm12 = vmor %vm1389_vm11, %vm1386_vm10 }
  0x25   : > { %660 = vmatpush1.bf16.msra.mxu1 %v1746_v44  ;;  %949 = vmatpush1.bf16.msra.mxu0 %v1747_v50  ;;  %v508_v26 = vsel %vm505_vm2, %v499_v24, %v504_v22  ;;  %v1758_v50 = vld [vmem:[%s2188_s2 + $0x190] ss:$8 sps:$4 sm:$0xff]   ;;  %v1155_v24 = vsub.s32 0, %v1937_v27 }
  0x26   : > { %776 = vmatprep.subr.bf16.mxu1 %v1750_v55  ;;  %1094 = vmatprep.subr.bf16.mxu0 %v1753_v56  ;;  %v2012_v28 = vsel %vm512_vm3, %v508_v26, 0  ;;  %v549_v29 = vshrl.u32 %v2010_v25, 16  ;;  %v551_v30 = vshll.u32 %v2010_v25, 16  ;;  %v1764_v55 = vld [vmem:[%s2188_s2 + $0x1a0] ss:$8 sps:$4 sm:$0xff]   ;;  %v1009_v13 = vrot.slane %v2010_v25, 3 }
  0x27   : > { %v556_v31 = vshll.u32 %v2012_v28, 16  ;;  %v560_v33 = vshrl.u32 %v2012_v28, 16  ;;  %v1769_v56 = vld [vmem:[%s2188_s2 + $0x34] ss:$8 sps:$4 sm:$0xff]   ;;  %v1010_v14 = vrot.slane %v2012_v28, 3  ;;  %v1159_v26 = vsub.s32 1, %v1937_v27 }
  0x28   : > { %v553_v34 = vrot.slane %v551_v30, 1  ;;  %v845_v36 = vrot.slane %v549_v29, 2  ;;  %v846_v37 = vrot.slane %v551_v30, 3 }
  0x29   : > { %v558_v35 = vrot.slane %v556_v31, 1  ;;  %v848_v38 = vrot.slane %v560_v33, 2  ;;  %v849_v39 = vrot.slane %v556_v31, 3  ;;  %v1011_v15 = vsel %vm510_vm0, %v1009_v13, %v1010_v14 }
  0x2a   : > { %v554_v41 = vor.u32 %v553_v34, %v549_v29  ;;  %v847_v42 = vor.u32 %v846_v37, %v845_v36 }
  0x2b   : > { %v850_v44 = vor.u32 %v849_v39, %v848_v38  ;;  %v562_v53 = vor.u32 %v560_v33, %v558_v35 }
  0x2c   : > { %v559_v46 = vsel %vm547_vm4, %v554_v41, %v558_v35 }
  0x2d   : > { %678 = vmatmul.mubr.bf16.vlgmr.msra.gmra.mrb[0].mxu1 %v559_v46  ;;  %v851_v48 = vsel %vm844_vm5, %v847_v42, %v850_v44 }
  0x2e   : > { %777 = vmatpush1.bf16.msra.mxu1 %v1748_v40  ;;  %967 = vmatmul.mubr.bf16.vlgmr.msra.gmra.mrb[0].mxu0 %v851_v48 }
  0x2f   : > { %1095 = vmatpush1.bf16.msra.mxu0 %v1751_v43  ;;  %778 = vmatprep.subr.bf16.mxu1 %v1757_v45  ;;  %v1823_v45 = vmov 1935823168  }
  0x30   : > { %1096 = vmatprep.subr.bf16.mxu0 %v1760_v47  ;;  %687 = vmatprep.mubr.bf16.mxu1 %v1821_v2  ;;  %v1290_v46 = vunpack.c.l.s4 %v1823_v45 }
  0x31   : > { %976 = vmatprep.mubr.bf16.mxu0 %v1821_v2 }
  0x32   : > { %779 = vmatpush1.bf16.msra.mxu1 %v1755_v49 }
  0x33   : > { %1097 = vmatpush1.bf16.msra.mxu0 %v1758_v50  ;;  %780 = vmatprep.subr.bf16.mxu1 %v1763_v51 }
  0x34   : > { %1098 = vmatprep.subr.bf16.mxu0 %v1766_v52 }
  0x35   : > { %688 = vmatmul.mubr.bf16.gmra.mrb[4].mxu1 %v562_v53 }
  0x36   : > { %781 = vmatpush1.bf16.msra.mxu1 %v1761_v54  ;;  %977 = vmatmul.mubr.bf16.gmra.mrb[4].mxu0 %v850_v44 }
  0x37   : > { %1099 = vmatpush1.bf16.msra.mxu0 %v1764_v55  ;;  %782 = vmatprep.subr.bf16.mxu1 %v1769_v56 }
  0x38   : > { %1100 = vmatprep.subr.bf16.mxu0 %v1772_v57  ;;  %808 = vmatprep.mubr.bf16.mxu1 %v1821_v2  ;;  %v1291_v57 = vunpack.c.0.s8 %v1290_v46 }
  0x39   : > { %1126 = vmatprep.mubr.bf16.mxu0 %v1821_v2 }
  0x3a   : > { %783 = vmatpush1.bf16.msra.mxu1 %v1767_v58 }
  0x3b   : > { %1101 = vmatpush1.bf16.msra.mxu0 %v1770_v59  ;;  %784 = vmatprep.subr.bf16.mxu1 %v1775_v60 }
  0x3c   : > { %1102 = vmatprep.subr.bf16.mxu0 %v1778_v61 }
  0x3e   : > { %785 = vmatpush1.bf16.msra.mxu1 %v1773_v62 }
  0x3f   : > { %1103 = vmatpush1.bf16.msra.mxu0 %v1776_v63  ;;  %786 = vmatprep.subr.bf16.mxu1 %v1781_v0 }
  0x40   : > { %1104 = vmatprep.subr.bf16.mxu0 %v1784_v1 }
  0x42   : > { %787 = vmatpush1.bf16.msra.mxu1 %v1779_v3 }
  0x43   : > { %1105 = vmatpush1.bf16.msra.mxu0 %v1782_v4  ;;  %788 = vmatprep.subr.bf16.mxu1 %v1787_v5 }
  0x44   : > { %1106 = vmatprep.subr.bf16.mxu0 %v1790_v6 }
  0x46   : > { %789 = vmatpush1.bf16.msra.mxu1 %v1785_v7 }
  0x47   : > { %1107 = vmatpush1.bf16.msra.mxu0 %v1788_v8  ;;  %790 = vmatprep.subr.bf16.mxu1 %v1793_v9  ;;  %v2128_v9 = vsub.s32 %v1291_v57, %v1937_v27  ;;  %v1397_v57 = vld [vmem:[%s2140_s5 + $0x10] sm:$0x77] }
  0x48   : > { %1108 = vmatprep.subr.bf16.mxu0 %v1796_v10 }
  0x4a   : > { %791 = vmatpush1.bf16.msra.mxu1 %v1791_v11 }
  0x4b   : > { %1109 = vmatpush1.bf16.msra.mxu0 %v1794_v12 }
  0x4d   : > { %809 = vmatmul.mubr.bf16.vlgmr.msra.gmra.mrb[0].mxu1 %v2010_v25  ;;  %v1151_v25 = vld [vmem:[%s2189_s3] sm:$0x3] }
  0x4e   : > { %1127 = vmatmul.mubr.bf16.vlgmr.msra.gmra.mrb[0].mxu0 %v1011_v15  ;;  %818 = vmatprep.mubr.bf16.mxu1 %v1821_v2  ;;  %v1156_v29 = vrot.slane %v1151_v25, %v1155_v24  ;;  %v1160_v31 = vrot.slane %v1151_v25, %v1159_v26 }
  0x4f   : > { %1136 = vmatprep.mubr.bf16.mxu0 %v1821_v2 }
  0x55   : > { %819 = vmatmul.mubr.bf16.gmra.mrb[8].mxu1 %v2012_v28 }
  0x56   : > { %1137 = vmatmul.mubr.bf16.gmra.mrb[8].mxu0 %v1010_v14 }
 0x108   : > { %v689_v16 = vpop.f32.mrb[4].mxu1 }
 0x109   : > { %v691_v17 = vpop.f32.mrb[5].mxu1  ;;  %v978_v18 = vpop.f32.mrb[4].mxu0 }
 0x10a   : > { %v693_v19 = vpop.f32.mrb[6].mxu1  ;;  %v980_v20 = vpop.f32.mrb[5].mxu0 }
 0x10b   : > { %v694_v21 = vpop.f32.mrb[7].mxu1  ;;  %v982_v22 = vpop.f32.mrb[6].mxu0 }
 0x10c   : > { %v983_v23 = vpop.f32.mrb[7].mxu0 }
 0x120   : > { %v810_v2 = vpop.f32.mrb[0].mxu1 }
 0x121   : > { %v1128_v28 = vpop.f32.mrb[0].mxu0  ;;  %v812_v30 = vpop.f32.mrb[1].mxu1 }
 0x122   : > { %v1658_v33 = vadd.f32 %v1128_v28, %v810_v2  ;;  %v1130_v34 = vpop.f32.mrb[1].mxu0  ;;  %v814_v35 = vpop.f32.mrb[2].mxu1 }
 0x123   : > { %v1659_v36 = vadd.f32 %v1130_v34, %v812_v30  ;;  %v1132_v37 = vpop.f32.mrb[2].mxu0  ;;  %v816_v38 = vpop.f32.mrb[3].mxu1 }
 0x124   : > { %v1163_v39 = vadd.f32 %v1658_v33, %v1156_v29  ;;  %v1660_v40 = vadd.f32 %v1132_v37, %v814_v35  ;;  %v1134_v41 = vpop.f32.mrb[3].mxu0 }
 0x125   : > { %v1164_v42 = vadd.f32 %v1659_v36, %v1160_v31  ;;  %v1661_v43 = vadd.f32 %v1134_v41, %v816_v38 }
 0x126   : > { %v1169_v44 = vmax.f32 %v1163_v39, 0.0  ;;  %v1165_v47 = vadd.f32 %v1660_v40, %v1156_v29  ;;  %v1391_v40 = vld [vmem:[%s2140_s5] sm:$0x77] }
 0x127   : > { %v1170_v48 = vmax.f32 %v1164_v42, 0.0  ;;  %v1166_v49 = vadd.f32 %v1661_v43, %v1160_v31 }
 0x128   : > { %v1171_v50 = vmax.f32 %v1165_v47, 0.0  ;;  %v820_v51 = vpop.f32.mrb[8].mxu1 }
 0x129   : > { %v1646_v52 = vpack.c.bf16 %v1170_v48, %v1169_v44  ;;  %v1172_v53 = vmax.f32 %v1166_v49, 0.0  ;;  %v821_v54 = vadd.f32 %v820_v51, %v689_v16  ;;  %v822_v55 = vpop.f32.mrb[9].mxu1  ;;  %v1138_v56 = vpop.f32.mrb[8].mxu0  ;;  %v1394_v48 = vld [vmem:[%s2140_s5 + $0x8] sm:$0x77] }
 0x12a   : > { %v823_v58 = vadd.f32 %v822_v55, %v691_v17  ;;  %v824_v59 = vpop.f32.mrb[10].mxu1  ;;  %v1140_v60 = vpop.f32.mrb[9].mxu0 }
 0x12b   : > { %v1191_v61 = vrot.slane %v1646_v52, %v1955_v32  ;;  %v1647_v62 = vpack.c.bf16 %v1172_v53, %v1171_v50  ;;  %v989_v63 = vadd.f32 %v978_v18, %v821_v54  ;;  %v825_v0 = vpop.f32.mrb[11].mxu1  ;;  %v1142_v1 = vpop.f32.mrb[10].mxu0 }
 0x12c   : > { %v990_v3 = vadd.f32 %v980_v20, %v823_v58  ;;  %v1143_v4 = vpop.f32.mrb[11].mxu0  ;;  %v1400_v1 = vld [vmem:[%s2140_s5 + $0x18] sm:$0x77] }
 0x12d   : > { %v1199_v5 = vcombine.high %v1191_v61, %v1191_v61  ;;  %v1207_v6 = vrot.slane %v1191_v61, %v1955_v32  ;;  %v1198_v7 = vrot.slane %v1647_v62, %v1955_v32  ;;  %v1149_v8 = vadd.f32 %v1138_v56, %v989_v63 }
 0x12e   : > { %v1150_v10 = vadd.f32 %v1140_v60, %v990_v3 }
 0x12f   : > { %v1221_v11 = vrot.slane %v1199_v5, %v1955_v32  ;;  %v1229_v12 = vcombine.high %v1207_v6, %v1207_v6  ;;  %v1200_v13 = vcombine.high %v1198_v7, %v1198_v7  ;;  %v1214_v14 = vrot.slane %v1198_v7, %v1955_v32 }
 0x130   : > { %v1167_v15 = vadd.f32 %v1156_v29, %v1149_v8  ;;  %v1168_v16 = vadd.f32 %v1160_v31, %v1150_v10 }
 0x131   : > { %v1231_v17 = vcombine.high %v1221_v11, %v1221_v11  ;;  %v1260_v18 = vunpack.i.l.s16 %v1229_v12  ;;  %v1261_v19 = vunpack.i.h.s16 %v1229_v12  ;;  %v1228_v27 = vrot.slane %v1200_v13, %v1955_v32 }
 0x132   : > { %v1265_v20 = vunpack.i.h.s16 %v1214_v14  ;;  %v1173_v21 = vmax.f32 %v1167_v15, 0.0  ;;  %v1174_v25 = vmax.f32 %v1168_v16, 0.0  ;;  %v1302_v26 = vrot.slane %v1221_v11, %v2128_v9 }
 0x133   : > { %v1263_v22 = vunpack.i.h.s16 %v1231_v17  ;;  %v1649_v23 = vpack.i.b16 %v1231_v17, %v1261_v19  ;;  %v1288_v24 = vcombine.low %v1207_v6, %v1260_v18  ;;  %v1232_v2 = vcombine.high %v1228_v27, %v1228_v27 }
 0x134   : > { %v1648_v31 = vpack.c.bf16 %v1174_v25, %v1173_v21  ;;  %v1230_v33 = vcombine.high %v1214_v14, %v1214_v14 }
 0x135   : > { %v1295_v29 = vrot.slane %v1288_v24, %v2128_v9  ;;  %v1650_v28 = vpack.i.b16 %v1214_v14, %v1263_v22  ;;  %v1311_v30 = vcombine.low %v1649_v23, %v1265_v20  ;;  %v1270_v34 = vunpack.i.l.s16 %v1232_v2 }
 0x136   : > { %v1240_v38 = vrot.slane %v1648_v31, %v1955_v32  ;;  %v1348_v47 = vrot.slane %v1230_v33, %v2128_v9  ;;  %v1271_v49 = vunpack.i.h.s16 %v1232_v2 }
 0x137   : > { %v1303_v35 = vcombine.low %v1295_v29, %v1302_v26  ;;  %v1318_v36 = vrot.slane %v1311_v30, %v2128_v9  ;;  %v1325_v37 = vrot.slane %v1650_v28, %v2128_v9  ;;  %v1334_v41 = vcombine.low %v1228_v27, %v1270_v34 }
 0x138   : > { %v1241_v44 = vcombine.high %v1240_v38, %v1240_v38  ;;  %v1248_v45 = vrot.slane %v1240_v38, %v1955_v32 }
 0x139   : > { %v1310_v42 = vrot.slane %v1303_v35, %v2128_v9  ;;  %v1326_v43 = vcombine.low %v1318_v36, %v1325_v37  ;;  %v1341_v46 = vrot.slane %v1334_v41, %v2128_v9 }
 0x13a   : > { %v1255_v52 = vrot.slane %v1241_v44, %v1955_v32  ;;  %v1273_v53 = vunpack.i.h.s16 %v1248_v45  ;;  %v1651_v55 = vpack.i.b16 %v1248_v45, %v1271_v49 }
 0x13b   : > { %v1392_v50 = vsel %vm2147_vm12, %v1310_v42, %v1391_v40  ;;  %v1333_v51 = vrot.slane %v1326_v43, %v2128_v9  ;;  %v1349_v54 = vcombine.low %v1341_v46, %v1348_v47 }
 0x13c   : > { %1393 = vst [vmem:[%s2140_s5] sm:$0x77] %v1392_v50  ;;  %v1275_v58 = vunpack.i.h.s16 %v1255_v52  ;;  %v1652_v59 = vpack.i.b16 %v1255_v52, %v1273_v53 }
 0x13d   : > { %v1395_v56 = vsel %vm2147_vm12, %v1333_v51, %v1394_v48  ;;  %v1356_v60 = vrot.slane %v1349_v54, %v2128_v9 }
 0x13e   : > { %1396 = vst [vmem:[%s2140_s5 + $0x8] sm:$0x77] %v1395_v56  ;;  %v1357_v61 = vcombine.low %v1651_v55, %v1275_v58  ;;  %v1371_v63 = vrot.slane %v1652_v59, %v2128_v9 }
 0x13f   : > { %v1398_v62 = vsel %vm2147_vm12, %v1356_v60, %v1397_v57 }
 0x140   : > { %1399 = vst [vmem:[%s2140_s5 + $0x10] sm:$0x77] %v1398_v62  ;;  %v1364_v32 = vrot.slane %v1357_v61, %v2128_v9 }
 0x142   : > { %v1372_v0 = vcombine.low %v1364_v32, %v1371_v63 }
 0x144   : > { %v1379_v3 = vrot.slane %v1372_v0, %v2128_v9 }
 0x146   : > { %v1401_v4 = vsel %vm2147_vm12, %v1379_v3, %v1400_v1 }
 0x147   : > { %1402 = vst [vmem:[%s2140_s5 + $0x18] sm:$0x77] %v1401_v4 }
 0x148 PF: > { %s14_s17 = sadd.s32 1, %s1819_s17   ;;  %s2193_s15 = smov %s1815_s16 }
 0x149   : > { %p11_p5 = scmp.ge.s32.totalorder %s14_s17, 4   ;;  %s2194_s16 = smov %s2196_s18 }
 0x14b   :  { %13 = sbr.rel (!%p11_p5) target bundleno = 2 (0x2), region = 72 }

// kernel: conv_autoencoder_forward.7
= control target key start
LH: loop header
LB: loop body
LE: loop exit
PB: predicated region body
PF: predicated region fallthrough
CT: control target
= control target key end

     0   :  { %s3141_s15 = smov 0   ;;  %s3143_s16 = smov 0   ;;  %s3645_s0 = inlined_call_operand.vmem [shape: bf16[2,9,9,64], index: 0, kind: input, shape index: {}, may-alias: {0,1}]   ;;  %s3646_s1 = inlined_call_operand.vmem [shape: bf16[2,9,9,64], index: 1, kind: input, shape index: {}, may-alias: {0,1}]   ;;  %s3647_s2 = inlined_call_operand.vmem [shape: bf16[4,64,16], index: 2, kind: input, shape index: {}]   ;;  %s3648_s3 = inlined_call_operand.vmem [shape: f32[1,16], index: 3, kind: input, shape index: {}]   ;;  %s3649_s4 = inlined_call_operand.vmem [shape: f32[2,8,9,16], index: 4, kind: output, shape index: {}]  }
   0x1   :  { %s3145_s17 = smov 0  }
   0x2 LB: > { %s26_s18 = sadd.s32 1, %s3107_s16  ;;  %p2738_p0 = scmp.ge.s32.totalorder %s3111_s17, 1  ;;  %s3111_s17 = sphi %s3145_s17, %s14_s17   ;;  %s3107_s16 = sphi %s3143_s16, %s3651_s16   ;;  %s3103_s15 = sphi %s3141_s15, %s3650_s15  }
   0x3   : > { %p28_p1 = scmp.ge.s32.totalorder %s26_s18, 2  ;;  %p218_p2 = scmp.lt.s32.totalorder %s3111_s17, 3 }
   0x5   : > { %s3653_s18 = smov (%p28_p1, %s26_s18), 0  ;;  %p219_p3 = pnand %p2738_p0, %p218_p2 }
   0x6   : > { %v3035_v0 = vld [vmem:[%s3647_s2 + $0x20] sm:$0xff] (!%p219_p3)   ;;  %v3113_v1 = vmov (!%p219_p3), 0.0   ;;  %v3037_v3 = vld [vmem:[%s3647_s2 + $0x28] sm:$0xff] (!%p219_p3)   ;;  %vm3114_vm0 = vmmov (!%p219_p3), 0   ;;  %p276_p4 = scmp.lt.s32.totalorder (!%p219_p3), %s3103_s15, 1  ;;  %v359_v5 = vlaneseq (!%p219_p3)  ;;  %v3039_v6 = vld [vmem:[%s3647_s2 + $0x30] sm:$0xff] (!%p219_p3)  }
   0x7   : > { %222 = sbr.rel (%p219_p3) target bundleno = 420 (0x1a4), region = 36  ;;  %2893 = vmatprep.subr.bf16.mxu0 (!%p219_p3), %v3113_v1  ;;  %2921 = vmatprep.subr.bf16.mxu1 (!%p219_p3), %v3113_v1  ;;  %v3036_v2 = vld [vmem:[%s3647_s2] sm:$0xff] (!%p219_p3)   ;;  %v3038_v4 = vld [vmem:[%s3647_s2 + $0x8] sm:$0xff] (!%p219_p3)   ;;  %v3040_v7 = vld [vmem:[%s3647_s2 + $0x10] sm:$0xff] (!%p219_p3)   ;;  %v3115_v12 = vmov (!%p219_p3), 1966171168  }
   0x8   : > { %2894 = vmatpush3.bf16.msra.mxu0 (!%p219_p3), %v3035_v0  ;;  %2929 = vmatprep.mubr.msk.bf16.mxu1 (!%p219_p3), %vm3114_vm0, %v3113_v1  ;;  %v3041_v8 = vld [vmem:[%s3647_s2 + $0x38] sm:$0xff] (!%p219_p3)   ;;  %v360_v9 = vshrl.u32 (!%p219_p3), %v359_v5, 7  ;;  %v357_v13 = vunpack.c.l.s4 (!%p219_p3), %v3115_v12  ;;  %vm1077_vm1 = vcmask (!%p219_p3), 523264   ;;  %vm1014_vm2 = vsmask.f32 (!%p219_p3), 7424 }
   0x9   : > { %2922 = vmatpush3.bf16.msra.mxu1 (!%p219_p3), %v3036_v2  ;;  %2895 = vmatprep.subr.bf16.mxu0 (!%p219_p3), %v3113_v1  ;;  %v3042_v10 = vld [vmem:[%s3647_s2 + $0x18] sm:$0xff] (!%p219_p3)   ;;  %vm989_vm3 = vcmask (!%p219_p3), 1043456   ;;  %vm1436_vm4 = vcmask (!%p219_p3), 1042432   ;;  %vm1280_vm5 = vsmask.f32 (!%p219_p3), 3328  ;;  %vm993_vm6 = vcmask (!%p219_p3), 1040384  }
   0xa   : > { %2923 = vmatprep.subr.bf16.mxu1 (!%p219_p3), %v3113_v1  ;;  %2901 = vmatprep.mubr.msk.bf16.mxu0 (!%p219_p3), %vm3114_vm0, %v3113_v1  ;;  %v358_v17 = vunpack.c.0.s8 (!%p219_p3), %v357_v13  ;;  %vm994_vm7 = vsmask.f32 (!%p219_p3), 256  ;;  %vm2601_vm9 = vcmask (!%p219_p3), 122880   ;;  %vm2599_vm10 = vcmask (!%p219_p3), 130048  }
   0xb   : > { %vm995_vm8 = vmand (!%p219_p3), %vm993_vm6, %vm994_vm7 }
   0xc   : > { %2896 = vmatpush3.bf16.msra.mxu0 (!%p219_p3), %v3037_v3  ;;  %v3210_v21 = vsub.s32 (!%p219_p3), %v358_v17, %v360_v9 }
   0xd   : > { %2924 = vmatpush3.bf16.msra.mxu1 (!%p219_p3), %v3038_v4  ;;  %2897 = vmatprep.subr.bf16.mxu0 (!%p219_p3), %v3113_v1 }
   0xe   : > { %s3655_s15 = smov (!%p276_p4, %s3103_s15), 1  ;;  %2925 = vmatprep.subr.bf16.mxu1 %v3113_v1 }
   0xf   : > { %s3005_s29 = smul.u32 72, %s3655_s15 }
  0x10   : > { %2898 = vmatpush3.bf16.msra.mxu0 %v3039_v6 }
  0x11   : > { %s3198_s10 = scalar_lea.vmem %s3645_s0, %s3005_s29  ;;  %2926 = vmatpush3.bf16.msra.mxu1 %v3040_v7  ;;  %2899 = vmatprep.subr.bf16.mxu0 %v3113_v1  ;;  %s2855_s13 = sadd.s32 64, %s3005_s29 }
  0x12   : > { %v2743_v11 = vld.sshfl [vmem:[%s3198_s10] sm:$0x33 pattern:$0x75316420]  ;;  %2927 = vmatprep.subr.bf16.mxu1 %v3113_v1  ;;  %s3241_s20 = scalar_lea.vmem %s3646_s1, %s2855_s13  ;;  %s2856_s13 = sshll.u32 %s3655_s15, 7 }
  0x13   : > { %v2744_v14 = vld.sshfl [vmem:[%s3198_s10 + $0x4] sm:$0x1 pattern:$0x75316420]  ;;  %v355_v16 = vcombine.high %v2743_v11, %v2743_v11  ;;  %v362_v23 = vrot.slane %v2743_v11, %v3210_v21  ;;  %s3488_s19 = scalar_lea.vmem %s3649_s4, %s2856_s13 }
  0x14   : > { %v2745_v15 = vld.sshfl [vmem:[%s3198_s10 + $0x8] sm:$0x33 pattern:$0x75316420]  ;;  %2900 = vmatpush3.bf16.msra.mxu0 %v3041_v8  ;;  %v385_v25 = vrot.slane %v2744_v14, %v3210_v21 }
  0x15   : > { %v2746_v18 = vld.sshfl [vmem:[%s3198_s10 + $0xc] sm:$0x1 pattern:$0x75316420]  ;;  %v393_v19 = vcombine.high %v2745_v15, %v2745_v15  ;;  %2928 = vmatpush3.bf16.msra.mxu1 %v3042_v10  ;;  %v369_v24 = vrot.slane %v355_v16, %v3210_v21  ;;  %v400_v26 = vrot.slane %v2745_v15, %v3210_v21  ;;  %2949 = vmatprep.subr.bf16.mxu0 %v3113_v1 }
  0x16   : > { %v2747_v20 = vld.sshfl [vmem:[%s3198_s10 + $0x10] sm:$0x33 pattern:$0x75316420]  ;;  %v423_v28 = vrot.slane %v2746_v18, %v3210_v21  ;;  %2977 = vmatprep.subr.bf16.mxu1 %v3113_v1 }
  0x17   : > { %v431_v22 = vcombine.high %v2747_v20, %v2747_v20  ;;  %v407_v27 = vrot.slane %v393_v19, %v3210_v21  ;;  %v438_v29 = vrot.slane %v2747_v20, %v3210_v21  ;;  %v408_v31 = vcombine.high %v400_v26, %v400_v26  ;;  %v2748_v35 = vld.sshfl [vmem:[%s3198_s10 + $0x14] sm:$0x1 pattern:$0x75316420] }
  0x18   : > { %v662_v32 = vunpack.i.h.s16 %v400_v26  ;;  %v2759_v33 = vpack.i.b16 %v400_v26, %v385_v25  ;;  %v762_v34 = vcombine.low %v362_v23, %v369_v24  ;;  %v2779_v38 = vcombine.high %v362_v23, %v369_v24  ;;  %v2749_v39 = vld.sshfl [vmem:[%s3198_s10 + $0x18] sm:$0x33 pattern:$0x75316420] }
  0x19   : > { %v445_v30 = vrot.slane %v431_v22, %v3210_v21  ;;  %v409_v36 = vcombine.high %v407_v27, %v407_v27  ;;  %v664_v37 = vunpack.i.h.s16 %v407_v27  ;;  %v446_v40 = vcombine.high %v438_v29, %v438_v29  ;;  %v2750_v45 = vld.sshfl [vmem:[%s3198_s10 + $0x1c] sm:$0x1 pattern:$0x75316420] }
  0x1a   : > { %v666_v41 = vunpack.i.h.s16 %v408_v31  ;;  %v2760_v42 = vpack.i.b16 %v407_v27, %v662_v32  ;;  %v772_v43 = vrot.slane %v762_v34, %v3210_v21  ;;  %v779_v48 = vrot.slane %v2779_v38, %v3210_v21  ;;  %v2751_v57 = vld.sshfl [vmem:[%s3198_s10 + $0x20] sm:$0x33 pattern:$0x75316420] }
  0x1b   : > { %v447_v44 = vcombine.high %v445_v30, %v445_v30  ;;  %v668_v46 = vunpack.i.h.s16 %v409_v36  ;;  %v2761_v47 = vpack.i.b16 %v408_v31, %v664_v37  ;;  %v461_v49 = vrot.slane %v2748_v35, %v3210_v21  ;;  %v2752_v63 = vld.sshfl [vmem:[%s3198_s10 + $0x24] sm:$0x1 pattern:$0x75316420] }
  0x1c   : > { %v2762_v50 = vpack.i.b16 %v409_v36, %v666_v41  ;;  %v764_v51 = vcombine.low %v2759_v33, %v2760_v42  ;;  %v469_v52 = vcombine.high %v2749_v39, %v2749_v39  ;;  %v476_v53 = vrot.slane %v2749_v39, %v3210_v21  ;;  %v2753_v5 = vld.sshfl [vmem:[%s3198_s10 + $0x28] sm:$0x33 pattern:$0x75316420]  ;;  %v3044_v27 = vld [vmem:[%s3647_s2 + $0x60] sm:$0xff]  }
  0x1d   : > { %v2763_v54 = vpack.i.b16 %v423_v28, %v668_v46  ;;  %v794_v55 = vcombine.low %v772_v43, %v779_v48  ;;  %v812_v56 = vcombine.low %v445_v30, %v446_v40  ;;  %v499_v58 = vrot.slane %v2750_v45, %v3210_v21  ;;  %v2754_v42 = vld.sshfl [vmem:[%s3198_s10 + $0x2c] sm:$0x1 pattern:$0x75316420] }
  0x1e   : > { %v765_v59 = vcombine.low %v2761_v47, %v2762_v50  ;;  %v786_v60 = vrot.slane %v764_v51, %v3210_v21  ;;  %v483_v61 = vrot.slane %v469_v52, %v3210_v21  ;;  %v484_v62 = vcombine.high %v476_v53, %v476_v53  ;;  %v3046_v46 = vld [vmem:[%s3647_s2 + $0x68] sm:$0xff]   ;;  %v2755_v47 = vld.sshfl [vmem:[%s3198_s10 + $0x30] sm:$0x33 pattern:$0x75316420] }
  0x1f   : > { %v802_v0 = vrot.slane %v794_v55, %v3210_v21  ;;  %v811_v2 = vcombine.low %v2763_v54, %v438_v29  ;;  %v680_v3 = vunpack.i.h.s16 %v476_v53  ;;  %v2764_v4 = vpack.i.b16 %v476_v53, %v461_v49  ;;  %v2756_v51 = vld.sshfl [vmem:[%s3198_s10 + $0x34] sm:$0x1 pattern:$0x75316420] }
  0x20   : > { %v793_v6 = vrot.slane %v765_v59, %v3210_v21  ;;  %v682_v7 = vunpack.i.h.s16 %v483_v61  ;;  %v828_v8 = vrot.slane %v812_v56, %v3210_v21  ;;  %v485_v9 = vcombine.high %v483_v61, %v483_v61  ;;  %v2757_v55 = vld.sshfl [vmem:[%s3198_s10 + $0x38] sm:$0x33 pattern:$0x75316420] }
  0x21   : > { %v2765_v10 = vpack.i.b16 %v483_v61, %v680_v3  ;;  %v813_v11 = vcombine.low %v447_v44, %v2764_v4  ;;  %v821_v12 = vrot.slane %v811_v2, %v3210_v21  ;;  %v507_v13 = vcombine.high %v2751_v57, %v2751_v57 }
  0x22   : > { %v795_v14 = vcombine.low %v786_v60, %v793_v6  ;;  %v2766_v15 = vpack.i.b16 %v484_v62, %v682_v7  ;;  %v514_v16 = vrot.slane %v2751_v57, %v3210_v21  ;;  %v537_v17 = vrot.slane %v2752_v63, %v3210_v21  ;;  %v3048_v7 = vld [vmem:[%s3647_s2 + $0x70] sm:$0xff]  }
  0x23   : > { %v835_v18 = vrot.slane %v813_v11, %v3210_v21  ;;  %v843_v19 = vcombine.low %v821_v12, %v828_v8  ;;  %v521_v20 = vrot.slane %v507_v13, %v3210_v21  ;;  %v545_v22 = vcombine.high %v2753_v5, %v2753_v5  ;;  %v3043_v13 = vld [vmem:[%s3647_s2 + $0x40] sm:$0xff]  }
  0x24   : > { %v809_v23 = vrot.slane %v795_v14, %v3210_v21  ;;  %v814_v24 = vcombine.low %v2765_v10, %v2766_v15  ;;  %v552_v25 = vrot.slane %v2753_v5, %v3210_v21  ;;  %v684_v26 = vunpack.i.h.s16 %v484_v62 }
  0x25   : > { %v559_v28 = vrot.slane %v545_v22, %v3210_v21  ;;  %v686_v29 = vunpack.i.h.s16 %v485_v9  ;;  %v861_v30 = vcombine.low %v514_v16, %v521_v20  ;;  %v2780_v37 = vcombine.high %v514_v16, %v521_v20 }
  0x26   : > { %v3256_v31 = vcombine.low %v802_v0, %v809_v23  ;;  %v842_v32 = vrot.slane %v814_v24, %v3210_v21  ;;  %v698_v33 = vunpack.i.h.s16 %v552_v25  ;;  %v2767_v34 = vpack.i.b16 %v485_v9, %v684_v26  ;;  %v3051_v24 = vld [vmem:[%s3647_s2 + $0x78] sm:$0xff]  }
  0x27   : > { %v2768_v35 = vpack.i.b16 %v499_v58, %v686_v29  ;;  %v2769_v36 = vpack.i.b16 %v552_v25, %v537_v17  ;;  %v851_v39 = vrot.slane %v843_v19, %v3210_v21  ;;  %v877_v45 = vrot.slane %v861_v30, %v3210_v21  ;;  %v3045_v29 = vld [vmem:[%s3647_s2 + $0x48] sm:$0xff]  }
  0x28   : > { %2930 = vmatmul.mubr.msk.bf16.vlgmr.msra.gmra.mrb[0].mxu1 %vm1077_vm1, %v3256_v31  ;;  %v844_v38 = vcombine.low %v835_v18, %v842_v32  ;;  %v1018_v40 = vshll.u32 %v3256_v31, 16  ;;  %v2770_v41 = vpack.i.b16 %v559_v28, %v698_v33  ;;  %v1016_v43 = vshrl.u32 %v3256_v31, 16  ;;  %v2758_v33 = vld.sshfl [vmem:[%s3198_s10 + $0x3c] sm:$0x1 pattern:$0x75316420] }
  0x29   : > { %2978 = vmatpush3.bf16.msra.mxu1 %v3044_v27  ;;  %2933 = vmatprep.mubr.msk.bf16.mxu1 %vm3114_vm0, %v3113_v1  ;;  %v860_v44 = vcombine.low %v2767_v34, %v2768_v35  ;;  %v884_v50 = vrot.slane %v2780_v37, %v3210_v21  ;;  %v560_v52 = vcombine.high %v552_v25, %v552_v25  ;;  %v700_v57 = vunpack.i.h.s16 %v559_v28 }
  0x2a   : > { %v858_v48 = vrot.slane %v844_v38, %v3210_v21  ;;  %v1020_v49 = vrot.slane %v1018_v40, 1  ;;  %2979 = vmatprep.subr.bf16.mxu1 %v3113_v1  ;;  %v863_v53 = vcombine.low %v2769_v36, %v2770_v41  ;;  %v561_v56 = vcombine.high %v559_v28, %v559_v28 }
  0x2b   : > { %v870_v54 = vrot.slane %v860_v44, %v3210_v21  ;;  %v575_v59 = vrot.slane %v2754_v42, %v3210_v21  ;;  %v583_v60 = vcombine.high %v2755_v47, %v2755_v47  ;;  %v590_v61 = vrot.slane %v2755_v47, %v3210_v21 }
  0x2c   : > { %v3280_v58 = vcombine.low %v851_v39, %v858_v48  ;;  %v1021_v62 = vor.u32 %v1020_v49, %v1016_v43  ;;  %v891_v63 = vrot.slane %v863_v53, %v3210_v21  ;;  %v613_v2 = vrot.slane %v2756_v51, %v3210_v21  ;;  %v3047_v49 = vld [vmem:[%s3647_s2 + $0x50] sm:$0xff]  }
  0x2d   : > { %v892_v0 = vcombine.low %v870_v54, %v877_v45  ;;  %2980 = vmatpush3.bf16.msra.mxu1 %v3046_v46  ;;  %v597_v4 = vrot.slane %v583_v60, %v3210_v21  ;;  %v598_v5 = vcombine.high %v590_v61, %v590_v61  ;;  %v628_v6 = vrot.slane %v2757_v55, %v3210_v21 }
  0x2e   : > { %v1023_v3 = vshll.u32 %v3280_v58, 16  ;;  %2981 = vmatprep.subr.bf16.mxu1 %v3113_v1  ;;  %v893_v8 = vcombine.low %v884_v50, %v891_v63  ;;  %v702_v10 = vunpack.i.h.s16 %v560_v52  ;;  %v704_v11 = vunpack.i.h.s16 %v561_v56 }
  0x2f   : > { %v900_v9 = vrot.slane %v892_v0, %v3210_v21  ;;  %v1027_v14 = vshrl.u32 %v3280_v58, 16  ;;  %v599_v15 = vcombine.high %v597_v4, %v597_v4  ;;  %v2771_v17 = vpack.i.b16 %v560_v52, %v700_v57  ;;  %v3050_v0 = vld [vmem:[%s3647_s2 + $0x58] sm:$0xff]  }
  0x30   : > { %v1025_v12 = vrot.slane %v1023_v3, 1  ;;  %2934 = vmatmul.mubr.msk.bf16.gmra.mrb[4].mxu1 %vm1077_vm1, %v3280_v58  ;;  %v907_v16 = vrot.slane %v893_v8, %v3210_v21  ;;  %v2772_v18 = vpack.i.b16 %v561_v56, %v702_v10  ;;  %v2773_v19 = vpack.i.b16 %v575_v59, %v704_v11  ;;  %v3049_v11 = vld [vmem:[%s3241_s20] ss:$0 sps:$4 sm:$0xff]  }
  0x31   : > { %2937 = vmatprep.mubr.msk.bf16.mxu1 %vm3114_vm0, %v3113_v1  ;;  %v2774_v22 = vpack.i.b16 %v628_v6, %v613_v2  ;;  %v911_v23 = vcombine.low %v597_v4, %v598_v5  ;;  %2982 = vmatpush3.bf16.msra.mxu1 %v3048_v7  ;;  %v621_v28 = vcombine.high %v2757_v55, %v2757_v55  ;;  %v716_v35 = vunpack.i.h.s16 %v628_v6 }
  0x32   : > { %v1026_v20 = vsel %vm1014_vm2, %v1021_v62, %v1025_v12  ;;  %v3312_v25 = vcombine.low %v900_v9, %v907_v16  ;;  %v909_v26 = vcombine.low %v2771_v17, %v2772_v18  ;;  %v910_v27 = vcombine.low %v2773_v19, %v590_v61  ;;  %2983 = vmatprep.subr.bf16.mxu1 %v3113_v1 }
  0x33   : > { %2902 = vmatmul.mubr.msk.bf16.vlgmr.msra.gmra.mrb[0].mxu0 %vm1077_vm1, %v1026_v20  ;;  %v912_v30 = vcombine.low %v599_v15, %v2774_v22  ;;  %v933_v32 = vrot.slane %v911_v23, %v3210_v21  ;;  %v636_v34 = vcombine.high %v628_v6, %v628_v6  ;;  %v1029_v36 = vor.u32 %v1027_v14, %v1025_v12 }
  0x34   : > { %2950 = vmatpush3.bf16.msra.mxu0 %v3043_v13  ;;  %2905 = vmatprep.mubr.msk.bf16.mxu0 %vm3114_vm0, %v3113_v1  ;;  %v1031_v37 = vshll.u32 %v3312_v25, 16  ;;  %v919_v38 = vrot.slane %v909_v26, %v3210_v21  ;;  %v926_v39 = vrot.slane %v910_v27, %v3210_v21  ;;  %v635_v42 = vrot.slane %v621_v28, %v3210_v21 }
  0x35   : > { %2951 = vmatprep.subr.bf16.mxu0 %v3113_v1  ;;  %v940_v41 = vrot.slane %v912_v30, %v3210_v21  ;;  %v720_v44 = vunpack.i.h.s16 %v636_v34  ;;  %2984 = vmatpush3.bf16.msra.mxu1 %v3051_v24  ;;  %v651_v47 = vrot.slane %v2758_v33, %v3210_v21  ;;  %v1035_v55 = vshrl.u32 %v3312_v25, 16 }
  0x36   : > { %v1033_v45 = vrot.slane %v1031_v37, 1  ;;  %v941_v46 = vcombine.low %v919_v38, %v926_v39  ;;  %v637_v50 = vcombine.high %v635_v42, %v635_v42  ;;  %v718_v51 = vunpack.i.h.s16 %v635_v42  ;;  %v3052_v39 = vld [vmem:[%s3241_s20 + $0x4] ss:$0 sps:$4 sm:$0x11]  }
  0x37   : > { %v942_v48 = vcombine.low %v933_v32, %v940_v41  ;;  %v2775_v52 = vpack.i.b16 %v635_v42, %v716_v35  ;;  %v1437_v19 = vrot.slane %v3256_v31, 5  ;;  %v1438_v20 = vrot.slane %v3280_v58, 5 }
  0x38   : > { %2952 = vmatpush3.bf16.msra.mxu0 %v3045_v29  ;;  %2938 = vmatmul.mubr.msk.bf16.gmra.mrb[8].mxu1 %vm1077_vm1, %v3312_v25  ;;  %v1034_v53 = vsel %vm1014_vm2, %v1029_v36, %v1033_v45  ;;  %v949_v54 = vrot.slane %v941_v46, %v3210_v21  ;;  %v722_v57 = vunpack.i.h.s16 %v637_v50  ;;  %v2776_v59 = vpack.i.b16 %v636_v34, %v718_v51 }
  0x39   : > { %2953 = vmatprep.subr.bf16.mxu0 %v3113_v1  ;;  %2941 = vmatprep.mubr.msk.bf16.mxu1 %vm3114_vm0, %v3113_v1  ;;  %v956_v56 = vrot.slane %v942_v48, %v3210_v21  ;;  %v2777_v60 = vpack.i.b16 %v637_v50, %v720_v44  ;;  %v1037_v2 = vor.u32 %v1035_v55, %v1033_v45  ;;  %v1281_v26 = vrot.slane %v1016_v43, 4 }
  0x3a   : > { %v2778_v62 = vpack.i.b16 %v651_v47, %v722_v57  ;;  %v958_v63 = vcombine.low %v2775_v52, %v2776_v59  ;;  %v1439_v24 = vsel %vm1436_vm4, %v1437_v19, %v1438_v20  ;;  %v1282_v28 = vrot.slane %v1018_v40, 5 }
  0x3b   : > { %2906 = vmatmul.mubr.msk.bf16.gmra.mrb[4].mxu0 %vm1077_vm1, %v1034_v53  ;;  %v3348_v61 = vcombine.low %v949_v54, %v956_v56  ;;  %v1285_v29 = vrot.slane %v1023_v3, 5  ;;  %v1284_v30 = vrot.slane %v1027_v14, 4  ;;  %v1440_v32 = vrot.slane %v3312_v25, 5 }
  0x3c   : > { %2909 = vmatprep.mubr.msk.bf16.mxu0 %vm3114_vm0, %v3113_v1  ;;  %2954 = vmatpush3.bf16.msra.mxu0 %v3047_v49  ;;  %v959_v5 = vcombine.low %v2777_v60, %v2778_v62  ;;  %v966_v6 = vrot.slane %v958_v63, %v3210_v21  ;;  %v1283_v43 = vor.u32 %v1282_v28, %v1281_v26  ;;  %v1288_v58 = vrot.slane %v1035_v55, 4 }
  0x3d   : > { %2955 = vmatprep.subr.bf16.mxu0 %v3113_v1  ;;  %v1039_v4 = vshll.u32 %v3348_v61, 16  ;;  %v1043_v12 = vshrl.u32 %v3348_v61, 16  ;;  %v1286_v33 = vor.u32 %v1285_v29, %v1284_v30  ;;  %v1441_v31 = vsel %vm1436_vm4, %v1438_v20, %v1440_v32 }
  0x3e   : > { %v973_v8 = vrot.slane %v959_v5, %v3210_v21  ;;  %v1289_v3 = vrot.slane %v1031_v37, 5  ;;  %v1442_v14 = vrot.slane %v3348_v61, 5  ;;  %v996_v44 = vsel %vm995_vm8, %v3052_v39, 0 }
  0x3f   : > { %v1041_v7 = vrot.slane %v1039_v4, 1  ;;  %v1287_v40 = vsel %vm1280_vm5, %v1283_v43, %v1286_v33  ;;  %v1292_v36 = vrot.slane %v1043_v12, 4  ;;  %v1293_v37 = vrot.slane %v1039_v4, 5 }
  0x40   : > { %2942 = vmatmul.mubr.msk.bf16.gmra.mrb[12].mxu1 %vm1077_vm1, %v3348_v61  ;;  %2956 = vmatpush3.bf16.msra.mxu0 %v3050_v0  ;;  %v974_v10 = vcombine.low %v966_v6, %v973_v8  ;;  %v1290_v34 = vor.u32 %v1289_v3, %v1288_v58  ;;  %v1443_v35 = vsel %vm1436_vm4, %v1440_v32, %v1442_v14  ;;  %v1446_v48 = vrot.slane %v996_v44, 5 }
  0x41   : > { %2945 = vmatprep.mubr.msk.bf16.mxu1 %vm3114_vm0, %v3113_v1  ;;  %v1042_v9 = vsel %vm1014_vm2, %v1037_v2, %v1041_v7  ;;  %v1045_v16 = vor.u32 %v1043_v12, %v1041_v7  ;;  %v1294_v41 = vor.u32 %v1293_v37, %v1292_v36  ;;  %v1301_v52 = vshll.u32 %v996_v44, 16 }
  0x42   : > { %v981_v13 = vrot.slane %v974_v10, %v3210_v21  ;;  %v1291_v25 = vsel %vm1280_vm5, %v1286_v33, %v1290_v34 }
  0x43   : > { %2910 = vmatmul.mubr.msk.bf16.gmra.mrb[8].mxu0 %vm1077_vm1, %v1042_v9  ;;  %v1295_v45 = vsel %vm1280_vm5, %v1290_v34, %v1294_v41  ;;  %v1303_v53 = vrot.slane %v1301_v52, 5  ;;  %v3452_v52 = vld [vmem:[%s3648_s3] ss:$0 sm:$0xff] }
  0x44   : > { %2913 = vmatprep.mubr.msk.bf16.mxu0 %vm3114_vm0, %v3113_v1  ;;  %v3370_v15 = vsel %vm989_vm3, %v981_v13, %v3049_v11 }
  0x45   : > { %v1046_v17 = vshll.u32 %v3370_v15, 16  ;;  %v1050_v23 = vshrl.u32 %v3370_v15, 16  ;;  %v1444_v38 = vrot.slane %v3370_v15, 5 }
  0x47   : > { %v1048_v18 = vrot.slane %v1046_v17, 1  ;;  %v1445_v42 = vsel %vm1436_vm4, %v1442_v14, %v1444_v38  ;;  %v1296_v46 = vrot.slane %v1050_v23, 4  ;;  %v1297_v47 = vrot.slane %v1046_v17, 5 }
  0x48   : > { %2946 = vmatmul.mubr.msk.bf16.gmra.mrb[16].mxu1 %vm1077_vm1, %v3370_v15  ;;  %v1447_v50 = vsel %vm1436_vm4, %v1444_v38, %v1446_v48 }
  0x49   : > { %2985 = vmatprep.mubr.msk.bf16.mxu1 %vm3114_vm0, %v3113_v1  ;;  %v1049_v22 = vsel %vm1014_vm2, %v1045_v16, %v1048_v18  ;;  %v1052_v27 = vor.u32 %v1050_v23, %v1048_v18  ;;  %v1298_v49 = vor.u32 %v1297_v47, %v1296_v46 }
  0x4b   : > { %2914 = vmatmul.mubr.msk.bf16.gmra.mrb[12].mxu0 %vm1077_vm1, %v1049_v22  ;;  %v1299_v51 = vsel %vm1280_vm5, %v1294_v41, %v1298_v49  ;;  %v1304_v54 = vsel %vm1280_vm5, %v1298_v49, %v1303_v53 }
  0x4c   : > { %2917 = vmatprep.mubr.msk.bf16.mxu0 %vm3114_vm0, %v3113_v1 }
  0x50   : > { %2986 = vmatmul.mubr.msk.bf16.vlgmr.msra.gmra.mrb[20].mxu1 %vm1077_vm1, %v1439_v24 }
  0x51   : > { %2989 = vmatprep.mubr.msk.bf16.mxu1 %vm3114_vm0, %v3113_v1 }
  0x53   : > { %2918 = vmatmul.mubr.msk.bf16.gmra.mrb[16].mxu0 %vm1077_vm1, %v1052_v27 }
  0x54   : > { %2957 = vmatprep.mubr.msk.bf16.mxu0 %vm3114_vm0, %v3113_v1 }
  0x58   : > { %2990 = vmatmul.mubr.msk.bf16.gmra.mrb[24].mxu1 %vm1077_vm1, %v1441_v31 }
  0x59   : > { %2993 = vmatprep.mubr.msk.bf16.mxu1 %vm3114_vm0, %v3113_v1 }
  0x5b   : > { %2958 = vmatmul.mubr.msk.bf16.vlgmr.msra.gmra.mrb[20].mxu0 %vm1077_vm1, %v1287_v40 }
  0x5c   : > { %2961 = vmatprep.mubr.msk.bf16.mxu0 %vm3114_vm0, %v3113_v1 }
  0x60   : > { %2994 = vmatmul.mubr.msk.bf16.gmra.mrb[28].mxu1 %vm1077_vm1, %v1443_v35 }
  0x61   : > { %2997 = vmatprep.mubr.msk.bf16.mxu1 %vm3114_vm0, %v3113_v1 }
  0x63   : > { %2962 = vmatmul.mubr.msk.bf16.gmra.mrb[24].mxu0 %vm1077_vm1, %v1291_v25 }
  0x64   : > { %2965 = vmatprep.mubr.msk.bf16.mxu0 %vm3114_vm0, %v3113_v1 }
  0x68   : > { %2998 = vmatmul.mubr.msk.bf16.gmra.mrb[32].mxu1 %vm1077_vm1, %v1445_v42 }
  0x69   : > { %3001 = vmatprep.mubr.msk.bf16.mxu1 %vm3114_vm0, %v3113_v1 }
  0x6b   : > { %2966 = vmatmul.mubr.msk.bf16.gmra.mrb[28].mxu0 %vm1077_vm1, %v1295_v45 }
  0x6c   : > { %2969 = vmatprep.mubr.msk.bf16.mxu0 %vm3114_vm0, %v3113_v1 }
  0x70   : > { %3002 = vmatmul.mubr.msk.bf16.gmra.mrb[36].mxu1 %vm1077_vm1, %v1447_v50 }
  0x73   : > { %2970 = vmatmul.mubr.msk.bf16.gmra.mrb[32].mxu0 %vm1077_vm1, %v1299_v51 }
  0x74   : > { %2973 = vmatprep.mubr.msk.bf16.mxu0 %vm3114_vm0, %v3113_v1 }
  0x7b   : > { %2974 = vmatmul.mubr.msk.bf16.gmra.mrb[36].mxu0 %vm1077_vm1, %v1304_v54 }
  0xfb   : > { %v1233_v55 = vpop.f32.mrb[0].mxu1 }
  0xfc   : > { %v2931_v56 = vpop.f32.mrb[1].mxu1 }
  0xfd   : > { %v1236_v57 = vpop.f32.mrb[2].mxu1 }
  0xfe   : > { %v2932_v59 = vpop.f32.mrb[3].mxu1 }
 0x103   : > { %v1241_v60 = vpop.f32.mrb[4].mxu1 }
 0x104   : > { %v2935_v61 = vpop.f32.mrb[5].mxu1 }
 0x105   : > { %v1244_v62 = vpop.f32.mrb[6].mxu1 }
 0x106   : > { %v1127_v63 = vpop.f32.mrb[0].mxu0  ;;  %v2936_v0 = vpop.f32.mrb[7].mxu1 }
 0x107   : > { %v1234_v2 = vadd.f32 %v1233_v55, %v1127_v63  ;;  %v2903_v4 = vpop.f32.mrb[1].mxu0 }
 0x108   : > { %v1130_v5 = vpop.f32.mrb[2].mxu0 }
 0x109   : > { %v1237_v6 = vadd.f32 %v1236_v57, %v1130_v5  ;;  %v2904_v7 = vpop.f32.mrb[3].mxu0 }
 0x10b   : > { %v1249_v1 = vpop.f32.mrb[8].mxu1 }
 0x10c   : > { %v2939_v8 = vpop.f32.mrb[9].mxu1 }
 0x10d   : > { %v1252_v9 = vpop.f32.mrb[10].mxu1 }
 0x10e   : > { %v1135_v10 = vpop.f32.mrb[4].mxu0  ;;  %v2940_v11 = vpop.f32.mrb[11].mxu1 }
 0x10f   : > { %v1242_v12 = vadd.f32 %v1241_v60, %v1135_v10  ;;  %v2907_v13 = vpop.f32.mrb[5].mxu0 }
 0x110   : > { %v1138_v15 = vpop.f32.mrb[6].mxu0 }
 0x111   : > { %v1245_v16 = vadd.f32 %v1244_v62, %v1138_v15  ;;  %v2908_v17 = vpop.f32.mrb[7].mxu0 }
 0x113   : > { %v1257_v18 = vpop.f32.mrb[12].mxu1 }
 0x114   : > { %v2943_v19 = vpop.f32.mrb[13].mxu1 }
 0x115   : > { %v1260_v20 = vpop.f32.mrb[14].mxu1 }
 0x116   : > { %v1143_v22 = vpop.f32.mrb[8].mxu0  ;;  %v2944_v23 = vpop.f32.mrb[15].mxu1 }
 0x117   : > { %v3439_v24 = vadd.f32 %v1249_v1, %v1143_v22  ;;  %v2911_v26 = vpop.f32.mrb[9].mxu0 }
 0x118   : > { %v1146_v27 = vpop.f32.mrb[10].mxu0 }
 0x119   : > { %v3441_v28 = vadd.f32 %v1252_v9, %v1146_v27  ;;  %v2912_v29 = vpop.f32.mrb[11].mxu0 }
 0x11b   : > { %v1265_v30 = vpop.f32.mrb[16].mxu1 }
 0x11c   : > { %v2947_v32 = vpop.f32.mrb[17].mxu1 }
 0x11d   : > { %v1268_v43 = vpop.f32.mrb[18].mxu1 }
 0x11e   : > { %v2948_v33 = vpop.f32.mrb[19].mxu1  ;;  %v1151_v31 = vpop.f32.mrb[12].mxu0 }
 0x11f   : > { %v3443_v40 = vadd.f32 %v1257_v18, %v1151_v31  ;;  %v2915_v58 = vpop.f32.mrb[13].mxu0 }
 0x120   : > { %v1154_v3 = vpop.f32.mrb[14].mxu0 }
 0x121   : > { %v3445_v14 = vadd.f32 %v1260_v20, %v1154_v3  ;;  %v2916_v34 = vpop.f32.mrb[15].mxu0 }
 0x123   : > { %v1521_v35 = vpop.f32.mrb[20].mxu1 }
 0x124   : > { %v2987_v25 = vpop.f32.mrb[21].mxu1 }
 0x125   : > { %v1524_v36 = vpop.f32.mrb[22].mxu1 }
 0x126   : > { %v2988_v37 = vpop.f32.mrb[23].mxu1  ;;  %v1159_v38 = vpop.f32.mrb[16].mxu0 }
 0x127   : > { %v3447_v39 = vadd.f32 %v1265_v30, %v1159_v38  ;;  %v2919_v41 = vpop.f32.mrb[17].mxu0 }
 0x128   : > { %v1162_v42 = vpop.f32.mrb[18].mxu0 }
 0x129   : > { %v2920_v44 = vpop.f32.mrb[19].mxu0 }
 0x12b   : > { %v1529_v45 = vpop.f32.mrb[24].mxu1 }
 0x12c   : > { %v2991_v46 = vpop.f32.mrb[25].mxu1 }
 0x12d   : > { %v1532_v47 = vpop.f32.mrb[26].mxu1 }
 0x12e   : > { %v2992_v48 = vpop.f32.mrb[27].mxu1  ;;  %v1378_v49 = vpop.f32.mrb[20].mxu0 }
 0x12f   : > { %v1416_v50 = vadd.f32 %v1378_v49, %v1234_v2  ;;  %v2959_v51 = vpop.f32.mrb[21].mxu0 }
 0x130   : > { %v1381_v53 = vpop.f32.mrb[22].mxu0 }
 0x131   : > { %v1559_v54 = vadd.f32 %v1521_v35, %v1416_v50  ;;  %v1417_v55 = vadd.f32 %v1381_v53, %v1237_v6  ;;  %v2960_v56 = vpop.f32.mrb[23].mxu0 }
 0x133   : > { %v1537_v57 = vpop.f32.mrb[28].mxu1  ;;  %v1575_v59 = vadd.f32 %v3452_v52, %v1559_v54  ;;  %v1560_v60 = vadd.f32 %v1524_v36, %v1417_v55 }
 0x134   : > { %v2995_v61 = vpop.f32.mrb[29].mxu1 }
 0x135   : > { %v1540_v62 = vpop.f32.mrb[30].mxu1  ;;  %v1584_v63 = vsub.f32 0.0, %v1575_v59  ;;  %v1576_v0 = vadd.f32 %v3452_v52, %v1560_v60 }
 0x136   : > { %v2996_v2 = vpop.f32.mrb[31].mxu1  ;;  %v1386_v4 = vpop.f32.mrb[24].mxu0 }
 0x137   : > { %v1593_v5 = vmul.f32 1.442695, %v1584_v63  ;;  %v1585_v7 = vsub.f32 0.0, %v1576_v0  ;;  %v1418_v1 = vadd.f32 %v1386_v4, %v1242_v12  ;;  %v2963_v8 = vpop.f32.mrb[25].mxu0 }
 0x138   : > { %v1389_v9 = vpop.f32.mrb[26].mxu0 }
 0x139   : > { %3053 = vpow2.f32 %v1593_v5  ;;  %v1595_v10 = vmul.f32 1.442695, %v1585_v7  ;;  %v1561_v6 = vadd.f32 %v1529_v45, %v1418_v1  ;;  %v1419_v11 = vadd.f32 %v1389_v9, %v1245_v16  ;;  %v2964_v13 = vpop.f32.mrb[27].mxu0 }
 0x13b   : > { %v1545_v15 = vpop.f32.mrb[32].mxu1  ;;  %3055 = vpow2.f32 %v1595_v10  ;;  %v1577_v17 = vadd.f32 %v3452_v52, %v1561_v6  ;;  %v1562_v18 = vadd.f32 %v1532_v47, %v1419_v11 }
 0x13c   : > { %v2999_v19 = vpop.f32.mrb[33].mxu1 }
 0x13d   : > { %v1548_v20 = vpop.f32.mrb[34].mxu1  ;;  %v1586_v22 = vsub.f32 0.0, %v1577_v17  ;;  %v1578_v23 = vadd.f32 %v3452_v52, %v1562_v18 }
 0x13e   : > { %v3000_v26 = vpop.f32.mrb[35].mxu1  ;;  %v1394_v27 = vpop.f32.mrb[28].mxu0 }
 0x13f   : > { %v1597_v12 = vmul.f32 1.442695, %v1586_v22  ;;  %v1587_v29 = vsub.f32 0.0, %v1578_v23  ;;  %v1420_v30 = vadd.f32 %v1394_v27, %v3439_v24  ;;  %v2967_v32 = vpop.f32.mrb[29].mxu0 }
 0x140   : > { %v1397_v43 = vpop.f32.mrb[30].mxu0 }
 0x141   : > { %3057 = vpow2.f32 %v1597_v12  ;;  %v1599_v16 = vmul.f32 1.442695, %v1587_v29  ;;  %v1563_v33 = vadd.f32 %v1537_v57, %v1420_v30  ;;  %v1421_v31 = vadd.f32 %v1397_v43, %v3441_v28  ;;  %v2968_v58 = vpop.f32.mrb[31].mxu0 }
 0x143   : > { %v1553_v3 = vpop.f32.mrb[36].mxu1  ;;  %v3054_v34 = vpop.eup %3053  ;;  %3059 = vpow2.f32 %v1599_v16  ;;  %v1579_v35 = vadd.f32 %v3452_v52, %v1563_v33  ;;  %v1564_v25 = vadd.f32 %v1540_v62, %v1421_v31 }
 0x144   : > { %v3003_v36 = vpop.f32.mrb[37].mxu1  ;;  %v1611_v37 = vadd.f32 1.0, %v3054_v34 }
 0x145   : > { %v1556_v38 = vpop.f32.mrb[38].mxu1  ;;  %v3056_v41 = vpop.eup %3055  ;;  %v1588_v42 = vsub.f32 0.0, %v1579_v35  ;;  %v1580_v24 = vadd.f32 %v3452_v52, %v1564_v25 }
 0x146   : > { %v3004_v44 = vpop.f32.mrb[39].mxu1  ;;  %3061 = vrcp.f32 %v1611_v37  ;;  %v1612_v45 = vadd.f32 1.0, %v3056_v41  ;;  %v1402_v46 = vpop.f32.mrb[32].mxu0 }
 0x147   : > { %v1601_v47 = vmul.f32 1.442695, %v1588_v42  ;;  %v1589_v28 = vsub.f32 0.0, %v1580_v24  ;;  %v1422_v48 = vadd.f32 %v1402_v46, %v3443_v40  ;;  %v2971_v49 = vpop.f32.mrb[33].mxu0 }
 0x148   : > { %3063 = vrcp.f32 %v1612_v45  ;;  %v1405_v50 = vpop.f32.mrb[34].mxu0 }
 0x149   : > { %3065 = vpow2.f32 %v1601_v47  ;;  %v1603_v51 = vmul.f32 1.442695, %v1589_v28  ;;  %v1565_v53 = vadd.f32 %v1545_v15, %v1422_v48  ;;  %v1423_v54 = vadd.f32 %v1405_v50, %v3445_v14  ;;  %v2972_v55 = vpop.f32.mrb[35].mxu0 }
 0x14b   : > { %v3058_v56 = vpop.eup %3057  ;;  %3067 = vpow2.f32 %v1603_v51  ;;  %v1581_v57 = vadd.f32 %v3452_v52, %v1565_v53  ;;  %v1566_v59 = vadd.f32 %v1548_v20, %v1423_v54 }
 0x14c   : > { %v1613_v60 = vadd.f32 1.0, %v3058_v56 }
 0x14d   : > { %v3060_v61 = vpop.eup %3059  ;;  %v1590_v62 = vsub.f32 0.0, %v1581_v57  ;;  %v1582_v63 = vadd.f32 %v3452_v52, %v1566_v59 }
 0x14e   : > { %v1614_v40 = vadd.f32 1.0, %v3060_v61  ;;  %v1410_v0 = vpop.f32.mrb[36].mxu0  ;;  %3069 = vrcp.f32 %v1613_v60 }
 0x14f   : > { %v1605_v2 = vmul.f32 1.442695, %v1590_v62  ;;  %v1591_v4 = vsub.f32 0.0, %v1582_v63  ;;  %v1424_v5 = vadd.f32 %v1410_v0, %v3447_v39  ;;  %v2975_v7 = vpop.f32.mrb[37].mxu0 }
 0x150   : > { %v3062_v14 = vpop.eup %3061  ;;  %v1413_v1 = vpop.f32.mrb[38].mxu0  ;;  %3071 = vrcp.f32 %v1614_v40 }
 0x151   : > { %v1638_v8 = vcombine.high %v3062_v14, %v3062_v14  ;;  %v1645_v9 = vrot.slane %v3062_v14, %v3210_v21  ;;  %v1607_v10 = vmul.f32 1.442695, %v1591_v4  ;;  %v2976_v6 = vpop.f32.mrb[39].mxu0  ;;  %3073 = vpow2.f32 %v1605_v2 }
 0x152   : > { %v3064_v11 = vpop.eup %3063  ;;  %v1567_v13 = vadd.f32 %v1553_v3, %v1424_v5 }
 0x153   : > { %v3066_v15 = vpop.eup %3065  ;;  %v1652_v17 = vrot.slane %v1638_v8, %v3210_v21  ;;  %v1653_v18 = vcombine.high %v1645_v9, %v1645_v9  ;;  %v1661_v39 = vrot.slane %v1645_v9, %v3210_v21  ;;  %v1687_v19 = vcombine.high %v3064_v11, %v3064_v11 }
 0x154   : > { %v1694_v20 = vrot.slane %v3064_v11, %v3210_v21  ;;  %v1615_v22 = vadd.f32 1.0, %v3066_v15  ;;  %3075 = vpow2.f32 %v1607_v10  ;;  %v3472_v23 = vadd.f32 %v3452_v52, %v1567_v13 }
 0x155   : > { %v3068_v26 = vpop.eup %3067  ;;  %v1654_v27 = vcombine.high %v1652_v17, %v1652_v17  ;;  %v1668_v12 = vrot.slane %v1652_v17, %v3210_v21  ;;  %v1675_v29 = vrot.slane %v1653_v18, %v3210_v21  ;;  %v1701_v30 = vrot.slane %v1687_v19, %v3210_v21 }
 0x156   : > { %v1702_v32 = vcombine.high %v1694_v20, %v1694_v20  ;;  %v1710_v43 = vrot.slane %v1694_v20, %v3210_v21  ;;  %3077 = vrcp.f32 %v1615_v22  ;;  %v3479_v16 = vadd.f32 1.0, %v3068_v26 }
 0x157   : > { %v1682_v33 = vrot.slane %v1654_v27, %v3210_v21  ;;  %v2079_v31 = vcombine.low %v1661_v39, %v1675_v29  ;;  %v2844_v52 = vcombine.high %v1661_v39, %v1675_v29  ;;  %v1703_v58 = vcombine.high %v1701_v30, %v1701_v30 }
 0x158   : > { %v1717_v3 = vrot.slane %v1701_v30, %v3210_v21  ;;  %v1724_v34 = vrot.slane %v1702_v32, %v3210_v21  ;;  %v1732_v35 = vcombine.high %v1710_v43, %v1710_v43  ;;  %v2134_v25 = vrot.slane %v1710_v43, %v3210_v21  ;;  %v3070_v36 = vpop.eup %3069 }
 0x159   : > { %v2081_v37 = vcombine.low %v1668_v12, %v1682_v33  ;;  %v2845_v38 = vcombine.high %v1668_v12, %v1682_v33  ;;  %v2089_v41 = vrot.slane %v2079_v31, %v3210_v21  ;;  %v2096_v42 = vrot.slane %v2844_v52, %v3210_v21 }
 0x15a   : > { %v1731_v24 = vrot.slane %v1703_v58, %v3210_v21  ;;  %v1733_v44 = vcombine.high %v1717_v3, %v1717_v3  ;;  %v1734_v45 = vcombine.high %v1724_v34, %v1724_v34  ;;  %v2141_v46 = vrot.slane %v2134_v25, %v3210_v21  ;;  %v3072_v47 = vpop.eup %3071 }
 0x15b   : > { %v2103_v28 = vrot.slane %v2081_v37, %v3210_v21  ;;  %v2110_v48 = vrot.slane %v2845_v38, %v3210_v21  ;;  %v2111_v49 = vcombine.low %v2089_v41, %v2096_v42  ;;  %v2142_v50 = vcombine.low %v1724_v34, %v1732_v35  ;;  %v3496_v51 = vpop.eup %3073 }
 0x15c   : > { %v2143_v53 = vcombine.low %v1734_v45, %v1717_v3  ;;  %v2144_v54 = vcombine.low %v1731_v24, %v1733_v44  ;;  %2602 = vst.msk [vmem:[%s3488_s19 + $0x8] sm:$0x1] %vm2601_vm9, %v2141_v46  ;;  %v1735_v55 = vcombine.high %v1731_v24, %v1731_v24  ;;  %v1736_v56 = vcombine.high %v3070_v36, %v3070_v36 }
 0x15d   : > { %v2112_v57 = vcombine.low %v2103_v28, %v2110_v48  ;;  %v2119_v59 = vrot.slane %v2111_v49, %v3210_v21  ;;  %v2152_v60 = vrot.slane %v2142_v50, %v3210_v21  ;;  %v1743_v61 = vrot.slane %v3070_v36, %v3210_v21 }
 0x15e   : > { %v3503_v62 = vpop.eup %3075  ;;  %v2159_v63 = vrot.slane %v2143_v53, %v3210_v21  ;;  %v1750_v40 = vrot.slane %v1736_v56, %v3210_v21  ;;  %v2166_v0 = vrot.slane %v2144_v54, %v3210_v21  ;;  %v1785_v2 = vcombine.high %v3072_v47, %v3072_v47 }
 0x15f   : > { %v2126_v4 = vrot.slane %v2112_v57, %v3210_v21  ;;  %v1751_v5 = vcombine.high %v1743_v61, %v1743_v61  ;;  %v1759_v7 = vrot.slane %v1743_v61, %v3210_v21  ;;  %v1792_v14 = vrot.slane %v3072_v47, %v3210_v21 }
 0x160   : > { %v3078_v1 = vpop.eup %3077  ;;  %v2174_v8 = vcombine.low %v2152_v60, %v2159_v63  ;;  %v1752_v9 = vcombine.high %v1750_v40, %v1750_v40  ;;  %v1766_v10 = vrot.slane %v1750_v40, %v3210_v21  ;;  %v1799_v6 = vrot.slane %v1785_v2, %v3210_v21 }
 0x161   : > { %v2127_v11 = vcombine.low %v2119_v59, %v2126_v4  ;;  %v1773_v13 = vrot.slane %v1751_v5, %v3210_v21  ;;  %v2145_v15 = vcombine.low %v1735_v55, %v1759_v7  ;;  %v1800_v17 = vcombine.high %v1792_v14, %v1792_v14 }
 0x162   : > { %v2182_v18 = vrot.slane %v2174_v8, %v3210_v21  ;;  %v1780_v39 = vrot.slane %v1752_v9, %v3210_v21  ;;  %v1801_v19 = vcombine.high %v1799_v6, %v1799_v6  ;;  %v1808_v20 = vrot.slane %v1792_v14, %v3210_v21 }
 0x163   : > { %2600 = vst.msk [vmem:[%s3488_s19] sm:$0xff] %vm2599_vm10, %v2127_v11  ;;  %v2173_v22 = vrot.slane %v2145_v15, %v3210_v21  ;;  %v2197_v26 = vrot.slane %v1773_v13, %v3210_v21  ;;  %v2846_v27 = vcombine.high %v1759_v7, %v1773_v13  ;;  %v1815_v12 = vrot.slane %v1799_v6, %v3210_v21 }
 0x164   : > { %v2206_v29 = vcombine.low %v1766_v10, %v1780_v39  ;;  %v2847_v30 = vcombine.high %v1766_v10, %v1780_v39  ;;  %v1822_v32 = vrot.slane %v1800_v17, %v3210_v21  ;;  %v1829_v43 = vrot.slane %v1801_v19, %v3210_v21 }
 0x165   : > { %v2175_v33 = vcombine.low %v2166_v0, %v2173_v22  ;;  %v2204_v31 = vrot.slane %v2197_v26, %v3210_v21  ;;  %v2215_v52 = vrot.slane %v2846_v27, %v3210_v21  ;;  %v1830_v58 = vcombine.high %v1808_v20, %v1808_v20 }
 0x166   : > { %v2222_v3 = vrot.slane %v2206_v29, %v3210_v21  ;;  %v2229_v34 = vrot.slane %v2847_v30, %v3210_v21  ;;  %v1831_v35 = vcombine.high %v1815_v12, %v1815_v12  ;;  %v1832_v25 = vcombine.high %v1822_v32, %v1822_v32 }
 0x167   : > { %v2189_v36 = vrot.slane %v2175_v33, %v3210_v21  ;;  %2604 = vst.msk [vmem:[%s3488_s19 + $0x18] sm:$0x1] %vm2601_vm9, %v2204_v31  ;;  %v2208_v37 = vcombine.low %v1808_v20, %v1822_v32  ;;  %v2260_v38 = vrot.slane %v1830_v58, %v3210_v21  ;;  %v1833_v41 = vcombine.high %v1829_v43, %v1829_v43 }
 0x168   : > { %v2237_v42 = vcombine.low %v2215_v52, %v2222_v3  ;;  %v2268_v24 = vcombine.low %v1832_v25, %v1815_v12  ;;  %v2269_v44 = vcombine.low %v1829_v43, %v1831_v35  ;;  %v1834_v45 = vcombine.high %v3078_v1, %v3078_v1 }
 0x169   : > { %v2190_v46 = vcombine.low %v2182_v18, %v2189_v36  ;;  %v2236_v47 = vrot.slane %v2208_v37, %v3210_v21  ;;  %v2267_v28 = vrot.slane %v2260_v38, %v3210_v21  ;;  %v1841_v48 = vrot.slane %v3078_v1, %v3210_v21 }
 0x16a   : > { %v2245_v49 = vrot.slane %v2237_v42, %v3210_v21  ;;  %v1848_v50 = vrot.slane %v1834_v45, %v3210_v21  ;;  %3079 = vrcp.f32 %v3479_v16  ;;  %v2278_v56 = vrot.slane %v2268_v24, %v3210_v21 }
 0x16b   : > { %2603 = vst.msk [vmem:[%s3488_s19 + $0x10] sm:$0xff] %vm2599_vm10, %v2190_v46  ;;  %v2238_v53 = vcombine.low %v2229_v34, %v2236_v47  ;;  %v1849_v54 = vcombine.high %v1841_v48, %v1841_v48  ;;  %v1857_v55 = vrot.slane %v1841_v48, %v3210_v21  ;;  %v2285_v57 = vrot.slane %v2269_v44, %v3210_v21 }
 0x16c   : > { %2606 = vst.msk [vmem:[%s3488_s19 + $0x28] sm:$0x1] %vm2601_vm9, %v2267_v28  ;;  %v1850_v59 = vcombine.high %v1848_v50, %v1848_v50  ;;  %v1617_v60 = vadd.f32 1.0, %v3496_v51  ;;  %v1864_v2 = vrot.slane %v1848_v50, %v3210_v21  ;;  %v1618_v16 = vadd.f32 1.0, %v3503_v62 }
 0x16d   : > { %v2252_v61 = vrot.slane %v2238_v53, %v3210_v21  ;;  %v1871_v63 = vrot.slane %v1849_v54, %v3210_v21  ;;  %v1879_v40 = vcombine.high %v1857_v55, %v1857_v55  ;;  %v2270_v0 = vcombine.low %v1833_v41, %v1857_v55 }
 0x16e   : > { %v1878_v4 = vrot.slane %v1850_v59, %v3210_v21  ;;  %3081 = vrcp.f32 %v1617_v60  ;;  %v1592_v51 = vsub.f32 0.0, %v3472_v23  ;;  %v2300_v9 = vcombine.low %v2278_v56, %v2285_v57 }
 0x16f   : > { %v2253_v5 = vcombine.low %v2245_v49, %v2252_v61  ;;  %v1881_v7 = vcombine.high %v1871_v63, %v1871_v63  ;;  %v2271_v14 = vcombine.low %v1871_v63, %v1879_v40  ;;  %3083 = vrcp.f32 %v1618_v16 }
 0x170   : > { %v2331_v1 = vcombine.low %v1864_v2, %v1878_v4  ;;  %v2848_v8 = vcombine.high %v1864_v2, %v1878_v4  ;;  %v2292_v10 = vrot.slane %v2270_v0, %v3210_v21  ;;  %v1609_v18 = vmul.f32 1.442695, %v1592_v51 }
 0x171   : > { %2605 = vst.msk [vmem:[%s3488_s19 + $0x20] sm:$0xff] %vm2599_vm10, %v2253_v5  ;;  %v2299_v6 = vrot.slane %v2271_v14, %v3210_v21  ;;  %v2323_v11 = vrot.slane %v1881_v7, %v3210_v21  ;;  %v2308_v23 = vrot.slane %v2300_v9, %v3210_v21 }
 0x172   : > { %v2341_v62 = vrot.slane %v2331_v1, %v3210_v21  ;;  %v2348_v13 = vrot.slane %v2848_v8, %v3210_v21  ;;  %3085 = vpow2.f32 %v1609_v18 }
 0x173   : > { %v2301_v15 = vcombine.low %v2292_v10, %v2299_v6  ;;  %v2330_v17 = vrot.slane %v2323_v11, %v3210_v21 }
 0x174   : > { %v3080_v39 = vpop.eup %3079  ;;  %v2363_v20 = vcombine.low %v2341_v62, %v2348_v13 }
 0x175   : > { %v2315_v19 = vrot.slane %v2301_v15, %v3210_v21  ;;  %2608 = vst.msk [vmem:[%s3488_s19 + $0x38] sm:$0x1] %vm2601_vm9, %v2330_v17  ;;  %v1883_v22 = vcombine.high %v3080_v39, %v3080_v39  ;;  %v1890_v26 = vrot.slane %v3080_v39, %v3210_v21 }
 0x176   : > { %v2371_v32 = vrot.slane %v2363_v20, %v3210_v21 }
 0x177   : > { %v2316_v27 = vcombine.low %v2308_v23, %v2315_v19  ;;  %v1897_v29 = vrot.slane %v1883_v22, %v3210_v21  ;;  %v1898_v30 = vcombine.high %v1890_v26, %v1890_v26  ;;  %v1906_v58 = vrot.slane %v1890_v26, %v3210_v21 }
 0x178   : > { %v3082_v12 = vpop.eup %3081 }
 0x179   : > { %2607 = vst.msk [vmem:[%s3488_s19 + $0x30] sm:$0xff] %vm2599_vm10, %v2316_v27  ;;  %v1932_v43 = vcombine.high %v3082_v12, %v3082_v12  ;;  %v1939_v33 = vrot.slane %v3082_v12, %v3210_v21  ;;  %v3084_v31 = vpop.eup %3083  ;;  %v1899_v52 = vcombine.high %v1897_v29, %v1897_v29  ;;  %v1913_v3 = vrot.slane %v1897_v29, %v3210_v21 }
 0x17a   : > { %v1920_v34 = vrot.slane %v1898_v30, %v3210_v21  ;;  %v1981_v37 = vcombine.high %v3084_v31, %v3084_v31  ;;  %v1988_v61 = vrot.slane %v3084_v31, %v3210_v21 }
 0x17b   : > { %v1946_v35 = vrot.slane %v1932_v43, %v3210_v21  ;;  %v1947_v25 = vcombine.high %v1939_v33, %v1939_v33  ;;  %v1955_v36 = vrot.slane %v1939_v33, %v3210_v21  ;;  %v1927_v38 = vrot.slane %v1899_v52, %v3210_v21 }
 0x17c   : > { %v1929_v41 = vcombine.high %v1913_v3, %v1913_v3  ;;  %v2333_v42 = vcombine.low %v1906_v58, %v1920_v34  ;;  %v2849_v24 = vcombine.high %v1906_v58, %v1920_v34  ;;  %v2386_v44 = vrot.slane %v1913_v3, %v3210_v21  ;;  %v3086_v4 = vpop.eup %3085 }
 0x17d   : > { %v1948_v45 = vcombine.high %v1946_v35, %v1946_v35  ;;  %v1962_v46 = vrot.slane %v1946_v35, %v3210_v21  ;;  %v1969_v47 = vrot.slane %v1947_v25, %v3210_v21  ;;  %v1931_v50 = vcombine.high %v1927_v38, %v1927_v38 }
 0x17e   : > { %v2355_v28 = vrot.slane %v2333_v42, %v3210_v21  ;;  %v2362_v48 = vrot.slane %v2849_v24, %v3210_v21  ;;  %v2394_v49 = vcombine.low %v1927_v38, %v1929_v41  ;;  %v2393_v53 = vrot.slane %v2386_v44, %v3210_v21 }
 0x17f   : > { %v1976_v54 = vrot.slane %v1948_v45, %v3210_v21  ;;  %v1977_v55 = vcombine.high %v1955_v36, %v1955_v36  ;;  %v1979_v56 = vcombine.high %v1969_v47, %v1969_v47  ;;  %v2395_v59 = vcombine.low %v1931_v50, %v1955_v36 }
 0x180   : > { %v2364_v57 = vcombine.low %v2355_v28, %v2362_v48  ;;  %v2404_v60 = vrot.slane %v2394_v49, %v3210_v21  ;;  %2610 = vst.msk [vmem:[%s3488_s19 + $0x48] sm:$0x1] %vm2601_vm9, %v2393_v53  ;;  %v1995_v7 = vrot.slane %v1981_v37, %v3210_v21  ;;  %v1996_v14 = vcombine.high %v1988_v61, %v1988_v61 }
 0x181   : > { %v2396_v63 = vcombine.low %v1969_v47, %v1977_v55  ;;  %v2397_v40 = vcombine.low %v1979_v56, %v1962_v46  ;;  %v2449_v0 = vrot.slane %v1976_v54, %v3210_v21  ;;  %v2850_v2 = vcombine.high %v1962_v46, %v1976_v54 }
 0x182   : > { %v2378_v16 = vrot.slane %v2364_v57, %v3210_v21  ;;  %v2411_v5 = vrot.slane %v2395_v59, %v3210_v21  ;;  %v1997_v6 = vcombine.high %v1995_v7, %v1995_v7  ;;  %v2004_v11 = vrot.slane %v1988_v61, %v3210_v21 }
 0x183   : > { %v2418_v1 = vrot.slane %v2396_v63, %v3210_v21  ;;  %v2425_v8 = vrot.slane %v2397_v40, %v3210_v21  ;;  %v2456_v51 = vrot.slane %v2449_v0, %v3210_v21  ;;  %v2011_v13 = vrot.slane %v1995_v7, %v3210_v21 }
 0x184   : > { %v2379_v9 = vcombine.low %v2371_v32, %v2378_v16  ;;  %v2426_v10 = vcombine.low %v2404_v60, %v2411_v5  ;;  %v2018_v15 = vrot.slane %v1996_v14, %v3210_v21  ;;  %v1619_v17 = vadd.f32 1.0, %v3086_v4 }
 0x185   : > { %v2427_v62 = vcombine.low %v2418_v1, %v2425_v8  ;;  %2612 = vst.msk [vmem:[%s3488_s19 + $0x58] sm:$0x1] %vm2601_vm9, %v2456_v51  ;;  %v2467_v39 = vrot.slane %v2850_v2, %v3210_v21  ;;  %v2025_v23 = vrot.slane %v1997_v6, %v3210_v21  ;;  %v2027_v20 = vcombine.high %v2011_v13, %v2011_v13 }
 0x186   : > { %2609 = vst.msk [vmem:[%s3488_s19 + $0x40] sm:$0xff] %vm2599_vm10, %v2379_v9  ;;  %v2434_v18 = vrot.slane %v2426_v10, %v3210_v21  ;;  %v2458_v22 = vcombine.low %v2004_v11, %v2018_v15  ;;  %v2851_v26 = vcombine.high %v2004_v11, %v2018_v15  ;;  %3087 = vrcp.f32 %v1619_v17 }
 0x187   : > { %v2441_v19 = vrot.slane %v2427_v62, %v3210_v21  ;;  %v2460_v27 = vcombine.low %v2011_v13, %v2025_v23  ;;  %v2512_v30 = vrot.slane %v2027_v20, %v3210_v21  ;;  %v2029_v37 = vcombine.high %v2025_v23, %v2025_v23 }
 0x188   : > { %v2474_v29 = vrot.slane %v2458_v22, %v3210_v21  ;;  %v2481_v32 = vrot.slane %v2851_v26, %v3210_v21 }
 0x189   : > { %v2442_v12 = vcombine.low %v2434_v18, %v2441_v19  ;;  %v2488_v43 = vrot.slane %v2460_v27, %v3210_v21  ;;  %v2519_v31 = vrot.slane %v2512_v30, %v3210_v21 }
 0x18a   : > { %v2489_v33 = vcombine.low %v2467_v39, %v2474_v29 }
 0x18b   : > { %2611 = vst.msk [vmem:[%s3488_s19 + $0x50] sm:$0xff] %vm2599_vm10, %v2442_v12  ;;  %v2490_v52 = vcombine.low %v2481_v32, %v2488_v43 }
 0x18c   : > { %2614 = vst.msk [vmem:[%s3488_s19 + $0x68] sm:$0x1] %vm2601_vm9, %v2519_v31  ;;  %v2497_v58 = vrot.slane %v2489_v33, %v3210_v21 }
 0x18d   : > { %v2504_v3 = vrot.slane %v2490_v52, %v3210_v21 }
 0x18f   : > { %v2505_v34 = vcombine.low %v2497_v58, %v2504_v3 }
 0x190   : > { %v3088_v35 = vpop.eup %3087 }
 0x191   : > { %2613 = vst.msk [vmem:[%s3488_s19 + $0x60] sm:$0xff] %vm2599_vm10, %v2505_v34  ;;  %v2030_v25 = vcombine.high %v3088_v35, %v3088_v35  ;;  %v2037_v36 = vrot.slane %v3088_v35, %v3210_v21 }
 0x193   : > { %v2044_v38 = vrot.slane %v2030_v25, %v3210_v21  ;;  %v2045_v41 = vcombine.high %v2037_v36, %v2037_v36  ;;  %v2053_v42 = vrot.slane %v2037_v36, %v3210_v21 }
 0x195   : > { %v2046_v24 = vcombine.high %v2044_v38, %v2044_v38  ;;  %v2060_v44 = vrot.slane %v2044_v38, %v3210_v21  ;;  %v2067_v45 = vrot.slane %v2045_v41, %v3210_v21  ;;  %v2075_v46 = vcombine.high %v2053_v42, %v2053_v42 }
 0x196   : > { %v2520_v47 = vcombine.low %v2029_v37, %v2053_v42 }
 0x197   : > { %v2074_v28 = vrot.slane %v2046_v24, %v3210_v21  ;;  %v2076_v48 = vcombine.high %v2060_v44, %v2060_v44  ;;  %v2077_v49 = vcombine.high %v2067_v45, %v2067_v45  ;;  %v2521_v50 = vcombine.low %v2067_v45, %v2075_v46 }
 0x198   : > { %v2530_v53 = vrot.slane %v2520_v47, %v3210_v21 }
 0x199   : > { %v2078_v54 = vcombine.high %v2074_v28, %v2074_v28  ;;  %v2522_v55 = vcombine.low %v2077_v49, %v2060_v44  ;;  %v2523_v56 = vcombine.low %v2074_v28, %v2076_v48  ;;  %v2537_v57 = vrot.slane %v2521_v50, %v3210_v21 }
 0x19b   : > { %v2544_v59 = vrot.slane %v2522_v55, %v3210_v21  ;;  %v2551_v60 = vrot.slane %v2523_v56, %v3210_v21  ;;  %v2552_v61 = vcombine.low %v2530_v53, %v2537_v57  ;;  %v2575_v63 = vrot.slane %v2078_v54, %v3210_v21 }
 0x19d   : > { %v2553_v40 = vcombine.low %v2544_v59, %v2551_v60  ;;  %v2582_v0 = vrot.slane %v2575_v63, %v3210_v21  ;;  %v2560_v2 = vrot.slane %v2552_v61, %v3210_v21 }
 0x19f   : > { %v2567_v4 = vrot.slane %v2553_v40, %v3210_v21  ;;  %2616 = vst.msk [vmem:[%s3488_s19 + $0x78] sm:$0x1] %vm2601_vm9, %v2582_v0 }
 0x1a1   : > { %v2568_v16 = vcombine.low %v2560_v2, %v2567_v4 }
 0x1a3   : > { %2615 = vst.msk [vmem:[%s3488_s19 + $0x70] sm:$0xff] %vm2599_vm10, %v2568_v16 }
 0x1a4 PF: > { %s14_s17 = sadd.s32 1, %s3111_s17   ;;  %s3650_s15 = smov %s3107_s16 }
 0x1a5   : > { %p11_p5 = scmp.ge.s32.totalorder %s14_s17, 4   ;;  %s3651_s16 = smov %s3653_s18 }
 0x1a7   :  { %13 = sbr.rel (!%p11_p5) target bundleno = 2 (0x2), region = 72 }

</bundles_post_ra>
